<compile_context>
chip_gen: v7x
topology: tpu7x:2x2x1
jax: 0.10.0
libtpu: 0.0.40
codegen_flags: <defaults>
</compile_context>

<pallas_src>
import jax
import jax.numpy as jnp
from jax.experimental import pallas as pl
from jax.experimental.pallas import tpu as pltpu

HIDDEN_SIZE = 256          # matches the module's hidden_size
VOCAB_SIZE = 2             # word_to_index = {'SOS': 0, 'EOS': 1}


def _gru_seq_kernel(tok_ref,   # SMEM (T,)       int32 token ids
                    gi_ref,    # VMEM (V, 1, 3H) f32   precomputed  x @ W_ih^T + b_ih  per vocab row
                    h0_ref,    # VMEM (1, H)     f32   initial hidden
                    whh_ref,   # VMEM (H, 3H)    f32   W_hh^T (recurrent weight)
                    bhh_ref,   # VMEM (1, 3H)    f32   b_hh
                    out_ref):  # VMEM (T, H)     f32   per-step GRU output (== hidden)
    T, H = out_ref.shape
    h = h0_ref[...]                                   # (1, H) f32, carried in vregs

    # Seq2seq sentences are short -> statically unroll the time loop (T is a
    # trace-time constant).  Every slice/store below is static; the only
    # dynamic access is the per-token row gather from the gi table.
    # TODO(synk): for long sequences switch to lax.fori_loop with a dynamic
    # row store (out_ref[pl.ds(t, 1), :]) to bound code size.
    for t in range(T):
        gi = gi_ref[tok_ref[t]]                       # (1, 3H)  x-side gates of token t
        gh = jnp.dot(h, whh_ref[...],
                     preferred_element_type=jnp.float32) + bhh_ref[...]   # (1, 3H)

        # PyTorch GRU gate order: reset | update | new.  All gate math in f32
        # (v5e VPU/EUP have no bf16 path).
        r = jax.nn.sigmoid(gi[:, 0:H] + gh[:, 0:H])
        z = jax.nn.sigmoid(gi[:, H:2 * H] + gh[:, H:2 * H])
        n = jnp.tanh(gi[:, 2 * H:3 * H] + r * gh[:, 2 * H:3 * H])
        h = (1.0 - z) * n + z * h

        out_ref[pl.ds(t, 1), :] = h                   # static row store into the (T, H) slab


def prepare_params(params):
    """One-time parameter preparation (hoisted out of the per-call path)."""
    H = params["w_hh"].shape[1]
    hi = jax.lax.Precision.HIGHEST
    emb = params["embedding"].astype(jnp.float32)
    # Precompute the input-side projection for every vocab row: (V, 3H).
    # NOTE(v7x): for a realistic vocab this table should stay in HBM
    # (memory_space=pl.ANY) with per-row DMA gathers; at V=2 it is ~6 KiB and
    # safely VMEM-resident on every generation.
    gi_tab = jnp.dot(emb, params["w_ih"].astype(jnp.float32).T,
                     precision=hi) + params["b_ih"].astype(jnp.float32)
    return {
        "hidden_size": H,
        "gi_tab": gi_tab[:, None, :].astype(jnp.float32),          # (V, 1, 3H)
        "whh_t": params["w_hh"].astype(jnp.float32).T,             # (H, 3H)
        "bhh": params["b_hh"].astype(jnp.float32).reshape(1, 3 * H),
    }


def encoder_forward_sequence(tokens, hidden0, prep):
    """Run the encoder over a whole token sequence in ONE gridless pallas_call.

    tokens: (T,) int32;  hidden0: (1,1,H) f32
    returns (outputs (T,1,H), hidden (1,1,H)) -- PyTorch GRU conventions.
    """
    H = prep["hidden_size"]
    toks = jnp.asarray(tokens, jnp.int32).reshape(-1)
    T = int(toks.shape[0])
    h0 = hidden0.reshape(1, H).astype(jnp.float32)

    outs2d = pl.pallas_call(
        _gru_seq_kernel,
        out_shape=jax.ShapeDtypeStruct((T, H), jnp.float32),
        in_specs=[
            pl.BlockSpec(memory_space=pltpu.MemorySpace.SMEM),   # token ids
            pl.BlockSpec(memory_space=pltpu.MemorySpace.VMEM),   # gi table (V, 1, 3H)
            pl.BlockSpec(memory_space=pltpu.MemorySpace.VMEM),   # h0       (1, H)
            pl.BlockSpec(memory_space=pltpu.MemorySpace.VMEM),   # W_hh^T   (H, 3H)
            pl.BlockSpec(memory_space=pltpu.MemorySpace.VMEM),   # b_hh     (1, 3H)
        ],
        out_specs=pl.BlockSpec(memory_space=pltpu.MemorySpace.VMEM),
    )(toks, prep["gi_tab"], h0, prep["whh_t"], prep["bhh"])

    outs = outs2d.reshape(T, 1, H)
    hidden = outs2d[T - 1].reshape(1, 1, H)
    return outs, hidden


def encoder_forward(token, hidden, prep):
    """Single-step API matching Encoder.forward(input, hidden) -> (output, hidden)."""
    H = prep["hidden_size"]
    outs, hid = encoder_forward_sequence(
        jnp.asarray(token, jnp.int32).reshape(1), hidden, prep)
    return outs.reshape(1, 1, H), hid


def init_params(key, vocab, hidden):
    """Deterministic synthetic params matching nn.Embedding + nn.GRU shapes."""
    k_emb, k_wih, k_whh, k_bih, k_bhh = jax.random.split(key, 5)
    bound = 1.0 / jnp.sqrt(hidden)
    u = lambda k, shape: jax.random.uniform(k, shape, jnp.float32, -bound, bound)
    return {
        "embedding": jax.random.normal(k_emb, (vocab, hidden), jnp.float32),
        "w_ih": u(k_wih, (3 * hidden, hidden)),     # PyTorch weight_ih_l0
        "w_hh": u(k_whh, (3 * hidden, hidden)),     # PyTorch weight_hh_l0
        "b_ih": u(k_bih, (3 * hidden,)),
        "b_hh": u(k_bhh, (3 * hidden,)),
    }


def _reference_forward_sequence(tokens, hidden0, params):
    """Pure-JAX f32 reference of the PyTorch Encoder run over a sequence."""
    H = params["w_hh"].shape[1]
    hi = jax.lax.Precision.HIGHEST
    h = hidden0.reshape(1, H).astype(jnp.float32)
    outs = []
    for tok in list(jnp.asarray(tokens, jnp.int32).reshape(-1)):
        x = params["embedding"][tok].reshape(1, H)
        gi = jnp.dot(x, params["w_ih"].T, precision=hi) + params["b_ih"]
        gh = jnp.dot(h, params["w_hh"].T, precision=hi) + params["b_hh"]
        r = jax.nn.sigmoid(gi[:, :H] + gh[:, :H])
        z = jax.nn.sigmoid(gi[:, H:2 * H] + gh[:, H:2 * H])
        n = jnp.tanh(gi[:, 2 * H:] + r * gh[:, 2 * H:])
        h = (1.0 - z) * n + z * h
        outs.append(h)
    out = jnp.stack(outs, axis=0).reshape(len(outs), 1, H)
    return out, h.reshape(1, 1, H)


if __name__ == "__main__":
    key = jax.random.PRNGKey(0)
    params = init_params(key, VOCAB_SIZE, HIDDEN_SIZE)
    prep = prepare_params(params)          # one-time gi-table / W_hh^T prep

    # Small sequence over the toy vocabulary {SOS=0, EOS=1}.
    tokens = jnp.array([0, 1, 0, 0, 1, 1, 0, 1], dtype=jnp.int32)       # T = 8
    hidden0 = jnp.zeros((1, 1, HIDDEN_SIZE), jnp.float32)               # Encoder.initHidden()

    outs, hid = encoder_forward_sequence(tokens, hidden0, prep)
    jax.block_until_ready((outs, hid))

    ref_outs, ref_hid = _reference_forward_sequence(tokens, hidden0, params)
    assert outs.shape == (tokens.shape[0], 1, HIDDEN_SIZE)
    assert hid.shape == (1, 1, HIDDEN_SIZE)
    assert jnp.allclose(outs, ref_outs, atol=2e-2), (
        "sequence output mismatch, max|diff|=%f" % float(jnp.max(jnp.abs(outs - ref_outs))))
    assert jnp.allclose(hid, ref_hid, atol=2e-2), (
        "hidden mismatch, max|diff|=%f" % float(jnp.max(jnp.abs(hid - ref_hid))))

    # Single-step API, matching Encoder.forward(input, hidden) exactly.
    out1, hid1 = encoder_forward(jnp.array(1, dtype=jnp.int32), hidden0, prep)
    jax.block_until_ready((out1, hid1))
    ref1_out, ref1_hid = _reference_forward_sequence(jnp.array([1], jnp.int32), hidden0, params)
    assert out1.shape == (1, 1, HIDDEN_SIZE) and hid1.shape == (1, 1, HIDDEN_SIZE)
    assert jnp.allclose(out1, ref1_out.reshape(1, 1, HIDDEN_SIZE), atol=2e-2)
    assert jnp.allclose(hid1, ref1_hid, atol=2e-2)

    print("KERNEL_OK")
</pallas_src>

<mosaic_0001>
module attributes {stable_mosaic.version = 11 : i64} {
  func.func @_gru_seq_kernel(%arg0: memref<8xi32, #tpu.memory_space<smem>>, %arg1: memref<2x1x768xf32, #tpu.memory_space<vmem>>, %arg2: memref<1x256xf32, #tpu.memory_space<vmem>>, %arg3: memref<256x768xf32, #tpu.memory_space<vmem>>, %arg4: memref<1x768xf32, #tpu.memory_space<vmem>>, %arg5: memref<8x256xf32, #tpu.memory_space<vmem>>) attributes {dimension_semantics = [], scalar_prefetch = 0 : i64, scratch_operands = 0 : i64, tpu.core_type = #tpu.core_type<tc>} {
    %c0 = arith.constant 0 : index
    %c0_0 = arith.constant 0 : index
    %0 = vector.load %arg2[%c0, %c0_0] : memref<1x256xf32, #tpu.memory_space<vmem>>, vector<1x256xf32>
    %c0_1 = arith.constant 0 : index
    %1 = memref.load %arg0[%c0_1] : memref<8xi32, #tpu.memory_space<smem>>
    %2 = arith.index_cast %1 : i32 to index
    %c0_2 = arith.constant 0 : index
    %c0_3 = arith.constant 0 : index
    %3 = vector.load %arg1[%2, %c0_2, %c0_3] : memref<2x1x768xf32, #tpu.memory_space<vmem>>, vector<1x1x768xf32>
    %4 = vector.shape_cast %3 : vector<1x1x768xf32> to vector<1x768xf32>
    %c0_4 = arith.constant 0 : index
    %c0_5 = arith.constant 0 : index
    %5 = vector.load %arg3[%c0_4, %c0_5] : memref<256x768xf32, #tpu.memory_space<vmem>>, vector<256x768xf32>
    %cst = arith.constant dense<0.000000e+00> : vector<1x768xf32>
    %6 = tpu.matmul %0, %5, %cst {dimension_numbers = #tpu.dot_dimension_numbers<[1], [0], [0], [1], [0, 0, 1, 1], [], []>} : vector<1x256xf32>, vector<256x768xf32>, vector<1x768xf32> -> vector<1x768xf32>
    %c0_6 = arith.constant 0 : index
    %c0_7 = arith.constant 0 : index
    %7 = vector.load %arg4[%c0_6, %c0_7] : memref<1x768xf32, #tpu.memory_space<vmem>>, vector<1x768xf32>
    %8 = arith.addf %6, %7 : vector<1x768xf32>
    %9 = vector.extract_strided_slice %4 {offsets = [0, 0], sizes = [1, 256], strides = [1, 1]} : vector<1x768xf32> to vector<1x256xf32>
    %10 = vector.extract_strided_slice %8 {offsets = [0, 0], sizes = [1, 256], strides = [1, 1]} : vector<1x768xf32> to vector<1x256xf32>
    %11 = arith.addf %9, %10 : vector<1x256xf32>
    %12 = arith.negf %11 : vector<1x256xf32>
    %13 = math.exp %12 : vector<1x256xf32>
    %cst_8 = arith.constant 1.000000e+00 : f32
    %14 = vector.broadcast %cst_8 : f32 to vector<1x256xf32>
    %15 = arith.addf %14, %13 : vector<1x256xf32>
    %16 = arith.divf %14, %15 : vector<1x256xf32>
    %17 = vector.extract_strided_slice %4 {offsets = [0, 256], sizes = [1, 256], strides = [1, 1]} : vector<1x768xf32> to vector<1x256xf32>
    %18 = vector.extract_strided_slice %8 {offsets = [0, 256], sizes = [1, 256], strides = [1, 1]} : vector<1x768xf32> to vector<1x256xf32>
    %19 = arith.addf %17, %18 : vector<1x256xf32>
    %20 = arith.negf %19 : vector<1x256xf32>
    %21 = math.exp %20 : vector<1x256xf32>
    %cst_9 = arith.constant 1.000000e+00 : f32
    %22 = vector.broadcast %cst_9 : f32 to vector<1x256xf32>
    %23 = arith.addf %22, %21 : vector<1x256xf32>
    %24 = arith.divf %22, %23 : vector<1x256xf32>
    %25 = vector.extract_strided_slice %4 {offsets = [0, 512], sizes = [1, 256], strides = [1, 1]} : vector<1x768xf32> to vector<1x256xf32>
    %26 = vector.extract_strided_slice %8 {offsets = [0, 512], sizes = [1, 256], strides = [1, 1]} : vector<1x768xf32> to vector<1x256xf32>
    %27 = arith.mulf %16, %26 : vector<1x256xf32>
    %28 = arith.addf %25, %27 : vector<1x256xf32>
    %29 = math.tanh %28 : vector<1x256xf32>
    %cst_10 = arith.constant 1.000000e+00 : f32
    %30 = vector.broadcast %cst_10 : f32 to vector<1x256xf32>
    %31 = arith.subf %30, %24 : vector<1x256xf32>
    %32 = arith.mulf %31, %29 : vector<1x256xf32>
    %33 = arith.mulf %24, %0 : vector<1x256xf32>
    %34 = arith.addf %32, %33 : vector<1x256xf32>
    %c0_11 = arith.constant 0 : index
    %c0_12 = arith.constant 0 : index
    %35 = vector.load %arg5[%c0_11, %c0_12] : memref<8x256xf32, #tpu.memory_space<vmem>>, vector<1x256xf32>
    tpu.vector_store %arg5[%c0_11, %c0_12], %34 {strides = array<i32>} : memref<8x256xf32, #tpu.memory_space<vmem>>, vector<1x256xf32>,
    %c1 = arith.constant 1 : index
    %36 = memref.load %arg0[%c1] : memref<8xi32, #tpu.memory_space<smem>>
    %37 = arith.index_cast %36 : i32 to index
    %c0_13 = arith.constant 0 : index
    %c0_14 = arith.constant 0 : index
    %38 = vector.load %arg1[%37, %c0_13, %c0_14] : memref<2x1x768xf32, #tpu.memory_space<vmem>>, vector<1x1x768xf32>
    %39 = vector.shape_cast %38 : vector<1x1x768xf32> to vector<1x768xf32>
    %c0_15 = arith.constant 0 : index
    %c0_16 = arith.constant 0 : index
    %40 = vector.load %arg3[%c0_15, %c0_16] : memref<256x768xf32, #tpu.memory_space<vmem>>, vector<256x768xf32>
    %cst_17 = arith.constant dense<0.000000e+00> : vector<1x768xf32>
    %41 = tpu.matmul %34, %40, %cst_17 {dimension_numbers = #tpu.dot_dimension_numbers<[1], [0], [0], [1], [0, 0, 1, 1], [], []>} : vector<1x256xf32>, vector<256x768xf32>, vector<1x768xf32> -> vector<1x768xf32>
    %c0_18 = arith.constant 0 : index
    %c0_19 = arith.constant 0 : index
    %42 = vector.load %arg4[%c0_18, %c0_19] : memref<1x768xf32, #tpu.memory_space<vmem>>, vector<1x768xf32>
    %43 = arith.addf %41, %42 : vector<1x768xf32>
    %44 = vector.extract_strided_slice %39 {offsets = [0, 0], sizes = [1, 256], strides = [1, 1]} : vector<1x768xf32> to vector<1x256xf32>
    %45 = vector.extract_strided_slice %43 {offsets = [0, 0], sizes = [1, 256], strides = [1, 1]} : vector<1x768xf32> to vector<1x256xf32>
    %46 = arith.addf %44, %45 : vector<1x256xf32>
    %47 = arith.negf %46 : vector<1x256xf32>
    %48 = math.exp %47 : vector<1x256xf32>
    %cst_20 = arith.constant 1.000000e+00 : f32
    %49 = vector.broadcast %cst_20 : f32 to vector<1x256xf32>
    %50 = arith.addf %49, %48 : vector<1x256xf32>
    %51 = arith.divf %49, %50 : vector<1x256xf32>
    %52 = vector.extract_strided_slice %39 {offsets = [0, 256], sizes = [1, 256], strides = [1, 1]} : vector<1x768xf32> to vector<1x256xf32>
    %53 = vector.extract_strided_slice %43 {offsets = [0, 256], sizes = [1, 256], strides = [1, 1]} : vector<1x768xf32> to vector<1x256xf32>
    %54 = arith.addf %52, %53 : vector<1x256xf32>
    %55 = arith.negf %54 : vector<1x256xf32>
    %56 = math.exp %55 : vector<1x256xf32>
    %cst_21 = arith.constant 1.000000e+00 : f32
    %57 = vector.broadcast %cst_21 : f32 to vector<1x256xf32>
    %58 = arith.addf %57, %56 : vector<1x256xf32>
    %59 = arith.divf %57, %58 : vector<1x256xf32>
    %60 = vector.extract_strided_slice %39 {offsets = [0, 512], sizes = [1, 256], strides = [1, 1]} : vector<1x768xf32> to vector<1x256xf32>
    %61 = vector.extract_strided_slice %43 {offsets = [0, 512], sizes = [1, 256], strides = [1, 1]} : vector<1x768xf32> to vector<1x256xf32>
    %62 = arith.mulf %51, %61 : vector<1x256xf32>
    %63 = arith.addf %60, %62 : vector<1x256xf32>
    %64 = math.tanh %63 : vector<1x256xf32>
    %cst_22 = arith.constant 1.000000e+00 : f32
    %65 = vector.broadcast %cst_22 : f32 to vector<1x256xf32>
    %66 = arith.subf %65, %59 : vector<1x256xf32>
    %67 = arith.mulf %66, %64 : vector<1x256xf32>
    %68 = arith.mulf %59, %34 : vector<1x256xf32>
    %69 = arith.addf %67, %68 : vector<1x256xf32>
    %c1_23 = arith.constant 1 : index
    %c0_24 = arith.constant 0 : index
    %70 = vector.load %arg5[%c1_23, %c0_24] : memref<8x256xf32, #tpu.memory_space<vmem>>, vector<1x256xf32>
    tpu.vector_store %arg5[%c1_23, %c0_24], %69 {strides = array<i32>} : memref<8x256xf32, #tpu.memory_space<vmem>>, vector<1x256xf32>,
    %c2 = arith.constant 2 : index
    %71 = memref.load %arg0[%c2] : memref<8xi32, #tpu.memory_space<smem>>
    %72 = arith.index_cast %71 : i32 to index
    %c0_25 = arith.constant 0 : index
    %c0_26 = arith.constant 0 : index
    %73 = vector.load %arg1[%72, %c0_25, %c0_26] : memref<2x1x768xf32, #tpu.memory_space<vmem>>, vector<1x1x768xf32>
    %74 = vector.shape_cast %73 : vector<1x1x768xf32> to vector<1x768xf32>
    %c0_27 = arith.constant 0 : index
    %c0_28 = arith.constant 0 : index
    %75 = vector.load %arg3[%c0_27, %c0_28] : memref<256x768xf32, #tpu.memory_space<vmem>>, vector<256x768xf32>
    %cst_29 = arith.constant dense<0.000000e+00> : vector<1x768xf32>
    %76 = tpu.matmul %69, %75, %cst_29 {dimension_numbers = #tpu.dot_dimension_numbers<[1], [0], [0], [1], [0, 0, 1, 1], [], []>} : vector<1x256xf32>, vector<256x768xf32>, vector<1x768xf32> -> vector<1x768xf32>
    %c0_30 = arith.constant 0 : index
    %c0_31 = arith.constant 0 : index
    %77 = vector.load %arg4[%c0_30, %c0_31] : memref<1x768xf32, #tpu.memory_space<vmem>>, vector<1x768xf32>
    %78 = arith.addf %76, %77 : vector<1x768xf32>
    %79 = vector.extract_strided_slice %74 {offsets = [0, 0], sizes = [1, 256], strides = [1, 1]} : vector<1x768xf32> to vector<1x256xf32>
    %80 = vector.extract_strided_slice %78 {offsets = [0, 0], sizes = [1, 256], strides = [1, 1]} : vector<1x768xf32> to vector<1x256xf32>
    %81 = arith.addf %79, %80 : vector<1x256xf32>
    %82 = arith.negf %81 : vector<1x256xf32>
    %83 = math.exp %82 : vector<1x256xf32>
    %cst_32 = arith.constant 1.000000e+00 : f32
    %84 = vector.broadcast %cst_32 : f32 to vector<1x256xf32>
    %85 = arith.addf %84, %83 : vector<1x256xf32>
    %86 = arith.divf %84, %85 : vector<1x256xf32>
    %87 = vector.extract_strided_slice %74 {offsets = [0, 256], sizes = [1, 256], strides = [1, 1]} : vector<1x768xf32> to vector<1x256xf32>
    %88 = vector.extract_strided_slice %78 {offsets = [0, 256], sizes = [1, 256], strides = [1, 1]} : vector<1x768xf32> to vector<1x256xf32>
    %89 = arith.addf %87, %88 : vector<1x256xf32>
    %90 = arith.negf %89 : vector<1x256xf32>
    %91 = math.exp %90 : vector<1x256xf32>
    %cst_33 = arith.constant 1.000000e+00 : f32
    %92 = vector.broadcast %cst_33 : f32 to vector<1x256xf32>
    %93 = arith.addf %92, %91 : vector<1x256xf32>
    %94 = arith.divf %92, %93 : vector<1x256xf32>
    %95 = vector.extract_strided_slice %74 {offsets = [0, 512], sizes = [1, 256], strides = [1, 1]} : vector<1x768xf32> to vector<1x256xf32>
    %96 = vector.extract_strided_slice %78 {offsets = [0, 512], sizes = [1, 256], strides = [1, 1]} : vector<1x768xf32> to vector<1x256xf32>
    %97 = arith.mulf %86, %96 : vector<1x256xf32>
    %98 = arith.addf %95, %97 : vector<1x256xf32>
    %99 = math.tanh %98 : vector<1x256xf32>
    %cst_34 = arith.constant 1.000000e+00 : f32
    %100 = vector.broadcast %cst_34 : f32 to vector<1x256xf32>
    %101 = arith.subf %100, %94 : vector<1x256xf32>
    %102 = arith.mulf %101, %99 : vector<1x256xf32>
    %103 = arith.mulf %94, %69 : vector<1x256xf32>
    %104 = arith.addf %102, %103 : vector<1x256xf32>
    %c2_35 = arith.constant 2 : index
    %c0_36 = arith.constant 0 : index
    %105 = vector.load %arg5[%c2_35, %c0_36] : memref<8x256xf32, #tpu.memory_space<vmem>>, vector<1x256xf32>
    tpu.vector_store %arg5[%c2_35, %c0_36], %104 {strides = array<i32>} : memref<8x256xf32, #tpu.memory_space<vmem>>, vector<1x256xf32>,
    %c3 = arith.constant 3 : index
    %106 = memref.load %arg0[%c3] : memref<8xi32, #tpu.memory_space<smem>>
    %107 = arith.index_cast %106 : i32 to index
    %c0_37 = arith.constant 0 : index
    %c0_38 = arith.constant 0 : index
    %108 = vector.load %arg1[%107, %c0_37, %c0_38] : memref<2x1x768xf32, #tpu.memory_space<vmem>>, vector<1x1x768xf32>
    %109 = vector.shape_cast %108 : vector<1x1x768xf32> to vector<1x768xf32>
    %c0_39 = arith.constant 0 : index
    %c0_40 = arith.constant 0 : index
    %110 = vector.load %arg3[%c0_39, %c0_40] : memref<256x768xf32, #tpu.memory_space<vmem>>, vector<256x768xf32>
    %cst_41 = arith.constant dense<0.000000e+00> : vector<1x768xf32>
    %111 = tpu.matmul %104, %110, %cst_41 {dimension_numbers = #tpu.dot_dimension_numbers<[1], [0], [0], [1], [0, 0, 1, 1], [], []>} : vector<1x256xf32>, vector<256x768xf32>, vector<1x768xf32> -> vector<1x768xf32>
    %c0_42 = arith.constant 0 : index
    %c0_43 = arith.constant 0 : index
    %112 = vector.load %arg4[%c0_42, %c0_43] : memref<1x768xf32, #tpu.memory_space<vmem>>, vector<1x768xf32>
    %113 = arith.addf %111, %112 : vector<1x768xf32>
    %114 = vector.extract_strided_slice %109 {offsets = [0, 0], sizes = [1, 256], strides = [1, 1]} : vector<1x768xf32> to vector<1x256xf32>
    %115 = vector.extract_strided_slice %113 {offsets = [0, 0], sizes = [1, 256], strides = [1, 1]} : vector<1x768xf32> to vector<1x256xf32>
    %116 = arith.addf %114, %115 : vector<1x256xf32>
    %117 = arith.negf %116 : vector<1x256xf32>
    %118 = math.exp %117 : vector<1x256xf32>
    %cst_44 = arith.constant 1.000000e+00 : f32
    %119 = vector.broadcast %cst_44 : f32 to vector<1x256xf32>
    %120 = arith.addf %119, %118 : vector<1x256xf32>
    %121 = arith.divf %119, %120 : vector<1x256xf32>
    %122 = vector.extract_strided_slice %109 {offsets = [0, 256], sizes = [1, 256], strides = [1, 1]} : vector<1x768xf32> to vector<1x256xf32>
    %123 = vector.extract_strided_slice %113 {offsets = [0, 256], sizes = [1, 256], strides = [1, 1]} : vector<1x768xf32> to vector<1x256xf32>
    %124 = arith.addf %122, %123 : vector<1x256xf32>
    %125 = arith.negf %124 : vector<1x256xf32>
    %126 = math.exp %125 : vector<1x256xf32>
    %cst_45 = arith.constant 1.000000e+00 : f32
    %127 = vector.broadcast %cst_45 : f32 to vector<1x256xf32>
    %128 = arith.addf %127, %126 : vector<1x256xf32>
    %129 = arith.divf %127, %128 : vector<1x256xf32>
    %130 = vector.extract_strided_slice %109 {offsets = [0, 512], sizes = [1, 256], strides = [1, 1]} : vector<1x768xf32> to vector<1x256xf32>
    %131 = vector.extract_strided_slice %113 {offsets = [0, 512], sizes = [1, 256], strides = [1, 1]} : vector<1x768xf32> to vector<1x256xf32>
    %132 = arith.mulf %121, %131 : vector<1x256xf32>
    %133 = arith.addf %130, %132 : vector<1x256xf32>
    %134 = math.tanh %133 : vector<1x256xf32>
    %cst_46 = arith.constant 1.000000e+00 : f32
    %135 = vector.broadcast %cst_46 : f32 to vector<1x256xf32>
    %136 = arith.subf %135, %129 : vector<1x256xf32>
    %137 = arith.mulf %136, %134 : vector<1x256xf32>
    %138 = arith.mulf %129, %104 : vector<1x256xf32>
    %139 = arith.addf %137, %138 : vector<1x256xf32>
    %c3_47 = arith.constant 3 : index
    %c0_48 = arith.constant 0 : index
    %140 = vector.load %arg5[%c3_47, %c0_48] : memref<8x256xf32, #tpu.memory_space<vmem>>, vector<1x256xf32>
    tpu.vector_store %arg5[%c3_47, %c0_48], %139 {strides = array<i32>} : memref<8x256xf32, #tpu.memory_space<vmem>>, vector<1x256xf32>,
    %c4 = arith.constant 4 : index
    %141 = memref.load %arg0[%c4] : memref<8xi32, #tpu.memory_space<smem>>
    %142 = arith.index_cast %141 : i32 to index
    %c0_49 = arith.constant 0 : index
    %c0_50 = arith.constant 0 : index
    %143 = vector.load %arg1[%142, %c0_49, %c0_50] : memref<2x1x768xf32, #tpu.memory_space<vmem>>, vector<1x1x768xf32>
    %144 = vector.shape_cast %143 : vector<1x1x768xf32> to vector<1x768xf32>
    %c0_51 = arith.constant 0 : index
    %c0_52 = arith.constant 0 : index
    %145 = vector.load %arg3[%c0_51, %c0_52] : memref<256x768xf32, #tpu.memory_space<vmem>>, vector<256x768xf32>
    %cst_53 = arith.constant dense<0.000000e+00> : vector<1x768xf32>
    %146 = tpu.matmul %139, %145, %cst_53 {dimension_numbers = #tpu.dot_dimension_numbers<[1], [0], [0], [1], [0, 0, 1, 1], [], []>} : vector<1x256xf32>, vector<256x768xf32>, vector<1x768xf32> -> vector<1x768xf32>
    %c0_54 = arith.constant 0 : index
    %c0_55 = arith.constant 0 : index
    %147 = vector.load %arg4[%c0_54, %c0_55] : memref<1x768xf32, #tpu.memory_space<vmem>>, vector<1x768xf32>
    %148 = arith.addf %146, %147 : vector<1x768xf32>
    %149 = vector.extract_strided_slice %144 {offsets = [0, 0], sizes = [1, 256], strides = [1, 1]} : vector<1x768xf32> to vector<1x256xf32>
    %150 = vector.extract_strided_slice %148 {offsets = [0, 0], sizes = [1, 256], strides = [1, 1]} : vector<1x768xf32> to vector<1x256xf32>
    %151 = arith.addf %149, %150 : vector<1x256xf32>
    %152 = arith.negf %151 : vector<1x256xf32>
    %153 = math.exp %152 : vector<1x256xf32>
    %cst_56 = arith.constant 1.000000e+00 : f32
    %154 = vector.broadcast %cst_56 : f32 to vector<1x256xf32>
    %155 = arith.addf %154, %153 : vector<1x256xf32>
    %156 = arith.divf %154, %155 : vector<1x256xf32>
    %157 = vector.extract_strided_slice %144 {offsets = [0, 256], sizes = [1, 256], strides = [1, 1]} : vector<1x768xf32> to vector<1x256xf32>
    %158 = vector.extract_strided_slice %148 {offsets = [0, 256], sizes = [1, 256], strides = [1, 1]} : vector<1x768xf32> to vector<1x256xf32>
    %159 = arith.addf %157, %158 : vector<1x256xf32>
    %160 = arith.negf %159 : vector<1x256xf32>
    %161 = math.exp %160 : vector<1x256xf32>
    %cst_57 = arith.constant 1.000000e+00 : f32
    %162 = vector.broadcast %cst_57 : f32 to vector<1x256xf32>
    %163 = arith.addf %162, %161 : vector<1x256xf32>
    %164 = arith.divf %162, %163 : vector<1x256xf32>
    %165 = vector.extract_strided_slice %144 {offsets = [0, 512], sizes = [1, 256], strides = [1, 1]} : vector<1x768xf32> to vector<1x256xf32>
    %166 = vector.extract_strided_slice %148 {offsets = [0, 512], sizes = [1, 256], strides = [1, 1]} : vector<1x768xf32> to vector<1x256xf32>
    %167 = arith.mulf %156, %166 : vector<1x256xf32>
    %168 = arith.addf %165, %167 : vector<1x256xf32>
    %169 = math.tanh %168 : vector<1x256xf32>
    %cst_58 = arith.constant 1.000000e+00 : f32
    %170 = vector.broadcast %cst_58 : f32 to vector<1x256xf32>
    %171 = arith.subf %170, %164 : vector<1x256xf32>
    %172 = arith.mulf %171, %169 : vector<1x256xf32>
    %173 = arith.mulf %164, %139 : vector<1x256xf32>
    %174 = arith.addf %172, %173 : vector<1x256xf32>
    %c4_59 = arith.constant 4 : index
    %c0_60 = arith.constant 0 : index
    %175 = vector.load %arg5[%c4_59, %c0_60] : memref<8x256xf32, #tpu.memory_space<vmem>>, vector<1x256xf32>
    tpu.vector_store %arg5[%c4_59, %c0_60], %174 {strides = array<i32>} : memref<8x256xf32, #tpu.memory_space<vmem>>, vector<1x256xf32>,
    %c5 = arith.constant 5 : index
    %176 = memref.load %arg0[%c5] : memref<8xi32, #tpu.memory_space<smem>>
    %177 = arith.index_cast %176 : i32 to index
    %c0_61 = arith.constant 0 : index
    %c0_62 = arith.constant 0 : index
    %178 = vector.load %arg1[%177, %c0_61, %c0_62] : memref<2x1x768xf32, #tpu.memory_space<vmem>>, vector<1x1x768xf32>
    %179 = vector.shape_cast %178 : vector<1x1x768xf32> to vector<1x768xf32>
    %c0_63 = arith.constant 0 : index
    %c0_64 = arith.constant 0 : index
    %180 = vector.load %arg3[%c0_63, %c0_64] : memref<256x768xf32, #tpu.memory_space<vmem>>, vector<256x768xf32>
    %cst_65 = arith.constant dense<0.000000e+00> : vector<1x768xf32>
    %181 = tpu.matmul %174, %180, %cst_65 {dimension_numbers = #tpu.dot_dimension_numbers<[1], [0], [0], [1], [0, 0, 1, 1], [], []>} : vector<1x256xf32>, vector<256x768xf32>, vector<1x768xf32> -> vector<1x768xf32>
    %c0_66 = arith.constant 0 : index
    %c0_67 = arith.constant 0 : index
    %182 = vector.load %arg4[%c0_66, %c0_67] : memref<1x768xf32, #tpu.memory_space<vmem>>, vector<1x768xf32>
    %183 = arith.addf %181, %182 : vector<1x768xf32>
    %184 = vector.extract_strided_slice %179 {offsets = [0, 0], sizes = [1, 256], strides = [1, 1]} : vector<1x768xf32> to vector<1x256xf32>
    %185 = vector.extract_strided_slice %183 {offsets = [0, 0], sizes = [1, 256], strides = [1, 1]} : vector<1x768xf32> to vector<1x256xf32>
    %186 = arith.addf %184, %185 : vector<1x256xf32>
    %187 = arith.negf %186 : vector<1x256xf32>
    %188 = math.exp %187 : vector<1x256xf32>
    %cst_68 = arith.constant 1.000000e+00 : f32
    %189 = vector.broadcast %cst_68 : f32 to vector<1x256xf32>
    %190 = arith.addf %189, %188 : vector<1x256xf32>
    %191 = arith.divf %189, %190 : vector<1x256xf32>
    %192 = vector.extract_strided_slice %179 {offsets = [0, 256], sizes = [1, 256], strides = [1, 1]} : vector<1x768xf32> to vector<1x256xf32>
    %193 = vector.extract_strided_slice %183 {offsets = [0, 256], sizes = [1, 256], strides = [1, 1]} : vector<1x768xf32> to vector<1x256xf32>
    %194 = arith.addf %192, %193 : vector<1x256xf32>
    %195 = arith.negf %194 : vector<1x256xf32>
    %196 = math.exp %195 : vector<1x256xf32>
    %cst_69 = arith.constant 1.000000e+00 : f32
    %197 = vector.broadcast %cst_69 : f32 to vector<1x256xf32>
    %198 = arith.addf %197, %196 : vector<1x256xf32>
    %199 = arith.divf %197, %198 : vector<1x256xf32>
    %200 = vector.extract_strided_slice %179 {offsets = [0, 512], sizes = [1, 256], strides = [1, 1]} : vector<1x768xf32> to vector<1x256xf32>
    %201 = vector.extract_strided_slice %183 {offsets = [0, 512], sizes = [1, 256], strides = [1, 1]} : vector<1x768xf32> to vector<1x256xf32>
    %202 = arith.mulf %191, %201 : vector<1x256xf32>
    %203 = arith.addf %200, %202 : vector<1x256xf32>
    %204 = math.tanh %203 : vector<1x256xf32>
    %cst_70 = arith.constant 1.000000e+00 : f32
    %205 = vector.broadcast %cst_70 : f32 to vector<1x256xf32>
    %206 = arith.subf %205, %199 : vector<1x256xf32>
    %207 = arith.mulf %206, %204 : vector<1x256xf32>
    %208 = arith.mulf %199, %174 : vector<1x256xf32>
    %209 = arith.addf %207, %208 : vector<1x256xf32>
    %c5_71 = arith.constant 5 : index
    %c0_72 = arith.constant 0 : index
    %210 = vector.load %arg5[%c5_71, %c0_72] : memref<8x256xf32, #tpu.memory_space<vmem>>, vector<1x256xf32>
    tpu.vector_store %arg5[%c5_71, %c0_72], %209 {strides = array<i32>} : memref<8x256xf32, #tpu.memory_space<vmem>>, vector<1x256xf32>,
    %c6 = arith.constant 6 : index
    %211 = memref.load %arg0[%c6] : memref<8xi32, #tpu.memory_space<smem>>
    %212 = arith.index_cast %211 : i32 to index
    %c0_73 = arith.constant 0 : index
    %c0_74 = arith.constant 0 : index
    %213 = vector.load %arg1[%212, %c0_73, %c0_74] : memref<2x1x768xf32, #tpu.memory_space<vmem>>, vector<1x1x768xf32>
    %214 = vector.shape_cast %213 : vector<1x1x768xf32> to vector<1x768xf32>
    %c0_75 = arith.constant 0 : index
    %c0_76 = arith.constant 0 : index
    %215 = vector.load %arg3[%c0_75, %c0_76] : memref<256x768xf32, #tpu.memory_space<vmem>>, vector<256x768xf32>
    %cst_77 = arith.constant dense<0.000000e+00> : vector<1x768xf32>
    %216 = tpu.matmul %209, %215, %cst_77 {dimension_numbers = #tpu.dot_dimension_numbers<[1], [0], [0], [1], [0, 0, 1, 1], [], []>} : vector<1x256xf32>, vector<256x768xf32>, vector<1x768xf32> -> vector<1x768xf32>
    %c0_78 = arith.constant 0 : index
    %c0_79 = arith.constant 0 : index
    %217 = vector.load %arg4[%c0_78, %c0_79] : memref<1x768xf32, #tpu.memory_space<vmem>>, vector<1x768xf32>
    %218 = arith.addf %216, %217 : vector<1x768xf32>
    %219 = vector.extract_strided_slice %214 {offsets = [0, 0], sizes = [1, 256], strides = [1, 1]} : vector<1x768xf32> to vector<1x256xf32>
    %220 = vector.extract_strided_slice %218 {offsets = [0, 0], sizes = [1, 256], strides = [1, 1]} : vector<1x768xf32> to vector<1x256xf32>
    %221 = arith.addf %219, %220 : vector<1x256xf32>
    %222 = arith.negf %221 : vector<1x256xf32>
    %223 = math.exp %222 : vector<1x256xf32>
    %cst_80 = arith.constant 1.000000e+00 : f32
    %224 = vector.broadcast %cst_80 : f32 to vector<1x256xf32>
    %225 = arith.addf %224, %223 : vector<1x256xf32>
    %226 = arith.divf %224, %225 : vector<1x256xf32>
    %227 = vector.extract_strided_slice %214 {offsets = [0, 256], sizes = [1, 256], strides = [1, 1]} : vector<1x768xf32> to vector<1x256xf32>
    %228 = vector.extract_strided_slice %218 {offsets = [0, 256], sizes = [1, 256], strides = [1, 1]} : vector<1x768xf32> to vector<1x256xf32>
    %229 = arith.addf %227, %228 : vector<1x256xf32>
    %230 = arith.negf %229 : vector<1x256xf32>
    %231 = math.exp %230 : vector<1x256xf32>
    %cst_81 = arith.constant 1.000000e+00 : f32
    %232 = vector.broadcast %cst_81 : f32 to vector<1x256xf32>
    %233 = arith.addf %232, %231 : vector<1x256xf32>
    %234 = arith.divf %232, %233 : vector<1x256xf32>
    %235 = vector.extract_strided_slice %214 {offsets = [0, 512], sizes = [1, 256], strides = [1, 1]} : vector<1x768xf32> to vector<1x256xf32>
    %236 = vector.extract_strided_slice %218 {offsets = [0, 512], sizes = [1, 256], strides = [1, 1]} : vector<1x768xf32> to vector<1x256xf32>
    %237 = arith.mulf %226, %236 : vector<1x256xf32>
    %238 = arith.addf %235, %237 : vector<1x256xf32>
    %239 = math.tanh %238 : vector<1x256xf32>
    %cst_82 = arith.constant 1.000000e+00 : f32
    %240 = vector.broadcast %cst_82 : f32 to vector<1x256xf32>
    %241 = arith.subf %240, %234 : vector<1x256xf32>
    %242 = arith.mulf %241, %239 : vector<1x256xf32>
    %243 = arith.mulf %234, %209 : vector<1x256xf32>
    %244 = arith.addf %242, %243 : vector<1x256xf32>
    %c6_83 = arith.constant 6 : index
    %c0_84 = arith.constant 0 : index
    %245 = vector.load %arg5[%c6_83, %c0_84] : memref<8x256xf32, #tpu.memory_space<vmem>>, vector<1x256xf32>
    tpu.vector_store %arg5[%c6_83, %c0_84], %244 {strides = array<i32>} : memref<8x256xf32, #tpu.memory_space<vmem>>, vector<1x256xf32>,
    %c7 = arith.constant 7 : index
    %246 = memref.load %arg0[%c7] : memref<8xi32, #tpu.memory_space<smem>>
    %247 = arith.index_cast %246 : i32 to index
    %c0_85 = arith.constant 0 : index
    %c0_86 = arith.constant 0 : index
    %248 = vector.load %arg1[%247, %c0_85, %c0_86] : memref<2x1x768xf32, #tpu.memory_space<vmem>>, vector<1x1x768xf32>
    %249 = vector.shape_cast %248 : vector<1x1x768xf32> to vector<1x768xf32>
    %c0_87 = arith.constant 0 : index
    %c0_88 = arith.constant 0 : index
    %250 = vector.load %arg3[%c0_87, %c0_88] : memref<256x768xf32, #tpu.memory_space<vmem>>, vector<256x768xf32>
    %cst_89 = arith.constant dense<0.000000e+00> : vector<1x768xf32>
    %251 = tpu.matmul %244, %250, %cst_89 {dimension_numbers = #tpu.dot_dimension_numbers<[1], [0], [0], [1], [0, 0, 1, 1], [], []>} : vector<1x256xf32>, vector<256x768xf32>, vector<1x768xf32> -> vector<1x768xf32>
    %c0_90 = arith.constant 0 : index
    %c0_91 = arith.constant 0 : index
    %252 = vector.load %arg4[%c0_90, %c0_91] : memref<1x768xf32, #tpu.memory_space<vmem>>, vector<1x768xf32>
    %253 = arith.addf %251, %252 : vector<1x768xf32>
    %254 = vector.extract_strided_slice %249 {offsets = [0, 0], sizes = [1, 256], strides = [1, 1]} : vector<1x768xf32> to vector<1x256xf32>
    %255 = vector.extract_strided_slice %253 {offsets = [0, 0], sizes = [1, 256], strides = [1, 1]} : vector<1x768xf32> to vector<1x256xf32>
    %256 = arith.addf %254, %255 : vector<1x256xf32>
    %257 = arith.negf %256 : vector<1x256xf32>
    %258 = math.exp %257 : vector<1x256xf32>
    %cst_92 = arith.constant 1.000000e+00 : f32
    %259 = vector.broadcast %cst_92 : f32 to vector<1x256xf32>
    %260 = arith.addf %259, %258 : vector<1x256xf32>
    %261 = arith.divf %259, %260 : vector<1x256xf32>
    %262 = vector.extract_strided_slice %249 {offsets = [0, 256], sizes = [1, 256], strides = [1, 1]} : vector<1x768xf32> to vector<1x256xf32>
    %263 = vector.extract_strided_slice %253 {offsets = [0, 256], sizes = [1, 256], strides = [1, 1]} : vector<1x768xf32> to vector<1x256xf32>
    %264 = arith.addf %262, %263 : vector<1x256xf32>
    %265 = arith.negf %264 : vector<1x256xf32>
    %266 = math.exp %265 : vector<1x256xf32>
    %cst_93 = arith.constant 1.000000e+00 : f32
    %267 = vector.broadcast %cst_93 : f32 to vector<1x256xf32>
    %268 = arith.addf %267, %266 : vector<1x256xf32>
    %269 = arith.divf %267, %268 : vector<1x256xf32>
    %270 = vector.extract_strided_slice %249 {offsets = [0, 512], sizes = [1, 256], strides = [1, 1]} : vector<1x768xf32> to vector<1x256xf32>
    %271 = vector.extract_strided_slice %253 {offsets = [0, 512], sizes = [1, 256], strides = [1, 1]} : vector<1x768xf32> to vector<1x256xf32>
    %272 = arith.mulf %261, %271 : vector<1x256xf32>
    %273 = arith.addf %270, %272 : vector<1x256xf32>
    %274 = math.tanh %273 : vector<1x256xf32>
    %cst_94 = arith.constant 1.000000e+00 : f32
    %275 = vector.broadcast %cst_94 : f32 to vector<1x256xf32>
    %276 = arith.subf %275, %269 : vector<1x256xf32>
    %277 = arith.mulf %276, %274 : vector<1x256xf32>
    %278 = arith.mulf %269, %244 : vector<1x256xf32>
    %279 = arith.addf %277, %278 : vector<1x256xf32>
    %c7_95 = arith.constant 7 : index
    %c0_96 = arith.constant 0 : index
    %280 = vector.load %arg5[%c7_95, %c0_96] : memref<8x256xf32, #tpu.memory_space<vmem>>, vector<1x256xf32>
    tpu.vector_store %arg5[%c7_95, %c0_96], %279 {strides = array<i32>} : memref<8x256xf32, #tpu.memory_space<vmem>>, vector<1x256xf32>,
    return
  }
}

</mosaic_0001>

<bundles_post_ra>
// kernel: tpu_custom_call.1
= control target key start
LH: loop header
LB: loop body
LE: loop exit
PB: predicated region body
PF: predicated region fallthrough
CT: control target
= control target key end

     0   :  { %10 = vsyncpa [#allocation5], 0  ;;  %s7900_s0 = inlined_call_operand.hbm [shape: s32[8], index: 0, kind: input, shape index: {}]   ;;  %s7901_s1 = inlined_call_operand.hbm [shape: f32[2,1,768], index: 1, kind: input, shape index: {}]   ;;  %s7902_s2 = inlined_call_operand.vmem [shape: f32[1,256], index: 2, kind: input, shape index: {}]   ;;  %s7903_s3 = inlined_call_operand.hbm [shape: f32[256,768], index: 3, kind: input, shape index: {}]   ;;  %s7904_s4 = inlined_call_operand.vmem [shape: f32[1,768], index: 4, kind: input, shape index: {}]   ;;  %s7905_s5 = inlined_call_operand.hbm [shape: f32[8,256], index: 5, kind: output, shape index: {}]  }
   0x1   :  { %11 = vsyncpa [#allocation3], 0 }
   0x2   :  { %12 = vsyncpa [#allocation8], 0 }
   0x3   :  { %13 = vsyncpa [#allocation4], 0  ;;  %s6025_s20 = scalar_lea.hbm %s7900_s0, 16 }
   0x4   :  { %p6026_p0 = scmp.ne.s32.totalorder %s7900_s0, %s6025_s20  ;;  %p6029_p1 = scmp.lt.u32.totalorder %s6025_s20, %s7900_s0 }
   0x6   :  { %p6031_p2 = pnand %p6029_p1, %p6026_p0 }
   0x8   :  { %6034 = shalt.err (!%p6031_p2)
}
   0x9   :  { %s6109_s25 = smov [#allocation2]   ;;  %s6110_s28 = smov [#allocation6]  }
   0xa   :  { %21 = dma.hbm_to_smem %s7900_s0, 16, %s6109_s25, [#allocation5]  }
   0xb   :  { %s27_s29 = sshll.u32 %s6110_s28, 4  ;;  %s6035_s7 = scalar_lea.hbm %s7901_s1, 192  ;;  %s28_s29 = int_to_ptr.vmem [resolvable:$true] %s27_s29 }
   0xc   :  { %p6036_p3 = scmp.ne.s32.totalorder %s7901_s1, %s6035_s7  ;;  %p6039_p4 = scmp.lt.u32.totalorder %s6035_s7, %s7901_s1 }
   0xe   :  { %p6041_p5 = pnand %p6039_p4, %p6036_p3 }
  0x10   :  { %6044 = shalt.err (!%p6041_p5)
}
  0x11   :  { %s6045_s12 = scalar_lea.vmem %s28_s29, 192  ;;  %p6050_p7 = scmp.lt.s32.totalorder %s28_s29, %s28_s29 }
  0x12   :  { %p6046_p6 = scmp.ne.s32.totalorder %s28_s29, %s6045_s12  ;;  %p6051_p8 = scmp.lt.s32.totalorder %s6045_s12, %s6045_s12 }
  0x14   :  { %p6052_p9 = por %p6051_p8, %p6050_p7 }
  0x16   :  { %p6053_p10 = pnand %p6052_p9, %p6046_p6 }
  0x18   :  { %6056 = shalt.err (!%p6053_p10)
}
  0x19   :  { %s6111_s0 = smov 96   ;;  %s6112_s13 = smov 6  }
  0x1a   :  { %33 = dma.hbm_to_vmem [thread:$0]  %s7901_s1, 192, %s28_s29, [#allocation3], %s6111_s0, %s6111_s0, %s6112_s13  }
  0x1b   :  { %s6113_s16 = smov [#allocation7]   ;;  %s6057_s20 = scalar_lea.hbm %s7903_s3, 24576 }
  0x1c   :  { %s41_s17 = sshll.u32 %s6113_s16, 4  ;;  %p6058_p11 = scmp.ne.s32.totalorder %s7903_s3, %s6057_s20  ;;  %s42_s17 = int_to_ptr.vmem [resolvable:$true] %s41_s17 }
  0x1d   :  { %p6061_p12 = scmp.lt.u32.totalorder %s6057_s20, %s7903_s3 }
  0x1f   :  { %p6063_p13 = pnand %p6061_p12, %p6058_p11 }
  0x21   :  { %6066 = shalt.err (!%p6063_p13)
}
  0x22   :  { %s6067_s25 = scalar_lea.vmem %s42_s17, 24576  ;;  %p6072_p1 = scmp.lt.s32.totalorder %s42_s17, %s42_s17 }
  0x23   :  { %p6068_p0 = scmp.ne.s32.totalorder %s42_s17, %s6067_s25  ;;  %p6073_p2 = scmp.lt.s32.totalorder %s6067_s25, %s6067_s25 }
  0x25   :  { %p6074_p3 = por %p6073_p2, %p6072_p1 }
  0x27   :  { %p6075_p4 = pnand %p6074_p3, %p6068_p0 }
  0x29   :  { %6078 = shalt.err (!%p6075_p4)
}
  0x2a   :  { %s6114_s1 = smov 768   ;;  %s6115_s26 = smov 48  }
  0x2b   :  { %47 = dma.hbm_to_vmem [thread:$0]  %s7903_s3, 24576, %s42_s17, [#allocation8], %s6114_s1, %s6114_s1, %s6115_s26  }
  0x2c   :  { %6101 = dma.done.wait [#allocation5], 16  }
  0x2d   :  { %6102 = vsyncadd [#allocation5], 4294967280 }
  0x2e   :  { %6103 = dma.done.wait [#allocation3], 192  }
  0x2f   :  { %6104 = vsyncadd [#allocation3], 4294967104 }
  0x30   :  { %6105 = dma.done.wait [#allocation8], 24576  }
  0x31   :  { %6106 = vsyncadd [#allocation8], 4294942720 }
  0x32   :  { %59 = sfence }
  0x33   :  { %v66_v0 = vld [vmem:[#allocation7 + $0x8] sm:$0xff]  ;;  %v72_v1 = vld [vmem:[#allocation7 + $0x38] sm:$0xff]  ;;  %v65_v2 = vld [vmem:[#allocation7] sm:$0xff]  ;;  %v7906_v31 = vlaneseq  ;;  %s61_s6 = sld [smem:[#allocation2]]  ;;  %s4379_s11 = sld [smem:[#allocation2 + $0x1]] }
  0x34   :  { %v6184_v3 = vpack.c.bf16 %v72_v1, %v66_v0  ;;  %v71_v4 = vld [vmem:[#allocation7 + $0x30] sm:$0xff]  ;;  %v78_v5 = vld [vmem:[#allocation7 + $0x68] sm:$0xff]  ;;  %v84_v6 = vld [vmem:[#allocation7 + $0x98] sm:$0xff]  ;;  %s4382_s15 = sld [smem:[#allocation2 + $0x2]]  ;;  %s4385_s20 = sld [smem:[#allocation2 + $0x3]] }
  0x35   :  { %v6186_v7 = vpack.c.bf16 %v71_v4, %v65_v2  ;;  %v6188_v8 = vpack.c.bf16 %v84_v6, %v78_v5  ;;  %v77_v9 = vld [vmem:[#allocation7 + $0x60] sm:$0xff]  ;;  %v83_v10 = vld [vmem:[#allocation7 + $0x90] sm:$0xff]  ;;  %v90_v11 = vld [vmem:[#allocation7 + $0xc8] sm:$0xff]  ;;  %v6220_v46 = vshrl.u32 %v7906_v31, 7  ;;  %s4388_s25 = sld [smem:[#allocation2 + $0x4]]  ;;  %s4391_s3 = sld [smem:[#allocation2 + $0x5]] }
  0x36   :  { %4401 = vmatprep.subr.bf16.mxu0 %v6184_v3  ;;  %v96_v12 = vld [vmem:[#allocation7 + $0xf8] sm:$0xff]  ;;  %v6192_v13 = vpack.c.bf16 %v83_v10, %v77_v9  ;;  %v89_v15 = vld [vmem:[#allocation7 + $0xc0] sm:$0xff]  ;;  %v95_v16 = vld [vmem:[#allocation7 + $0xf0] sm:$0xff]  ;;  %s6117_s13 = smov [#allocation9]  }
  0x37   :  { %4403 = vmatpush1.bf16.msra.mxu0 %v6186_v7  ;;  %v6195_v14 = vpack.c.bf16 %v96_v12, %v90_v11  ;;  %v102_v17 = vld [vmem:[#allocation7 + $0x128] sm:$0xff]  ;;  %v108_v18 = vld [vmem:[#allocation7 + $0x158] sm:$0xff]  ;;  %v6198_v19 = vpack.c.bf16 %v95_v16, %v89_v15  ;;  %v101_v21 = vld [vmem:[#allocation7 + $0x120] sm:$0xff]  ;;  %7990 = vst [vmem:[#allocation14_spill] sm:$0xff] %v6220_v46  ;;  %v6238_v62 = vsub.s32 1, %v6220_v46  ;;  %v6323_v31 = vsub.s32 0, %v6220_v46 }
  0x38   :  { %4405 = vmatprep.subr.bf16.mxu0 %v6188_v8  ;;  %v6201_v20 = vpack.c.bf16 %v108_v18, %v102_v17  ;;  %v107_v22 = vld [vmem:[#allocation7 + $0x150] sm:$0xff]  ;;  %v114_v23 = vld [vmem:[#allocation7 + $0x188] sm:$0xff]  ;;  %v120_v24 = vld [vmem:[#allocation7 + $0x1b8] sm:$0xff]  ;;  %s4350_s14 = sshll.u32 %s6117_s13, 4  ;;  %s4351_s14 = int_to_ptr.vmem [resolvable:$true] %s4350_s14 }
  0x39   :  { %v6204_v25 = vpack.c.bf16 %v107_v22, %v101_v21  ;;  %v6207_v26 = vpack.c.bf16 %v120_v24, %v114_v23  ;;  %v113_v27 = vld [vmem:[#allocation7 + $0x180] sm:$0xff]  ;;  %v119_v28 = vld [vmem:[#allocation7 + $0x1b0] sm:$0xff]  ;;  %v126_v29 = vld [vmem:[#allocation7 + $0x1e8] sm:$0xff]  ;;  %7991 = vst [vmem:[#allocation15_spill] sm:$0xff] %v6238_v62  ;;  %s62_s7 = smul.u32 6, %s61_s6  ;;  %p6084_p6 = scmp.lt.s32.totalorder %s4351_s14, %s4351_s14 }
  0x3a   :  { %v132_v30 = vld [vmem:[#allocation7 + $0x218] sm:$0xff]  ;;  %v6210_v32 = vpack.c.bf16 %v119_v28, %v113_v27  ;;  %v125_v33 = vld [vmem:[#allocation7 + $0x1e0] sm:$0xff]  ;;  %v131_v36 = vld [vmem:[#allocation7 + $0x210] sm:$0xff]  ;;  %7994 = vst [vmem:[#allocation18_spill] sm:$0xff] %v6323_v31  ;;  %s600_s12 = smul.u32 6, %s4379_s11 }
  0x3b   :  { %4407 = vmatpush1.bf16.msra.mxu0 %v6192_v13  ;;  %v68_v34 = vld [vmem:[#allocation7 + $0x18] sm:$0xff]  ;;  %v6213_v35 = vpack.c.bf16 %v132_v30, %v126_v29  ;;  %v138_v37 = vld [vmem:[#allocation7 + $0x248] sm:$0xff]  ;;  %v67_v41 = vld [vmem:[#allocation7 + $0x10] sm:$0xff]  ;;  %v6223_v47 = vpack.c.bf16 %v131_v36, %v125_v33  ;;  %s63_s8 = scalar_lea.vmem [#allocation6], %s62_s7  ;;  %s1135_s16 = smul.u32 6, %s4382_s15 }
  0x3c   :  { %4409 = vmatprep.subr.bf16.mxu0 %v6195_v14  ;;  %v74_v38 = vld [vmem:[#allocation7 + $0x48] sm:$0xff]  ;;  %v144_v39 = vld [vmem:[#allocation7 + $0x278] sm:$0xff]  ;;  %v73_v42 = vld [vmem:[#allocation7 + $0x40] sm:$0xff]  ;;  %s601_s0 = scalar_lea.vmem [#allocation6], %s600_s12  ;;  %s1670_s21 = smul.u32 6, %s4385_s20 }
  0x3d   :  { %v6215_v40 = vpack.c.bf16 %v74_v38, %v68_v34  ;;  %v6217_v43 = vpack.c.bf16 %v73_v42, %v67_v41  ;;  %v80_v44 = vld [vmem:[#allocation7 + $0x78] sm:$0xff]  ;;  %v86_v45 = vld [vmem:[#allocation7 + $0xa8] sm:$0xff]  ;;  %v137_v48 = vld [vmem:[#allocation7 + $0x240] sm:$0xff]  ;;  %v6229_v51 = vpack.c.bf16 %v144_v39, %v138_v37  ;;  %s1136_s17 = scalar_lea.vmem [#allocation6], %s1135_s16  ;;  %s2205_s1 = smul.u32 6, %s4388_s25 }
  0x3e   :  { %v6226_v49 = vpack.c.bf16 %v86_v45, %v80_v44  ;;  %v79_v50 = vld [vmem:[#allocation7 + $0x70] sm:$0xff]  ;;  %v150_v53 = vld [vmem:[#allocation7 + $0x2a8] sm:$0xff]  ;;  %v85_v54 = vld [vmem:[#allocation7 + $0xa0] sm:$0xff]  ;;  %s1671_s22 = scalar_lea.vmem [#allocation6], %s1670_s21  ;;  %s2740_s29 = smul.u32 6, %s4391_s3 }
  0x3f   :  { %4411 = vmatpush1.bf16.msra.mxu0 %v6198_v19  ;;  %4465 = vmatprep.subr.bf16.mxu1 %v6215_v40  ;;  %v143_v52 = vld [vmem:[#allocation7 + $0x270] sm:$0xff]  ;;  %v156_v55 = vld [vmem:[#allocation7 + $0x2d8] sm:$0xff]  ;;  %v6233_v56 = vpack.c.bf16 %v85_v54, %v79_v50  ;;  %v98_v58 = vld [vmem:[#allocation7 + $0x108] sm:$0xff]  ;;  %s2206_s26 = scalar_lea.vmem [#allocation6], %s2205_s1  ;;  %s4394_s7 = sld [smem:[#allocation2 + $0x6]] }
  0x40   :  { %4413 = vmatprep.subr.bf16.mxu0 %v6201_v20  ;;  %4467 = vmatpush1.bf16.msra.mxu1 %v6217_v43  ;;  %v92_v57 = vld [vmem:[#allocation7 + $0xd8] sm:$0xff]  ;;  %v91_v60 = vld [vmem:[#allocation7 + $0xd0] sm:$0xff]  ;;  %v97_v61 = vld [vmem:[#allocation7 + $0x100] sm:$0xff]  ;;  %v6241_v63 = vpack.c.bf16 %v143_v52, %v137_v48  ;;  %v6244_v4 = vpack.c.bf16 %v156_v55, %v150_v53  ;;  %s4397_s12 = sld [smem:[#allocation2 + $0x7]]  ;;  %s6079_s15 = scalar_lea.vmem %s4351_s14, 256 }
  0x41   :  { %4469 = vmatprep.subr.bf16.mxu1 %v6226_v49  ;;  %v6235_v59 = vpack.c.bf16 %v98_v58, %v92_v57  ;;  %v149_v0 = vld [vmem:[#allocation7 + $0x2a0] sm:$0xff]  ;;  %v155_v1 = vld [vmem:[#allocation7 + $0x2d0] sm:$0xff]  ;;  %v104_v2 = vld [vmem:[#allocation7 + $0x138] sm:$0xff]  ;;  %v6247_v9 = vpack.c.bf16 %v97_v61, %v91_v60  ;;  %p6080_p5 = scmp.ne.s32.totalorder %s4351_s14, %s6079_s15  ;;  %p6085_p7 = scmp.lt.s32.totalorder %s6079_s15, %s6079_s15 }
  0x42   :  { %v162_v5 = vld [vmem:[#allocation7 + $0x308] sm:$0xff]  ;;  %v168_v6 = vld [vmem:[#allocation7 + $0x338] sm:$0xff]  ;;  %v103_v12 = vld [vmem:[#allocation7 + $0x130] sm:$0xff]  ;;  %v6262_v22 = vpack.c.bf16 %v155_v1, %v149_v0 }
  0x43   :  { %4415 = vmatpush1.bf16.msra.mxu0 %v6204_v25  ;;  %v110_v10 = vld [vmem:[#allocation7 + $0x168] sm:$0xff]  ;;  %v109_v15 = vld [vmem:[#allocation7 + $0x160] sm:$0xff]  ;;  %v116_v18 = vld [vmem:[#allocation7 + $0x198] sm:$0xff]  ;;  %v6265_v23 = vpack.c.bf16 %v168_v6, %v162_v5  ;;  %p6086_p8 = por %p6085_p7, %p6084_p6 }
  0x44   :  { %4417 = vmatprep.subr.bf16.mxu0 %v6207_v26  ;;  %4471 = vmatpush1.bf16.msra.mxu1 %v6233_v56  ;;  %v6250_v11 = vpack.c.bf16 %v110_v10, %v104_v2  ;;  %v6255_v16 = vld [vmem:[%s7902_s2] sm:$0x3]  ;;  %v122_v21 = vld [vmem:[#allocation7 + $0x1c8] sm:$0xff]  ;;  %v167_v27 = vld [vmem:[#allocation7 + $0x330] sm:$0xff]  ;;  %v6268_v29 = vpack.c.bf16 %v109_v15, %v103_v12  ;;  %s2741_s2 = scalar_lea.vmem [#allocation6], %s2740_s29 }
  0x45   :  { %4473 = vmatprep.subr.bf16.mxu1 %v6235_v59  ;;  %7992 = vst [vmem:[#allocation16_spill] sm:$0xff] %v6255_v16  ;;  %v6259_v17 = vrot.slane %v6255_v16, %v6238_v62  ;;  %v161_v24 = vld [vmem:[#allocation7 + $0x300] sm:$0xff]  ;;  %v174_v28 = vld [vmem:[#allocation7 + $0x368] sm:$0xff]  ;;  %v180_v30 = vld [vmem:[#allocation7 + $0x398] sm:$0xff]  ;;  %v6272_v33 = vpack.c.bf16 %v122_v21, %v116_v18  ;;  %p6087_p9 = pnand %p6086_p8, %p6080_p5 }
  0x46   :  { %v115_v34 = vld [vmem:[#allocation7 + $0x190] sm:$0xff]  ;;  %v121_v36 = vld [vmem:[#allocation7 + $0x1c0] sm:$0xff]  ;;  %v128_v37 = vld [vmem:[#allocation7 + $0x1f8] sm:$0xff]  ;;  %v6276_v39 = vpack.c.bf16 %v167_v27, %v161_v24  ;;  %v4436_v41 = vpack.c.bf16 %v180_v30, %v174_v28 }
  0x47   :  { %4419 = vmatpush1.bf16.msra.mxu0 %v6210_v32  ;;  %364 = vmatprep.mubr.f32.mxu0 %v6259_v17  ;;  %v134_v38 = vld [vmem:[#allocation7 + $0x228] sm:$0xff]  ;;  %v173_v42 = vld [vmem:[#allocation7 + $0x360] sm:$0xff]  ;;  %v179_v44 = vld [vmem:[#allocation7 + $0x390] sm:$0xff]  ;;  %v6280_v48 = vpack.c.bf16 %v121_v36, %v115_v34 }
  0x48   :  { %4421 = vmatprep.subr.bf16.mxu0 %v6213_v35  ;;  %4475 = vmatpush1.bf16.msra.mxu1 %v6247_v9  ;;  %v186_v45 = vld [vmem:[#allocation7 + $0x3c8] sm:$0xff]  ;;  %v192_v50 = vld [vmem:[#allocation7 + $0x3f8] sm:$0xff]  ;;  %v6283_v52 = vpack.c.bf16 %v134_v38, %v128_v37  ;;  %v127_v53 = vld [vmem:[#allocation7 + $0x1f0] sm:$0xff]  ;;  %v4438_v58 = vpack.c.bf16 %v179_v44, %v173_v42 }
  0x49   :  { %4477 = vmatprep.subr.bf16.mxu1 %v6250_v11  ;;  %435 = vmatprep.mubr.f32.mxu1 %v6259_v17  ;;  %v133_v54 = vld [vmem:[#allocation7 + $0x220] sm:$0xff]  ;;  %v140_v55 = vld [vmem:[#allocation7 + $0x258] sm:$0xff]  ;;  %v146_v57 = vld [vmem:[#allocation7 + $0x288] sm:$0xff]  ;;  %v4440_v60 = vpack.c.bf16 %v192_v50, %v186_v45 }
  0x4a   :  { %v185_v61 = vld [vmem:[#allocation7 + $0x3c0] sm:$0xff]  ;;  %v191_v0 = vld [vmem:[#allocation7 + $0x3f0] sm:$0xff]  ;;  %v198_v1 = vld [vmem:[#allocation7 + $0x428] sm:$0xff]  ;;  %v6287_v2 = vpack.c.bf16 %v133_v54, %v127_v53  ;;  %v6290_v6 = vpack.c.bf16 %v146_v57, %v140_v55 }
  0x4b   :  { %4423 = vmatpush1.bf16.msra.mxu0 %v6223_v47  ;;  %v204_v5 = vld [vmem:[#allocation7 + $0x458] sm:$0xff]  ;;  %v139_v10 = vld [vmem:[#allocation7 + $0x250] sm:$0xff]  ;;  %v145_v12 = vld [vmem:[#allocation7 + $0x280] sm:$0xff]  ;;  %v4442_v21 = vpack.c.bf16 %v191_v0, %v185_v61 }
  0x4c   :  { %4425 = vmatprep.subr.bf16.mxu0 %v6229_v51  ;;  %4479 = vmatpush1.bf16.msra.mxu1 %v6268_v29  ;;  %v152_v15 = vld [vmem:[#allocation7 + $0x2b8] sm:$0xff]  ;;  %v158_v18 = vld [vmem:[#allocation7 + $0x2e8] sm:$0xff]  ;;  %v4444_v24 = vpack.c.bf16 %v204_v5, %v198_v1  ;;  %v197_v27 = vld [vmem:[#allocation7 + $0x420] sm:$0xff]  ;;  %v6293_v34 = vpack.c.bf16 %v145_v12, %v139_v10 }
  0x4d   :  { %4481 = vmatprep.subr.bf16.mxu1 %v6272_v33  ;;  %v203_v28 = vld [vmem:[#allocation7 + $0x450] sm:$0xff]  ;;  %v210_v30 = vld [vmem:[#allocation7 + $0x488] sm:$0xff]  ;;  %v216_v36 = vld [vmem:[#allocation7 + $0x4b8] sm:$0xff]  ;;  %v6296_v37 = vpack.c.bf16 %v158_v18, %v152_v15 }
  0x4e   :  { %v151_v38 = vld [vmem:[#allocation7 + $0x2b0] sm:$0xff]  ;;  %v164_v42 = vld [vmem:[#allocation7 + $0x318] sm:$0xff]  ;;  %v170_v44 = vld [vmem:[#allocation7 + $0x348] sm:$0xff]  ;;  %v4446_v45 = vpack.c.bf16 %v203_v28, %v197_v27  ;;  %v4448_v50 = vpack.c.bf16 %v216_v36, %v210_v30 }
  0x4f   :  { %4427 = vmatpush1.bf16.msra.mxu0 %v6241_v63  ;;  %v209_v53 = vld [vmem:[#allocation7 + $0x480] sm:$0xff]  ;;  %v215_v54 = vld [vmem:[#allocation7 + $0x4b0] sm:$0xff]  ;;  %v222_v55 = vld [vmem:[#allocation7 + $0x4e8] sm:$0xff] }
  0x50   :  { %4429 = vmatprep.subr.bf16.mxu0 %v6244_v4  ;;  %4483 = vmatpush1.bf16.msra.mxu1 %v6280_v48  ;;  %v163_v61 = vld [vmem:[#allocation7 + $0x310] sm:$0xff]  ;;  %v169_v0 = vld [vmem:[#allocation7 + $0x340] sm:$0xff]  ;;  %v176_v1 = vld [vmem:[#allocation7 + $0x378] sm:$0xff]  ;;  %v4450_v10 = vpack.c.bf16 %v215_v54, %v209_v53 }
  0x51   :  { %4485 = vmatprep.subr.bf16.mxu1 %v6283_v52  ;;  %v182_v5 = vld [vmem:[#allocation7 + $0x3a8] sm:$0xff]  ;;  %v221_v15 = vld [vmem:[#allocation7 + $0x4e0] sm:$0xff]  ;;  %v227_v18 = vld [vmem:[#allocation7 + $0x510] sm:$0xff] }
  0x52   :  { %v240_v27 = vld [vmem:[#allocation7 + $0x578] sm:$0xff]  ;;  %v6308_v28 = vpack.c.bf16 %v182_v5, %v176_v1  ;;  %v175_v30 = vld [vmem:[#allocation7 + $0x370] sm:$0xff]  ;;  %v181_v36 = vld [vmem:[#allocation7 + $0x3a0] sm:$0xff] }
  0x53   :  { %4431 = vmatpush1.bf16.msra.mxu0 %v6262_v22  ;;  %v246_v53 = vld [vmem:[#allocation7 + $0x5a8] sm:$0xff]  ;;  %v6311_v54 = vpack.c.bf16 %v181_v36, %v175_v30  ;;  %v200_v1 = vld [vmem:[#allocation7 + $0x438] sm:$0xff]  ;;  %v211_v46 = vld [vmem:[#allocation7 + $0x490] sm:$0xff] }
  0x54   :  { %4433 = vmatprep.subr.bf16.mxu0 %v6265_v23  ;;  %4487 = vmatpush1.bf16.msra.mxu1 %v6287_v2  ;;  %v206_v5 = vld [vmem:[#allocation7 + $0x468] sm:$0xff]  ;;  %v76_v30 = vld [vmem:[#allocation7 + $0x58] sm:$0xff]  ;;  %v217_v62 = vld [vmem:[#allocation7 + $0x4c0] sm:$0xff] }
  0x55   :  { %4489 = vmatprep.subr.bf16.mxu1 %v6290_v6  ;;  %v6320_v36 = vpack.c.bf16 %v206_v5, %v200_v1  ;;  %v88_v1 = vld [vmem:[#allocation7 + $0xb8] sm:$0xff] }
  0x57   :  { %4435 = vmatpush1.bf16.msra.mxu0 %v6276_v39  ;;  %7993 = vst [vmem:[#allocation17_spill] sm:$0xff] %v6320_v36 }
  0x58   :  { %4437 = vmatprep.subr.bf16.mxu0 %v4436_v41  ;;  %v157_v41 = vld [vmem:[#allocation7 + $0x2e0] sm:$0xff]  ;;  %4491 = vmatpush1.bf16.msra.mxu1 %v6293_v34 }
  0x59   :  { %v6299_v57 = vpack.c.bf16 %v157_v41, %v151_v38  ;;  %4493 = vmatprep.subr.bf16.mxu1 %v6296_v37  ;;  %v188_v38 = vld [vmem:[#allocation7 + $0x3d8] sm:$0xff]  ;;  %v194_v41 = vld [vmem:[#allocation7 + $0x408] sm:$0xff] }
  0x5b   :  { %4439 = vmatpush1.bf16.msra.mxu0 %v4438_v58  ;;  %v228_v58 = vld [vmem:[#allocation7 + $0x518] sm:$0xff] }
  0x5c   :  { %4441 = vmatprep.subr.bf16.mxu0 %v4440_v60  ;;  %v6302_v60 = vpack.c.bf16 %v170_v44, %v164_v42  ;;  %v4452_v12 = vpack.c.bf16 %v228_v58, %v222_v55  ;;  %4495 = vmatpush1.bf16.msra.mxu1 %v6299_v57  ;;  %v4454_v42 = vpack.c.bf16 %v227_v18, %v221_v15  ;;  %v252_v55 = vld [vmem:[#allocation7 + $0x5d8] sm:$0xff]  ;;  %v245_v15 = vld [vmem:[#allocation7 + $0x5a0] sm:$0xff]  ;;  %v251_v18 = vld [vmem:[#allocation7 + $0x5d0] sm:$0xff] }
  0x5d   :  { %v6314_v58 = vpack.c.bf16 %v194_v41, %v188_v38  ;;  %v199_v38 = vld [vmem:[#allocation7 + $0x430] sm:$0xff]  ;;  %v205_v41 = vld [vmem:[#allocation7 + $0x460] sm:$0xff] }
  0x5e   :  { %4497 = vmatprep.subr.bf16.mxu1 %v6302_v60 }
  0x5f   :  { %4443 = vmatpush1.bf16.msra.mxu0 %v4442_v21  ;;  %v234_v21 = vld [vmem:[#allocation7 + $0x548] sm:$0xff] }
  0x60   :  { %4445 = vmatprep.subr.bf16.mxu0 %v4444_v24  ;;  %v6305_v24 = vpack.c.bf16 %v169_v0, %v163_v61  ;;  %v4456_v44 = vpack.c.bf16 %v240_v27, %v234_v21  ;;  %v187_v61 = vld [vmem:[#allocation7 + $0x3d0] sm:$0xff]  ;;  %v193_v0 = vld [vmem:[#allocation7 + $0x400] sm:$0xff]  ;;  %v70_v21 = vld [vmem:[#allocation7 + $0x28] sm:$0xff] }
  0x61   :  { %v6317_v27 = vpack.c.bf16 %v193_v0, %v187_v61  ;;  %v82_v61 = vld [vmem:[#allocation7 + $0x88] sm:$0xff]  ;;  %v6326_v0 = vpack.c.bf16 %v205_v41, %v199_v38  ;;  %v87_v38 = vld [vmem:[#allocation7 + $0xb0] sm:$0xff] }
  0x62   :  { %4499 = vmatpush1.bf16.msra.mxu1 %v6305_v24  ;;  %v94_v41 = vld [vmem:[#allocation7 + $0xe8] sm:$0xff] }
  0x63   :  { %4447 = vmatpush1.bf16.msra.mxu0 %v4446_v45  ;;  %v233_v45 = vld [vmem:[#allocation7 + $0x540] sm:$0xff]  ;;  %4501 = vmatprep.subr.bf16.mxu1 %v6308_v28  ;;  %7995 = vst [vmem:[#allocation19_spill] sm:$0xff] %v6326_v0 }
  0x64   :  { %4449 = vmatprep.subr.bf16.mxu0 %v4448_v50  ;;  %v239_v50 = vld [vmem:[#allocation7 + $0x570] sm:$0xff] }
  0x66   :  { %4503 = vmatpush1.bf16.msra.mxu1 %v6311_v54 }
  0x67   :  { %4451 = vmatpush1.bf16.msra.mxu0 %v4450_v10  ;;  %v4458_v10 = vpack.c.bf16 %v239_v50, %v233_v45  ;;  %4505 = vmatprep.subr.bf16.mxu1 %v6314_v58  ;;  %v4462_v45 = vpack.c.bf16 %v251_v18, %v245_v15  ;;  %v4528_v50 = vpack.c.bf16 %v76_v30, %v70_v21  ;;  %v230_v15 = vld [vmem:[#allocation7 + $0x528] sm:$0xff]  ;;  %v81_v30 = vld [vmem:[#allocation7 + $0x80] sm:$0xff] }
  0x68   :  { %4453 = vmatprep.subr.bf16.mxu0 %v4452_v12  ;;  %v4460_v12 = vpack.c.bf16 %v252_v55, %v246_v53  ;;  %v69_v53 = vld [vmem:[#allocation7 + $0x20] sm:$0xff]  ;;  %v75_v55 = vld [vmem:[#allocation7 + $0x50] sm:$0xff]  ;;  %v4532_v21 = vpack.c.bf16 %v88_v1, %v82_v61 }
  0x69   :  { %v4530_v18 = vpack.c.bf16 %v75_v55, %v69_v53  ;;  %v242_v53 = vld [vmem:[#allocation7 + $0x588] sm:$0xff]  ;;  %v93_v61 = vld [vmem:[#allocation7 + $0xe0] sm:$0xff] }
  0x6a   :  { %4507 = vmatpush1.bf16.msra.mxu1 %v6317_v27 }
  0x6b   :  { %4455 = vmatpush1.bf16.msra.mxu0 %v4454_v42  ;;  %v212_v42 = vld [vmem:[#allocation7 + $0x498] sm:$0xff]  ;;  %4509 = vmatprep.subr.bf16.mxu1 %v6320_v36  ;;  %v6336_v36 = vpack.c.bf16 %v217_v62, %v211_v46  ;;  %v99_v46 = vld [vmem:[#allocation7 + $0x110] sm:$0xff]  ;;  %v106_v62 = vld [vmem:[#allocation7 + $0x148] sm:$0xff] }
  0x6c   :  { %4457 = vmatprep.subr.bf16.mxu0 %v4456_v44  ;;  %v218_v44 = vld [vmem:[#allocation7 + $0x4c8] sm:$0xff] }
  0x6d   :  { %v6329_v5 = vpack.c.bf16 %v218_v44, %v212_v42  ;;  %7997 = vst [vmem:[#allocation21_spill] sm:$0xff] %v6336_v36  ;;  %v100_v42 = vld [vmem:[#allocation7 + $0x118] sm:$0xff] }
  0x6e   :  { %4511 = vmatpush1.bf16.msra.mxu1 %v6326_v0  ;;  %v4536_v55 = vpack.c.bf16 %v100_v42, %v94_v41  ;;  %v241_v0 = vld [vmem:[#allocation7 + $0x580] sm:$0xff]  ;;  %v111_v41 = vld [vmem:[#allocation7 + $0x170] sm:$0xff]  ;;  %v118_v42 = vld [vmem:[#allocation7 + $0x1a8] sm:$0xff] }
  0x6f   :  { %4459 = vmatpush1.bf16.msra.mxu0 %v4458_v10  ;;  %7996 = vst [vmem:[#allocation20_spill] sm:$0xff] %v6329_v5  ;;  %v6333_v10 = vrot.slane %v6255_v16, %v6323_v31  ;;  %4513 = vmatprep.subr.bf16.mxu1 %v6329_v5  ;;  %v223_v16 = vld [vmem:[#allocation7 + $0x4f0] sm:$0xff]  ;;  %v229_v31 = vld [vmem:[#allocation7 + $0x520] sm:$0xff] }
  0x70   :  { %4461 = vmatprep.subr.bf16.mxu0 %v4460_v12  ;;  %v224_v12 = vld [vmem:[#allocation7 + $0x4f8] sm:$0xff]  ;;  %v6344_v1 = vpack.c.bf16 %v229_v31, %v223_v16  ;;  %v235_v5 = vld [vmem:[#allocation7 + $0x550] sm:$0xff] }
  0x71   :  { %v6339_v44 = vpack.c.bf16 %v230_v15, %v224_v12  ;;  %v112_v12 = vld [vmem:[#allocation7 + $0x178] sm:$0xff]  ;;  %v6350_v31 = vpack.c.bf16 %v241_v0, %v235_v5  ;;  %v130_v0 = vld [vmem:[#allocation7 + $0x208] sm:$0xff] }
  0x72   :  { %4515 = vmatpush1.bf16.msra.mxu1 %v6336_v36  ;;  %v124_v16 = vld [vmem:[#allocation7 + $0x1d8] sm:$0xff] }
  0x73   :  { %4463 = vmatpush1.bf16.msra.mxu0 %v4462_v45  ;;  %7998 = vst [vmem:[#allocation22_spill] sm:$0xff] %v6339_v44  ;;  %v236_v45 = vld [vmem:[#allocation7 + $0x558] sm:$0xff]  ;;  %4517 = vmatprep.subr.bf16.mxu1 %v6339_v44  ;;  %v253_v44 = vld [vmem:[#allocation7 + $0x5e0] sm:$0xff] }
  0x74   :  { %4529 = vmatprep.subr.bf16.mxu0 %v4528_v50  ;;  %v4534_v50 = vpack.c.bf16 %v87_v38, %v81_v30  ;;  %v6347_v15 = vpack.c.bf16 %v242_v53, %v236_v45  ;;  %v254_v30 = vld [vmem:[#allocation7 + $0x5e8] sm:$0xff]  ;;  %v105_v38 = vld [vmem:[#allocation7 + $0x140] sm:$0xff]  ;;  %v247_v53 = vld [vmem:[#allocation7 + $0x5b0] sm:$0xff] }
  0x75   :  { %v4542_v36 = vpack.c.bf16 %v111_v41, %v105_v38  ;;  %v136_v5 = vld [vmem:[#allocation7 + $0x238] sm:$0xff]  ;;  %v141_v38 = vld [vmem:[#allocation7 + $0x260] sm:$0xff]  ;;  %v147_v41 = vld [vmem:[#allocation7 + $0x290] sm:$0xff] }
  0x76   :  { %365 = vmatmul.mubr.f32.vlgmr.msra.gmra.mrb[0].mxu0 %v6333_v10  ;;  %4519 = vmatpush1.bf16.msra.mxu1 %v6344_v1 }
  0x77   :  { %4531 = vmatpush1.bf16.msra.mxu0 %v4530_v18  ;;  %506 = vmatprep.mubr.f32.mxu0 %v6259_v17  ;;  %v248_v18 = vld [vmem:[#allocation7 + $0x5b8] sm:$0xff]  ;;  %v4538_v17 = vpack.c.bf16 %v99_v46, %v93_v61  ;;  %v123_v61 = vld [vmem:[#allocation7 + $0x1d0] sm:$0xff]  ;;  %v6358_v46 = vpack.c.bf16 %v253_v44, %v247_v53 }
  0x78   :  { %4533 = vmatprep.subr.bf16.mxu0 %v4532_v21  ;;  %v4540_v21 = vpack.c.bf16 %v112_v12, %v106_v62  ;;  %4521 = vmatprep.subr.bf16.mxu1 %v6347_v15  ;;  %v6353_v45 = vpack.c.bf16 %v254_v30, %v248_v18  ;;  %v6364_v12 = vpack.c.bf16 %v136_v5, %v130_v0  ;;  %v129_v18 = vld [vmem:[#allocation7 + $0x200] sm:$0xff]  ;;  %v135_v30 = vld [vmem:[#allocation7 + $0x230] sm:$0xff]  ;;  %v166_v0 = vld [vmem:[#allocation7 + $0x328] sm:$0xff] }
  0x79   :  { %v6369_v44 = vpack.c.bf16 %v135_v30, %v129_v18  ;;  %v172_v5 = vld [vmem:[#allocation7 + $0x358] sm:$0xff]  ;;  %v165_v18 = vld [vmem:[#allocation7 + $0x320] sm:$0xff]  ;;  %v171_v30 = vld [vmem:[#allocation7 + $0x350] sm:$0xff] }
  0x7a   :  { %4523 = vmatpush1.bf16.msra.mxu1 %v6350_v31 }
  0x7b   :  { %4535 = vmatpush1.bf16.msra.mxu0 %v4534_v50  ;;  %v6355_v50 = vpack.c.bf16 %v124_v16, %v118_v42  ;;  %4525 = vmatprep.subr.bf16.mxu1 %v6353_v45  ;;  %v154_v42 = vld [vmem:[#allocation7 + $0x2c8] sm:$0xff]  ;;  %v160_v16 = vld [vmem:[#allocation7 + $0x2f8] sm:$0xff] }
  0x7c   :  { %4537 = vmatprep.subr.bf16.mxu0 %v4536_v55  ;;  %v117_v55 = vld [vmem:[#allocation7 + $0x1a0] sm:$0xff]  ;;  %v6381_v53 = vpack.c.bf16 %v160_v16, %v154_v42  ;;  %v190_v42 = vld [vmem:[#allocation7 + $0x3e8] sm:$0xff]  ;;  %v196_v16 = vld [vmem:[#allocation7 + $0x418] sm:$0xff] }
  0x7d   :  { %v6361_v62 = vpack.c.bf16 %v123_v61, %v117_v55  ;;  %v153_v55 = vld [vmem:[#allocation7 + $0x2c0] sm:$0xff]  ;;  %v159_v61 = vld [vmem:[#allocation7 + $0x2f0] sm:$0xff] }
  0x7e   :  { %4527 = vmatpush1.bf16.msra.mxu1 %v6358_v46 }
  0x7f   :  { %4539 = vmatpush1.bf16.msra.mxu0 %v4538_v17  ;;  %v142_v17 = vld [vmem:[#allocation7 + $0x268] sm:$0xff]  ;;  %4593 = vmatprep.subr.bf16.mxu1 %v6184_v3  ;;  %v6378_v3 = vpack.c.bf16 %v147_v41, %v141_v38  ;;  %v177_v38 = vld [vmem:[#allocation7 + $0x380] sm:$0xff]  ;;  %v183_v41 = vld [vmem:[#allocation7 + $0x3b0] sm:$0xff] }
  0x80   :  { %4541 = vmatprep.subr.bf16.mxu0 %v4540_v21  ;;  %v148_v21 = vld [vmem:[#allocation7 + $0x298] sm:$0xff] }
  0x81   :  { %436 = vmatmul.mubr.f32.vlgmr.msra.gmra.mrb[0].mxu1 %v6333_v10 }
  0x82   :  { %4595 = vmatpush1.bf16.msra.mxu1 %v6186_v7  ;;  %v6386_v7 = vpack.c.bf16 %v159_v61, %v153_v55  ;;  %v189_v55 = vld [vmem:[#allocation7 + $0x3e0] sm:$0xff]  ;;  %v195_v61 = vld [vmem:[#allocation7 + $0x410] sm:$0xff] }
  0x83   :  { %4543 = vmatpush1.bf16.msra.mxu0 %v4542_v36  ;;  %v6373_v36 = vpack.c.bf16 %v148_v21, %v142_v17  ;;  %4597 = vmatprep.subr.bf16.mxu1 %v6188_v8  ;;  %v6389_v8 = vpack.c.bf16 %v172_v5, %v166_v0  ;;  %v178_v17 = vld [vmem:[#allocation7 + $0x388] sm:$0xff]  ;;  %v184_v21 = vld [vmem:[#allocation7 + $0x3b8] sm:$0xff] }
  0x84   :  { %4545 = vmatprep.subr.bf16.mxu0 %v6355_v50  ;;  %v202_v0 = vld [vmem:[#allocation7 + $0x448] sm:$0xff]  ;;  %v208_v5 = vld [vmem:[#allocation7 + $0x478] sm:$0xff] }
  0x86   :  { %4599 = vmatpush1.bf16.msra.mxu1 %v6192_v13  ;;  %v6394_v13 = vpack.c.bf16 %v171_v30, %v165_v18  ;;  %v201_v18 = vld [vmem:[#allocation7 + $0x440] sm:$0xff]  ;;  %v207_v30 = vld [vmem:[#allocation7 + $0x470] sm:$0xff] }
  0x87   :  { %4547 = vmatpush1.bf16.msra.mxu0 %v6361_v62  ;;  %4601 = vmatprep.subr.bf16.mxu1 %v6195_v14  ;;  %v6397_v14 = vpack.c.bf16 %v184_v21, %v178_v17  ;;  %v214_v17 = vld [vmem:[#allocation7 + $0x4a8] sm:$0xff]  ;;  %v220_v21 = vld [vmem:[#allocation7 + $0x4d8] sm:$0xff] }
  0x88   :  { %4549 = vmatprep.subr.bf16.mxu0 %v6364_v12 }
  0x8a   :  { %4603 = vmatpush1.bf16.msra.mxu1 %v6198_v19  ;;  %v6402_v19 = vpack.c.bf16 %v183_v41, %v177_v38  ;;  %v213_v38 = vld [vmem:[#allocation7 + $0x4a0] sm:$0xff]  ;;  %v219_v41 = vld [vmem:[#allocation7 + $0x4d0] sm:$0xff] }
  0x8b   :  { %4551 = vmatpush1.bf16.msra.mxu0 %v6369_v44  ;;  %4605 = vmatprep.subr.bf16.mxu1 %v6201_v20  ;;  %v6405_v20 = vpack.c.bf16 %v196_v16, %v190_v42  ;;  %v226_v42 = vld [vmem:[#allocation7 + $0x508] sm:$0xff]  ;;  %v232_v16 = vld [vmem:[#allocation7 + $0x538] sm:$0xff] }
  0x8c   :  { %4553 = vmatprep.subr.bf16.mxu0 %v6373_v36 }
  0x8e   :  { %4607 = vmatpush1.bf16.msra.mxu1 %v6204_v25  ;;  %v6410_v25 = vpack.c.bf16 %v195_v61, %v189_v55  ;;  %v225_v55 = vld [vmem:[#allocation7 + $0x500] sm:$0xff]  ;;  %v231_v61 = vld [vmem:[#allocation7 + $0x530] sm:$0xff] }
  0x8f   :  { %4555 = vmatpush1.bf16.msra.mxu0 %v6378_v3  ;;  %4609 = vmatprep.subr.bf16.mxu1 %v6207_v26  ;;  %v6413_v26 = vpack.c.bf16 %v208_v5, %v202_v0  ;;  %v238_v0 = vld [vmem:[#allocation7 + $0x568] sm:$0xff]  ;;  %v244_v5 = vld [vmem:[#allocation7 + $0x598] sm:$0xff] }
  0x90   :  { %4557 = vmatprep.subr.bf16.mxu0 %v6381_v53 }
  0x92   :  { %4611 = vmatpush1.bf16.msra.mxu1 %v6210_v32  ;;  %v6418_v32 = vpack.c.bf16 %v207_v30, %v201_v18  ;;  %v237_v18 = vld [vmem:[#allocation7 + $0x560] sm:$0xff]  ;;  %v243_v30 = vld [vmem:[#allocation7 + $0x590] sm:$0xff] }
  0x93   :  { %4559 = vmatpush1.bf16.msra.mxu0 %v6386_v7  ;;  %4613 = vmatprep.subr.bf16.mxu1 %v6213_v35  ;;  %v6421_v35 = vpack.c.bf16 %v220_v21, %v214_v17  ;;  %v250_v17 = vld [vmem:[#allocation7 + $0x5c8] sm:$0xff]  ;;  %v256_v21 = vld [vmem:[#allocation7 + $0x5f8] sm:$0xff] }
  0x94   :  { %4561 = vmatprep.subr.bf16.mxu0 %v6389_v8 }
  0x96   :  { %4615 = vmatpush1.bf16.msra.mxu1 %v6223_v47  ;;  %v6426_v47 = vpack.c.bf16 %v219_v41, %v213_v38  ;;  %v249_v38 = vld [vmem:[#allocation7 + $0x5c0] sm:$0xff]  ;;  %v255_v41 = vld [vmem:[#allocation7 + $0x5f0] sm:$0xff] }
  0x97   :  { %4563 = vmatpush1.bf16.msra.mxu0 %v6394_v13  ;;  %4617 = vmatprep.subr.bf16.mxu1 %v6229_v51  ;;  %v6429_v51 = vpack.c.bf16 %v232_v16, %v226_v42  ;;  %v6447_v42 = vpack.c.bf16 %v255_v41, %v249_v38  ;;  %v760_v16 = vld [vmem:[#allocation7 + $0x4e8] sm:$0xff]  ;;  %v771_v38 = vld [vmem:[#allocation7 + $0x540] sm:$0xff]  ;;  %v777_v41 = vld [vmem:[#allocation7 + $0x570] sm:$0xff] }
  0x98   :  { %4565 = vmatprep.subr.bf16.mxu0 %v6397_v14 }
  0x9a   :  { %4619 = vmatpush1.bf16.msra.mxu1 %v6241_v63  ;;  %v6434_v63 = vpack.c.bf16 %v231_v61, %v225_v55  ;;  %v766_v55 = vld [vmem:[#allocation7 + $0x518] sm:$0xff]  ;;  %v759_v61 = vld [vmem:[#allocation7 + $0x4e0] sm:$0xff] }
  0x9b   :  { %4567 = vmatpush1.bf16.msra.mxu0 %v6402_v19  ;;  %4621 = vmatprep.subr.bf16.mxu1 %v6244_v4  ;;  %v6437_v4 = vpack.c.bf16 %v244_v5, %v238_v0  ;;  %v6507_v0 = vpack.c.bf16 %v766_v55, %v760_v16  ;;  %v765_v5 = vld [vmem:[#allocation7 + $0x510] sm:$0xff] }
  0x9c   :  { %4569 = vmatprep.subr.bf16.mxu0 %v6405_v20 }
  0x9e   :  { %4623 = vmatpush1.bf16.msra.mxu1 %v6262_v22  ;;  %v6441_v22 = vpack.c.bf16 %v243_v30, %v237_v18  ;;  %v772_v18 = vld [vmem:[#allocation7 + $0x548] sm:$0xff]  ;;  %v778_v30 = vld [vmem:[#allocation7 + $0x578] sm:$0xff] }
  0x9f   :  { %4571 = vmatpush1.bf16.msra.mxu0 %v6410_v25  ;;  %4625 = vmatprep.subr.bf16.mxu1 %v6265_v23  ;;  %v6444_v23 = vpack.c.bf16 %v256_v21, %v250_v17  ;;  %v6510_v17 = vpack.c.bf16 %v765_v5, %v759_v61  ;;  %v6513_v21 = vpack.c.bf16 %v778_v30, %v772_v18  ;;  %v6116_v30 = vmov 1966171168  }
  0xa0   :  { %4573 = vmatprep.subr.bf16.mxu0 %v6413_v26 }
  0xa2   :  { %4627 = vmatpush1.bf16.msra.mxu1 %v6276_v39  ;;  %v717_v39 = vld [vmem:[#allocation7 + $0x390] sm:$0xff] }
  0xa3   :  { %4575 = vmatpush1.bf16.msra.mxu0 %v6418_v32 }
  0xa4   :  { %4577 = vmatprep.subr.bf16.mxu0 %v6421_v35 }
  0xa7   :  { %4579 = vmatpush1.bf16.msra.mxu0 %v6426_v47 }
  0xa8   :  { %4581 = vmatprep.subr.bf16.mxu0 %v6429_v51 }
  0xab   :  { %4583 = vmatpush1.bf16.msra.mxu0 %v6434_v63 }
  0xac   :  { %4585 = vmatprep.subr.bf16.mxu0 %v6437_v4 }
  0xaf   :  { %4587 = vmatpush1.bf16.msra.mxu0 %v6441_v22 }
  0xb0   :  { %4589 = vmatprep.subr.bf16.mxu0 %v6444_v23 }
  0xb3   :  { %4591 = vmatpush1.bf16.msra.mxu0 %v6447_v42 }
  0xb4   :  { %4657 = vmatprep.subr.bf16.mxu0 %v6215_v40  ;;  %v7999_v40 = vld [vmem:[#allocation17_spill] sm:$0xff] }
  0xb6   :  { %507 = vmatmul.mubr.f32.vlgmr.msra.gmra.mrb[2].mxu0 %v6333_v10  ;;  %v748_v10 = vld [vmem:[#allocation7 + $0x488] sm:$0xff] }
  0xb7   :  { %4659 = vmatpush1.bf16.msra.mxu0 %v6217_v43  ;;  %v8000_v43 = vld [vmem:[#allocation19_spill] sm:$0xff] }
  0xb8   :  { %4661 = vmatprep.subr.bf16.mxu0 %v6226_v49  ;;  %v8001_v49 = vld [vmem:[#allocation20_spill] sm:$0xff] }
  0xbb   :  { %4663 = vmatpush1.bf16.msra.mxu0 %v6233_v56  ;;  %v8002_v56 = vld [vmem:[#allocation21_spill] sm:$0xff] }
  0xbc   :  { %4665 = vmatprep.subr.bf16.mxu0 %v6235_v59  ;;  %v8003_v59 = vld [vmem:[#allocation22_spill] sm:$0xff] }
  0xbf   :  { %4667 = vmatpush1.bf16.msra.mxu0 %v6247_v9  ;;  %v712_v9 = vld [vmem:[#allocation7 + $0x368] sm:$0xff] }
  0xc0   :  { %4669 = vmatprep.subr.bf16.mxu0 %v6250_v11  ;;  %v718_v11 = vld [vmem:[#allocation7 + $0x398] sm:$0xff] }
  0xc3   :  { %4671 = vmatpush1.bf16.msra.mxu0 %v6268_v29  ;;  %v6484_v29 = vpack.c.bf16 %v718_v11, %v712_v9  ;;  %v789_v9 = vld [vmem:[#allocation7 + $0x5d0] sm:$0xff] }
  0xc4   :  { %4673 = vmatprep.subr.bf16.mxu0 %v6272_v33  ;;  %v711_v33 = vld [vmem:[#allocation7 + $0x360] sm:$0xff] }
  0xc5   :  { %4629 = vmatprep.subr.bf16.mxu1 %v6484_v29 }
  0xc7   :  { %4675 = vmatpush1.bf16.msra.mxu0 %v6280_v48  ;;  %v6486_v48 = vpack.c.bf16 %v717_v39, %v711_v33  ;;  %v608_v33 = vld [vmem:[#allocation7 + $0x28] sm:$0xff]  ;;  %v614_v39 = vld [vmem:[#allocation7 + $0x58] sm:$0xff] }
  0xc8   :  { %4677 = vmatprep.subr.bf16.mxu0 %v6283_v52  ;;  %v724_v52 = vld [vmem:[#allocation7 + $0x3c8] sm:$0xff] }
  0xc9   :  { %4631 = vmatpush1.bf16.msra.mxu1 %v6486_v48 }
  0xcb   :  { %4679 = vmatpush1.bf16.msra.mxu0 %v6287_v2  ;;  %v730_v2 = vld [vmem:[#allocation7 + $0x3f8] sm:$0xff] }
  0xcc   :  { %4681 = vmatprep.subr.bf16.mxu0 %v6290_v6  ;;  %v6490_v6 = vpack.c.bf16 %v730_v2, %v724_v52  ;;  %v6526_v52 = vpack.c.bf16 %v614_v39, %v608_v33  ;;  %v257_v2 = vld [vmem:[%s7904_s4] sm:$0x3f] }
  0xce   :  { %4633 = vmatprep.subr.bf16.mxu1 %v6490_v6 }
  0xcf   :  { %4683 = vmatpush1.bf16.msra.mxu0 %v6293_v34  ;;  %v723_v34 = vld [vmem:[#allocation7 + $0x3c0] sm:$0xff] }
  0xd0   :  { %4685 = vmatprep.subr.bf16.mxu0 %v6296_v37  ;;  %v729_v37 = vld [vmem:[#allocation7 + $0x3f0] sm:$0xff] }
  0xd3   :  { %4687 = vmatpush1.bf16.msra.mxu0 %v6299_v57  ;;  %v6492_v57 = vpack.c.bf16 %v729_v37, %v723_v34  ;;  %v8004_v34 = vld [vmem:[#allocation18_spill] sm:$0xff] }
  0xd4   :  { %4689 = vmatprep.subr.bf16.mxu0 %v6302_v60  ;;  %v736_v60 = vld [vmem:[#allocation7 + $0x428] sm:$0xff]  ;;  %v273_v37 = vrot.slane %v257_v2, %v8004_v34 }
  0xd5   :  { %4635 = vmatpush1.bf16.msra.mxu1 %v6492_v57 }
  0xd7   :  { %4691 = vmatpush1.bf16.msra.mxu0 %v6305_v24  ;;  %v742_v24 = vld [vmem:[#allocation7 + $0x458] sm:$0xff] }
  0xd8   :  { %4693 = vmatprep.subr.bf16.mxu0 %v6308_v28  ;;  %v6496_v28 = vpack.c.bf16 %v742_v24, %v736_v60  ;;  %v8005_v60 = vld [vmem:[#allocation15_spill] sm:$0xff] }
  0xd9   :  { %v277_v24 = vrot.slane %v257_v2, %v8005_v60 }
  0xda   :  { %4637 = vmatprep.subr.bf16.mxu1 %v6496_v28 }
  0xdb   :  { %4695 = vmatpush1.bf16.msra.mxu0 %v6311_v54  ;;  %v735_v54 = vld [vmem:[#allocation7 + $0x420] sm:$0xff] }
  0xdc   :  { %4697 = vmatprep.subr.bf16.mxu0 %v6314_v58  ;;  %v741_v58 = vld [vmem:[#allocation7 + $0x450] sm:$0xff] }
  0xdf   :  { %4699 = vmatpush1.bf16.msra.mxu0 %v6317_v27  ;;  %v6498_v27 = vpack.c.bf16 %v741_v58, %v735_v54 }
  0xe0   :  { %4701 = vmatprep.subr.bf16.mxu0 %v7999_v40  ;;  %v784_v40 = vld [vmem:[#allocation7 + $0x5a8] sm:$0xff] }
  0xe1   :  { %4639 = vmatpush1.bf16.msra.mxu1 %v6498_v27 }
  0xe3   :  { %4703 = vmatpush1.bf16.msra.mxu0 %v8000_v43  ;;  %v790_v43 = vld [vmem:[#allocation7 + $0x5d8] sm:$0xff] }
  0xe4   :  { %4705 = vmatprep.subr.bf16.mxu0 %v8001_v49  ;;  %v6516_v49 = vpack.c.bf16 %v777_v41, %v771_v38  ;;  %v517_v38 = vunpack.c.l.s4 %v6116_v30 }
  0xe7   :  { %4707 = vmatpush1.bf16.msra.mxu0 %v8002_v56  ;;  %v6519_v56 = vpack.c.bf16 %v790_v43, %v784_v40 }
  0xe8   :  { %4709 = vmatprep.subr.bf16.mxu0 %v8003_v59  ;;  %v783_v59 = vld [vmem:[#allocation7 + $0x5a0] sm:$0xff] }
  0xe9   :  { %v6522_v11 = vpack.c.bf16 %v789_v9, %v783_v59  ;;  %v518_v9 = vunpack.c.0.s8 %v517_v38 }
  0xeb   :  { %4711 = vmatpush1.bf16.msra.mxu0 %v6344_v1  ;;  %v754_v1 = vld [vmem:[#allocation7 + $0x4b8] sm:$0xff] }
  0xec   :  { %4713 = vmatprep.subr.bf16.mxu0 %v6347_v15  ;;  %v6502_v15 = vpack.c.bf16 %v754_v1, %v748_v10 }
  0xee   :  { %4641 = vmatprep.subr.bf16.mxu1 %v6502_v15 }
  0xef   :  { %4715 = vmatpush1.bf16.msra.mxu0 %v6350_v31  ;;  %v747_v31 = vld [vmem:[#allocation7 + $0x480] sm:$0xff] }
  0xf0   :  { %4717 = vmatprep.subr.bf16.mxu0 %v6353_v45  ;;  %v753_v45 = vld [vmem:[#allocation7 + $0x4b0] sm:$0xff] }
  0xf3   :  { %4719 = vmatpush1.bf16.msra.mxu0 %v6358_v46  ;;  %v6504_v46 = vpack.c.bf16 %v753_v45, %v747_v31  ;;  %v8006_v45 = vld [vmem:[#allocation14_spill] sm:$0xff] }
  0xf4   :  { %v6535_v16 = vsub.s32 2, %v8006_v45  ;;  %v6538_v55 = vsub.s32 3, %v8006_v45  ;;  %v6543_v33 = vsub.s32 %v518_v9, %v8006_v45  ;;  %v6550_v38 = vsub.s32 4, %v8006_v45 }
  0xf5   :  { %4643 = vmatpush1.bf16.msra.mxu1 %v6504_v46 }
  0xf6   :  { %4645 = vmatprep.subr.bf16.mxu1 %v6507_v0  ;;  %8007 = vst [vmem:[#allocation17_spill] sm:$0xff] %v6535_v16  ;;  %8008 = vst [vmem:[#allocation19_spill] sm:$0xff] %v6538_v55  ;;  %v281_v61 = vrot.slane %v257_v2, %v6535_v16  ;;  %v285_v5 = vrot.slane %v257_v2, %v6538_v55  ;;  %v8011_v55 = vld [vmem:[#allocation16_spill] sm:$0xff] }
  0xf7   :  { %8009 = vst [vmem:[#allocation20_spill] sm:$0xff] %v6550_v38 }
  0xf9   :  { %4647 = vmatpush1.bf16.msra.mxu1 %v6510_v17 }
  0xfa   :  { %4649 = vmatprep.subr.bf16.mxu1 %v6513_v21 }
  0xfd   :  { %4651 = vmatpush1.bf16.msra.mxu1 %v6516_v49 }
  0xfe   :  { %4653 = vmatprep.subr.bf16.mxu1 %v6519_v56 }
 0x101   :  { %4655 = vmatpush1.bf16.msra.mxu1 %v6522_v11 }
 0x102   :  { %4721 = vmatprep.subr.bf16.mxu1 %v6526_v52 }
 0x149   :  { %v366_v54 = vpop.f32.mrb[0].mxu0 }
 0x14a   :  { %v367_v58 = vadd.f32 %v366_v54, %v273_v37  ;;  %v368_v10 = vpop.f32.mrb[1].mxu0 }
 0x14b   :  { %v369_v1 = vadd.f32 %v368_v10, %v277_v24  ;;  %v64_v24 = vld [vmem:[%s63_s8] sm:$0x3f]  ;;  %s3275_s8 = smul.u32 6, %s4394_s7 }
 0x14d   :  { %v515_v31 = vcombine.low %v367_v58, %v369_v1  ;;  %v539_v1 = vrot.slane %v64_v24, 2  ;;  %s3276_s9 = scalar_lea.vmem [#allocation6], %s3275_s8 }
 0x14f   :  { %v522_v39 = vrot.slane %v515_v31, %v6543_v33  ;;  %v6553_v31 = vsub.s32 5, %v8006_v45  ;;  %v585_v45 = vrot.slane %v64_v24, 4 }
 0x151   :  { %v529_v37 = vrot.slane %v522_v39, %v6543_v33  ;;  %8010 = vst [vmem:[#allocation21_spill] sm:$0xff] %v6553_v31 }
 0x153   :  { %v531_v54 = vadd.f32 %v529_v37, %v64_v24  ;;  %v620_v24 = vld [vmem:[#allocation7 + $0x88] sm:$0xff] }
 0x154   :  { %v437_v18 = vpop.f32.mrb[0].mxu1 }
 0x155   :  { %v438_v41 = vadd.f32 %v437_v18, %v281_v61  ;;  %v439_v40 = vpop.f32.mrb[1].mxu1  ;;  %v4377_v10 = vmul.f32 -1.442695, %v531_v54 }
 0x156   :  { %v440_v43 = vadd.f32 %v439_v40, %v285_v5  ;;  %v289_v40 = vrot.slane %v257_v2, %v6550_v38 }
 0x157   :  { %5945 = vpow2.f32 %v4377_v10 }
 0x158   :  { %v543_v59 = vcombine.low %v438_v41, %v440_v43  ;;  %v293_v43 = vrot.slane %v257_v2, %v6553_v31 }
 0x15a   :  { %v550_v58 = vrot.slane %v543_v59, %v6543_v33 }
 0x15c   :  { %v557_v61 = vrot.slane %v550_v58, %v6543_v33 }
 0x15e   :  { %v559_v5 = vadd.f32 %v557_v61, %v539_v1 }
 0x160   :  { %v4378_v18 = vmul.f32 -1.442695, %v559_v5 }
 0x161   :  { %v5946_v30 = vpop.eup %5945 }
 0x162   :  { %5947 = vpow2.f32 %v4378_v18  ;;  %v535_v41 = vadd.f32 1.0, %v5946_v30 }
 0x164   :  { %5949 = vrcp.f32 %v535_v41 }
 0x16c   :  { %v5948_v9 = vpop.eup %5947 }
 0x16d   :  { %v563_v58 = vadd.f32 1.0, %v5948_v9  ;;  %v8012_v9 = vlaneseq }
 0x16e   :  { %v5950_v5 = vpop.eup %5949 }
 0x16f   :  { %5951 = vrcp.f32 %v563_v58  ;;  %vm6561_vm0 = vcmp.lt.s32.totalorder %v8012_v9, 256  ;;  %v643_v9 = vld [vmem:[#allocation7 + $0x140] sm:$0xff] }
 0x179   :  { %v5952_v38 = vpop.eup %5951 }
 0x17a   :  { %v589_v2 = vsub.f32 1.0, %v5952_v38 }
 0x189   :  { %v508_v59 = vpop.f32.mrb[2].mxu0 }
 0x18a   :  { %v509_v39 = vadd.f32 %v508_v59, %v289_v40  ;;  %v510_v37 = vpop.f32.mrb[3].mxu0  ;;  %v591_v40 = vmul.f32 %v5952_v38, %v8011_v55  ;;  %v607_v59 = vld [vmem:[#allocation7 + $0x20] sm:$0xff] }
 0x18b   :  { %v511_v54 = vadd.f32 %v510_v37, %v293_v43  ;;  %v613_v43 = vld [vmem:[#allocation7 + $0x50] sm:$0xff]  ;;  %v619_v38 = vld [vmem:[#allocation7 + $0x80] sm:$0xff] }
 0x18d   :  { %v568_v10 = vcombine.low %v509_v39, %v511_v54  ;;  %v626_v54 = vld [vmem:[#allocation7 + $0xb8] sm:$0xff] }
 0x18e   :  { %v6576_v55 = vpack.c.bf16 %v626_v54, %v620_v24  ;;  %v649_v24 = vld [vmem:[#allocation7 + $0x170] sm:$0xff] }
 0x18f   :  { %v575_v1 = vrot.slane %v568_v10, %v6543_v33  ;;  %v6591_v54 = vpack.c.bf16 %v649_v24, %v643_v9  ;;  %v1175_v24 = vld [vmem:[#allocation7 + $0x128] sm:$0xff] }
 0x191   :  { %v582_v61 = vrot.slane %v575_v1, %v6543_v33  ;;  %v6571_v1 = vpack.c.bf16 %v613_v43, %v607_v59 }
 0x193   :  { %v584_v18 = vmul.f32 %v5950_v5, %v582_v61  ;;  %v625_v61 = vld [vmem:[#allocation7 + $0xb0] sm:$0xff] }
 0x194   :  { %v6579_v5 = vpack.c.bf16 %v625_v61, %v619_v38  ;;  %v1162_v61 = vld [vmem:[#allocation7 + $0xc0] sm:$0xff] }
 0x195   :  { %v587_v30 = vadd.f32 %v585_v45, %v584_v18  ;;  %v638_v45 = vld [vmem:[#allocation7 + $0x118] sm:$0xff] }
 0x197   :  { %5953 = vtanh.f32 %v587_v30  ;;  %v631_v30 = vld [vmem:[#allocation7 + $0xe0] sm:$0xff] }
 0x1a1   :  { %v5954_v41 = vpop.eup %5953 }
 0x1a2   :  { %v590_v31 = vmul.f32 %v5954_v41, %v589_v2  ;;  %v637_v2 = vld [vmem:[#allocation7 + $0x110] sm:$0xff]  ;;  %v644_v41 = vld [vmem:[#allocation7 + $0x148] sm:$0xff] }
 0x1a3   :  { %v6585_v59 = vpack.c.bf16 %v637_v2, %v631_v30  ;;  %v1171_v30 = vld [vmem:[#allocation7 + $0x108] sm:$0xff]  ;;  %v1164_v2 = vld [vmem:[#allocation7 + $0xd0] sm:$0xff] }
 0x1a4   :  { %v6565_v37 = vadd.f32 %v591_v40, %v590_v31  ;;  %v632_v31 = vld [vmem:[#allocation7 + $0xe8] sm:$0xff]  ;;  %v650_v40 = vld [vmem:[#allocation7 + $0x178] sm:$0xff] }
 0x1a5   :  { %v6582_v18 = vpack.c.bf16 %v638_v45, %v632_v31  ;;  %v6588_v43 = vpack.c.bf16 %v650_v40, %v644_v41  ;;  %v1168_v31 = vld [vmem:[#allocation7 + $0xf0] sm:$0xff]  ;;  %v1165_v45 = vld [vmem:[#allocation7 + $0xd8] sm:$0xff]  ;;  %v1170_v41 = vld [vmem:[#allocation7 + $0x100] sm:$0xff] }
 0x1a6   :  { %v804_v58 = vrot.slane %v6565_v37, %v8005_v60  ;;  %v800_v10 = vrot.slane %v6565_v37, %v8004_v34  ;;  %597 = vst.msk [vmem:[#allocation9] ss:$8 sm:$0x3] %vm6561_vm0, %v6565_v37  ;;  %v6644_v40 = vpack.c.bf16 %v1168_v31, %v1162_v61  ;;  %v6646_v9 = vpack.c.bf16 %v1171_v30, %v1165_v45  ;;  %v1192_v61 = vld [vmem:[#allocation7 + $0x1b0] sm:$0xff]  ;;  %v1194_v30 = vld [vmem:[#allocation7 + $0x1c0] sm:$0xff] }
 0x1a7   :  { %v1188_v31 = vld [vmem:[#allocation7 + $0x190] sm:$0xff] }
 0x1a8   :  { %902 = vmatprep.mubr.f32.mxu1 %v804_v58  ;;  %973 = vmatprep.mubr.f32.mxu0 %v804_v58  ;;  %8016 = vst [vmem:[#allocation18_spill] sm:$0xff] %v6646_v9 }
 0x1a9   :  { %903 = vmatmul.mubr.f32.vlgmr.msra.gmra.mrb[2].mxu1 %v800_v10  ;;  %974 = vmatmul.mubr.f32.vlgmr.msra.gmra.mrb[4].mxu0 %v800_v10 }
 0x1aa   :  { %4723 = vmatpush1.bf16.msra.mxu1 %v6571_v1  ;;  %1044 = vmatprep.mubr.f32.mxu1 %v804_v58  ;;  %v1169_v58 = vld [vmem:[#allocation7 + $0xf8] sm:$0xff] }
 0x1ab   :  { %4725 = vmatprep.subr.bf16.mxu1 %v6576_v55 }
 0x1ae   :  { %4727 = vmatpush1.bf16.msra.mxu1 %v6579_v5 }
 0x1af   :  { %4729 = vmatprep.subr.bf16.mxu1 %v6582_v18 }
 0x1b2   :  { %4731 = vmatpush1.bf16.msra.mxu1 %v6585_v59 }
 0x1b3   :  { %4733 = vmatprep.subr.bf16.mxu1 %v6588_v43 }
 0x1b6   :  { %4735 = vmatpush1.bf16.msra.mxu1 %v6591_v54 }
 0x1b7   :  { %4737 = vmatprep.subr.bf16.mxu1 %v6355_v50  ;;  %v1139_v50 = vld [vmem:[#allocation7 + $0x8] sm:$0xff] }
 0x1ba   :  { %4739 = vmatpush1.bf16.msra.mxu1 %v6361_v62  ;;  %v1145_v62 = vld [vmem:[#allocation7 + $0x38] sm:$0xff] }
 0x1bb   :  { %4741 = vmatprep.subr.bf16.mxu1 %v6364_v12  ;;  %v1138_v12 = vld [vmem:[#allocation7] sm:$0xff] }
 0x1be   :  { %4743 = vmatpush1.bf16.msra.mxu1 %v6369_v44  ;;  %v6619_v44 = vpack.c.bf16 %v1145_v62, %v1139_v50  ;;  %v1181_v50 = vld [vmem:[#allocation7 + $0x158] sm:$0xff]  ;;  %v1174_v62 = vld [vmem:[#allocation7 + $0x120] sm:$0xff] }
 0x1bf   :  { %4745 = vmatprep.subr.bf16.mxu1 %v6373_v36  ;;  %v1144_v36 = vld [vmem:[#allocation7 + $0x30] sm:$0xff] }
 0x1c0   :  { %4785 = vmatprep.subr.bf16.mxu0 %v6619_v44 }
 0x1c2   :  { %4747 = vmatpush1.bf16.msra.mxu1 %v6378_v3  ;;  %v1141_v3 = vld [vmem:[#allocation7 + $0x18] sm:$0xff] }
 0x1c3   :  { %4749 = vmatprep.subr.bf16.mxu1 %v6381_v53  ;;  %v1147_v53 = vld [vmem:[#allocation7 + $0x48] sm:$0xff] }
 0x1c6   :  { %4751 = vmatpush1.bf16.msra.mxu1 %v6386_v7  ;;  %v6621_v7 = vpack.c.bf16 %v1144_v36, %v1138_v12  ;;  %v6650_v12 = vpack.c.bf16 %v1170_v41, %v1164_v2  ;;  %v6652_v36 = vpack.c.bf16 %v1181_v50, %v1175_v24  ;;  %v1199_v2 = vld [vmem:[#allocation7 + $0x1e8] sm:$0xff]  ;;  %v1205_v41 = vld [vmem:[#allocation7 + $0x218] sm:$0xff] }
 0x1c7   :  { %4753 = vmatprep.subr.bf16.mxu1 %v6389_v8  ;;  %v6623_v8 = vpack.c.bf16 %v1147_v53, %v1141_v3  ;;  %v1180_v3 = vld [vmem:[#allocation7 + $0x150] sm:$0xff]  ;;  %v1177_v53 = vld [vmem:[#allocation7 + $0x138] sm:$0xff]  ;;  %v1207_v50 = vld [vmem:[#allocation7 + $0x228] sm:$0xff] }
 0x1c8   :  { %4787 = vmatpush1.bf16.msra.mxu0 %v6621_v7  ;;  %8017 = vst [vmem:[#allocation15_spill] sm:$0xff] %v6650_v12  ;;  %v1201_v24 = vld [vmem:[#allocation7 + $0x1f8] sm:$0xff] }
 0x1ca   :  { %4755 = vmatpush1.bf16.msra.mxu1 %v6394_v13  ;;  %v1140_v13 = vld [vmem:[#allocation7 + $0x10] sm:$0xff] }
 0x1cb   :  { %4757 = vmatprep.subr.bf16.mxu1 %v6397_v14  ;;  %v1146_v14 = vld [vmem:[#allocation7 + $0x40] sm:$0xff] }
 0x1ce   :  { %4759 = vmatpush1.bf16.msra.mxu1 %v6402_v19  ;;  %v1151_v19 = vld [vmem:[#allocation7 + $0x68] sm:$0xff] }
 0x1cf   :  { %4761 = vmatprep.subr.bf16.mxu1 %v6405_v20  ;;  %v6626_v20 = vpack.c.bf16 %v1146_v14, %v1140_v13  ;;  %v1183_v13 = vld [vmem:[#allocation7 + $0x168] sm:$0xff] }
 0x1d0   :  { %v6655_v14 = vpack.c.bf16 %v1183_v13, %v1177_v53  ;;  %v6676_v53 = vpack.c.bf16 %v1205_v41, %v1199_v2  ;;  %v1198_v13 = vld [vmem:[#allocation7 + $0x1e0] sm:$0xff]  ;;  %v1216_v41 = vld [vmem:[#allocation7 + $0x270] sm:$0xff] }
 0x1d1   :  { %v1210_v2 = vld [vmem:[#allocation7 + $0x240] sm:$0xff] }
 0x1d2   :  { %4763 = vmatpush1.bf16.msra.mxu1 %v6410_v25  ;;  %v1157_v25 = vld [vmem:[#allocation7 + $0x98] sm:$0xff]  ;;  %8018 = vst [vmem:[#allocation14_spill] sm:$0xff] %v6655_v14 }
 0x1d3   :  { %4765 = vmatprep.subr.bf16.mxu1 %v6413_v26  ;;  %v1150_v26 = vld [vmem:[#allocation7 + $0x60] sm:$0xff] }
 0x1d6   :  { %4767 = vmatpush1.bf16.msra.mxu1 %v6418_v32  ;;  %v1156_v32 = vld [vmem:[#allocation7 + $0x90] sm:$0xff] }
 0x1d7   :  { %4769 = vmatprep.subr.bf16.mxu1 %v6421_v35  ;;  %v6630_v35 = vpack.c.bf16 %v1157_v25, %v1151_v19  ;;  %v1176_v19 = vld [vmem:[#allocation7 + $0x130] sm:$0xff]  ;;  %v1182_v25 = vld [vmem:[#allocation7 + $0x160] sm:$0xff] }
 0x1d9   :  { %4789 = vmatprep.subr.bf16.mxu0 %v6630_v35 }
 0x1da   :  { %4771 = vmatpush1.bf16.msra.mxu1 %v6426_v47  ;;  %v6632_v47 = vpack.c.bf16 %v1156_v32, %v1150_v26  ;;  %v1187_v26 = vld [vmem:[#allocation7 + $0x188] sm:$0xff]  ;;  %v1193_v32 = vld [vmem:[#allocation7 + $0x1b8] sm:$0xff] }
 0x1db   :  { %4773 = vmatprep.subr.bf16.mxu1 %v6429_v51  ;;  %v1153_v51 = vld [vmem:[#allocation7 + $0x78] sm:$0xff] }
 0x1dc   :  { %4791 = vmatpush1.bf16.msra.mxu0 %v6632_v47 }
 0x1de   :  { %4775 = vmatpush1.bf16.msra.mxu1 %v6434_v63  ;;  %v1159_v63 = vld [vmem:[#allocation7 + $0xa8] sm:$0xff] }
 0x1df   :  { %4777 = vmatprep.subr.bf16.mxu1 %v6437_v4  ;;  %v1152_v4 = vld [vmem:[#allocation7 + $0x70] sm:$0xff] }
 0x1e2   :  { %4779 = vmatpush1.bf16.msra.mxu1 %v6441_v22  ;;  %v6635_v22 = vpack.c.bf16 %v1159_v63, %v1153_v51  ;;  %v6658_v51 = vpack.c.bf16 %v1180_v3, %v1174_v62  ;;  %v1189_v63 = vld [vmem:[#allocation7 + $0x198] sm:$0xff]  ;;  %v6674_v3 = vpack.c.bf16 %v1194_v30, %v1188_v31 }
 0x1e3   :  { %4781 = vmatprep.subr.bf16.mxu1 %v6444_v23  ;;  %v1158_v23 = vld [vmem:[#allocation7 + $0xa0] sm:$0xff] }
 0x1e4   :  { %8021 = vst [vmem:[#allocation24_spill] sm:$0xff] %v6674_v3 }
 0x1e6   :  { %4783 = vmatpush1.bf16.msra.mxu1 %v6447_v42  ;;  %v1163_v42 = vld [vmem:[#allocation7 + $0xc8] sm:$0xff] }
 0x1e7   :  { %4849 = vmatprep.subr.bf16.mxu1 %v6623_v8  ;;  %v6640_v38 = vpack.c.bf16 %v1169_v58, %v1163_v42  ;;  %v6664_v42 = vpack.c.bf16 %v1193_v32, %v1187_v26  ;;  %v1186_v58 = vld [vmem:[#allocation7 + $0x180] sm:$0xff]  ;;  %v6679_v26 = vpack.c.bf16 %v1207_v50, %v1201_v24  ;;  %v1212_v24 = vld [vmem:[#allocation7 + $0x250] sm:$0xff] }
 0x1e8   :  { %v6670_v62 = vpack.c.bf16 %v1192_v61, %v1186_v58  ;;  %v1206_v32 = vld [vmem:[#allocation7 + $0x220] sm:$0xff]  ;;  %v1213_v58 = vld [vmem:[#allocation7 + $0x258] sm:$0xff]  ;;  %v1219_v61 = vld [vmem:[#allocation7 + $0x288] sm:$0xff] }
 0x1e9   :  { %1045 = vmatmul.mubr.f32.vlgmr.msra.gmra.mrb[4].mxu1 %v800_v10  ;;  %v6638_v10 = vpack.c.bf16 %v1158_v23, %v1152_v4  ;;  %4793 = vmatprep.subr.bf16.mxu0 %v6640_v38  ;;  %v1195_v4 = vld [vmem:[#allocation7 + $0x1c8] sm:$0xff]  ;;  %v6662_v23 = vpack.c.bf16 %v1182_v25, %v1176_v19  ;;  %v1204_v19 = vld [vmem:[#allocation7 + $0x210] sm:$0xff]  ;;  %8022 = vst [vmem:[#allocation25_spill] sm:$0xff] %v6679_v26 }
 0x1ea   :  { %4851 = vmatpush1.bf16.msra.mxu1 %v6626_v20  ;;  %4795 = vmatpush1.bf16.msra.mxu0 %v6644_v40  ;;  %v6667_v45 = vpack.c.bf16 %v1195_v4, %v1189_v63  ;;  %v1200_v25 = vld [vmem:[#allocation7 + $0x1f0] sm:$0xff]  ;;  %v1211_v63 = vld [vmem:[#allocation7 + $0x248] sm:$0xff]  ;;  %v1217_v4 = vld [vmem:[#allocation7 + $0x278] sm:$0xff]  ;;  %v6691_v50 = vpack.c.bf16 %v1219_v61, %v1213_v58 }
 0x1eb   :  { %8015 = vst [vmem:[#allocation22_spill] sm:$0xff] %v6638_v10  ;;  %4853 = vmatprep.subr.bf16.mxu1 %v6635_v22  ;;  %4797 = vmatprep.subr.bf16.mxu0 %v6652_v36  ;;  %8019 = vst [vmem:[#allocation16_spill] sm:$0xff] %v6662_v23  ;;  %v6686_v31 = vpack.c.bf16 %v1206_v32, %v1200_v25  ;;  %v6688_v30 = vpack.c.bf16 %v1217_v4, %v1211_v63  ;;  %v1222_v63 = vld [vmem:[#allocation7 + $0x2a0] sm:$0xff]  ;;  %v1228_v4 = vld [vmem:[#allocation7 + $0x2d0] sm:$0xff] }
 0x1ec   :  { %8020 = vst [vmem:[#allocation23_spill] sm:$0xff] %v6667_v45  ;;  %v1224_v58 = vld [vmem:[#allocation7 + $0x2b0] sm:$0xff] }
 0x1ee   :  { %4855 = vmatpush1.bf16.msra.mxu1 %v6638_v10  ;;  %4799 = vmatpush1.bf16.msra.mxu0 %v6658_v51  ;;  %v1241_v10 = vld [vmem:[#allocation7 + $0x338] sm:$0xff] }
 0x1ef   :  { %4857 = vmatprep.subr.bf16.mxu1 %v6646_v9  ;;  %4801 = vmatprep.subr.bf16.mxu0 %v6664_v42  ;;  %v1235_v9 = vld [vmem:[#allocation7 + $0x308] sm:$0xff] }
 0x1f2   :  { %4859 = vmatpush1.bf16.msra.mxu1 %v6650_v12  ;;  %4803 = vmatpush1.bf16.msra.mxu0 %v6670_v62  ;;  %v1229_v12 = vld [vmem:[#allocation7 + $0x2d8] sm:$0xff] }
 0x1f3   :  { %4861 = vmatprep.subr.bf16.mxu1 %v6655_v14  ;;  %4805 = vmatprep.subr.bf16.mxu0 %v6676_v53  ;;  %v1223_v14 = vld [vmem:[#allocation7 + $0x2a8] sm:$0xff] }
 0x1f4   :  { %v6700_v32 = vpack.c.bf16 %v1229_v12, %v1223_v14  ;;  %v6712_v14 = vpack.c.bf16 %v1241_v10, %v1235_v9  ;;  %v1249_v9 = vld [vmem:[#allocation7 + $0x378] sm:$0xff] }
 0x1f6   :  { %4863 = vmatpush1.bf16.msra.mxu1 %v6662_v23  ;;  %v6682_v23 = vpack.c.bf16 %v1204_v19, %v1198_v13  ;;  %v1225_v13 = vld [vmem:[#allocation7 + $0x2b8] sm:$0xff]  ;;  %v1231_v19 = vld [vmem:[#allocation7 + $0x2e8] sm:$0xff] }
 0x1f7   :  { %4865 = vmatprep.subr.bf16.mxu1 %v6667_v45  ;;  %v1218_v45 = vld [vmem:[#allocation7 + $0x280] sm:$0xff]  ;;  %v6703_v61 = vpack.c.bf16 %v1231_v19, %v1225_v13  ;;  %v1243_v19 = vld [vmem:[#allocation7 + $0x348] sm:$0xff] }
 0x1f8   :  { %4807 = vmatpush1.bf16.msra.mxu0 %v6682_v23  ;;  %v6698_v25 = vpack.c.bf16 %v1218_v45, %v1212_v24  ;;  %v1234_v45 = vld [vmem:[#allocation7 + $0x300] sm:$0xff]  ;;  %v1237_v24 = vld [vmem:[#allocation7 + $0x318] sm:$0xff] }
 0x1f9   :  { %4809 = vmatprep.subr.bf16.mxu0 %v6688_v30  ;;  %8023 = vst [vmem:[#allocation26_spill] sm:$0xff] %v6703_v61 }
 0x1fa   :  { %4867 = vmatpush1.bf16.msra.mxu1 %v6674_v3  ;;  %v6694_v3 = vpack.c.bf16 %v1216_v41, %v1210_v2  ;;  %v6706_v2 = vpack.c.bf16 %v1228_v4, %v1222_v63  ;;  %v1240_v41 = vld [vmem:[#allocation7 + $0x330] sm:$0xff]  ;;  %v1242_v4 = vld [vmem:[#allocation7 + $0x340] sm:$0xff] }
 0x1fb   :  { %4869 = vmatprep.subr.bf16.mxu1 %v6679_v26  ;;  %v1230_v26 = vld [vmem:[#allocation7 + $0x2e0] sm:$0xff]  ;;  %v6718_v13 = vpack.c.bf16 %v1240_v41, %v1234_v45  ;;  %v1236_v63 = vld [vmem:[#allocation7 + $0x310] sm:$0xff] }
 0x1fc   :  { %4811 = vmatpush1.bf16.msra.mxu0 %v6694_v3  ;;  %v6710_v12 = vpack.c.bf16 %v1230_v26, %v1224_v58  ;;  %v6720_v26 = vpack.c.bf16 %v1243_v19, %v1237_v24  ;;  %v6722_v10 = vpack.c.bf16 %v1242_v4, %v1236_v63  ;;  %v1255_v58 = vld [vmem:[#allocation7 + $0x3a8] sm:$0xff]  ;;  %v1248_v45 = vld [vmem:[#allocation7 + $0x370] sm:$0xff]  ;;  %v1254_v41 = vld [vmem:[#allocation7 + $0x3a0] sm:$0xff] }
 0x1fd   :  { %4813 = vmatprep.subr.bf16.mxu0 %v6700_v32  ;;  %v1261_v24 = vld [vmem:[#allocation7 + $0x3d8] sm:$0xff]  ;;  %v1267_v19 = vld [vmem:[#allocation7 + $0x408] sm:$0xff]  ;;  %v1260_v63 = vld [vmem:[#allocation7 + $0x3d0] sm:$0xff] }
 0x1fe   :  { %4871 = vmatpush1.bf16.msra.mxu1 %v6686_v31  ;;  %8024 = vst [vmem:[#allocation27_spill] sm:$0xff] %v6710_v12  ;;  %v1266_v4 = vld [vmem:[#allocation7 + $0x400] sm:$0xff] }
 0x1ff   :  { %4873 = vmatprep.subr.bf16.mxu1 %v6691_v50 }
 0x200   :  { %4815 = vmatpush1.bf16.msra.mxu0 %v6706_v2 }
 0x201   :  { %4817 = vmatprep.subr.bf16.mxu0 %v6712_v14 }
 0x202   :  { %4875 = vmatpush1.bf16.msra.mxu1 %v6698_v25 }
 0x203   :  { %4877 = vmatprep.subr.bf16.mxu1 %v6703_v61  ;;  %v6730_v61 = vpack.c.bf16 %v1254_v41, %v1248_v45  ;;  %v1272_v45 = vld [vmem:[#allocation7 + $0x430] sm:$0xff]  ;;  %v1278_v41 = vld [vmem:[#allocation7 + $0x460] sm:$0xff] }
 0x204   :  { %4819 = vmatpush1.bf16.msra.mxu0 %v6718_v13 }
 0x205   :  { %4821 = vmatprep.subr.bf16.mxu0 %v6484_v29  ;;  %v6736_v29 = vpack.c.bf16 %v1267_v19, %v1261_v24  ;;  %v6746_v24 = vpack.c.bf16 %v1278_v41, %v1272_v45  ;;  %v1291_v19 = vld [vmem:[#allocation7 + $0x4c8] sm:$0xff]  ;;  %v1296_v45 = vld [vmem:[#allocation7 + $0x4f0] sm:$0xff]  ;;  %v1302_v41 = vld [vmem:[#allocation7 + $0x520] sm:$0xff] }
 0x206   :  { %4879 = vmatpush1.bf16.msra.mxu1 %v6710_v12  ;;  %v6728_v12 = vpack.c.bf16 %v1255_v58, %v1249_v9  ;;  %v6738_v9 = vpack.c.bf16 %v1266_v4, %v1260_v63  ;;  %v1279_v58 = vld [vmem:[#allocation7 + $0x468] sm:$0xff]  ;;  %v1284_v63 = vld [vmem:[#allocation7 + $0x490] sm:$0xff]  ;;  %v1290_v4 = vld [vmem:[#allocation7 + $0x4c0] sm:$0xff] }
 0x207   :  { %4881 = vmatprep.subr.bf16.mxu1 %v6720_v26 }
 0x208   :  { %4823 = vmatpush1.bf16.msra.mxu0 %v6486_v48  ;;  %8025 = vst [vmem:[#allocation28_spill] sm:$0xff] %v6738_v9  ;;  %v1273_v48 = vld [vmem:[#allocation7 + $0x438] sm:$0xff] }
 0x209   :  { %4825 = vmatprep.subr.bf16.mxu0 %v6490_v6  ;;  %v6744_v6 = vpack.c.bf16 %v1279_v58, %v1273_v48  ;;  %v1297_v48 = vld [vmem:[#allocation7 + $0x4f8] sm:$0xff]  ;;  %v6754_v58 = vpack.c.bf16 %v1290_v4, %v1284_v63  ;;  %v1308_v63 = vld [vmem:[#allocation7 + $0x550] sm:$0xff]  ;;  %v1314_v4 = vld [vmem:[#allocation7 + $0x580] sm:$0xff] }
 0x20a   :  { %4883 = vmatpush1.bf16.msra.mxu1 %v6722_v10 }
 0x20b   :  { %4885 = vmatprep.subr.bf16.mxu1 %v6728_v12  ;;  %8026 = vst [vmem:[#allocation29_spill] sm:$0xff] %v6744_v6 }
 0x20c   :  { %4827 = vmatpush1.bf16.msra.mxu0 %v6492_v57  ;;  %v1285_v57 = vld [vmem:[#allocation7 + $0x498] sm:$0xff] }
 0x20d   :  { %4829 = vmatprep.subr.bf16.mxu0 %v6496_v28  ;;  %v6752_v28 = vpack.c.bf16 %v1291_v19, %v1285_v57  ;;  %v6762_v57 = vpack.c.bf16 %v1302_v41, %v1296_v45  ;;  %v1326_v45 = vld [vmem:[#allocation7 + $0x5e0] sm:$0xff] }
 0x20e   :  { %4887 = vmatpush1.bf16.msra.mxu1 %v6730_v61 }
 0x20f   :  { %4889 = vmatprep.subr.bf16.mxu1 %v6736_v29  ;;  %8027 = vst [vmem:[#allocation30_spill] sm:$0xff] %v6752_v28  ;;  %8028 = vst [vmem:[#allocation31_spill] sm:$0xff] %v6762_v57 }
 0x210   :  { %4831 = vmatpush1.bf16.msra.mxu0 %v6498_v27 }
 0x211   :  { %4833 = vmatprep.subr.bf16.mxu0 %v6502_v15  ;;  %v1309_v15 = vld [vmem:[#allocation7 + $0x558] sm:$0xff] }
 0x212   :  { %4891 = vmatpush1.bf16.msra.mxu1 %v6738_v9  ;;  %v1303_v9 = vld [vmem:[#allocation7 + $0x528] sm:$0xff] }
 0x213   :  { %4893 = vmatprep.subr.bf16.mxu1 %v6744_v6  ;;  %v6758_v27 = vpack.c.bf16 %v1303_v9, %v1297_v48  ;;  %v1315_v6 = vld [vmem:[#allocation7 + $0x588] sm:$0xff]  ;;  %v6770_v9 = vpack.c.bf16 %v1314_v4, %v1308_v63  ;;  %v1320_v48 = vld [vmem:[#allocation7 + $0x5b0] sm:$0xff] }
 0x214   :  { %4835 = vmatpush1.bf16.msra.mxu0 %v6504_v46  ;;  %v6765_v19 = vpack.c.bf16 %v1315_v6, %v1309_v15  ;;  %v1321_v46 = vld [vmem:[#allocation7 + $0x5b8] sm:$0xff] }
 0x215   :  { %4837 = vmatprep.subr.bf16.mxu0 %v6507_v0  ;;  %8030 = vst [vmem:[#allocation33_spill] sm:$0xff] %v6770_v9 }
 0x216   :  { %4895 = vmatpush1.bf16.msra.mxu1 %v6746_v24  ;;  %8029 = vst [vmem:[#allocation32_spill] sm:$0xff] %v6765_v19 }
 0x217   :  { %4897 = vmatprep.subr.bf16.mxu1 %v6752_v28  ;;  %v1327_v28 = vld [vmem:[#allocation7 + $0x5e8] sm:$0xff] }
 0x218   :  { %4839 = vmatpush1.bf16.msra.mxu0 %v6510_v17  ;;  %v6773_v0 = vpack.c.bf16 %v1327_v28, %v1321_v46  ;;  %v6778_v17 = vpack.c.bf16 %v1326_v45, %v1320_v48  ;;  %v8033_v28 = vld [vmem:[#allocation19_spill] sm:$0xff] }
 0x219   :  { %4841 = vmatprep.subr.bf16.mxu0 %v6513_v21  ;;  %v795_v21 = vld [vmem:[%s7904_s4] sm:$0x3f] }
 0x21a   :  { %4899 = vmatpush1.bf16.msra.mxu1 %v6754_v58  ;;  %8031 = vst [vmem:[#allocation34_spill] sm:$0xff] %v6773_v0  ;;  %8032 = vst [vmem:[#allocation35_spill] sm:$0xff] %v6778_v17  ;;  %v815_v6 = vrot.slane %v795_v21, %v8005_v60  ;;  %v823_v41 = vrot.slane %v795_v21, %v8033_v28 }
 0x21b   :  { %4901 = vmatprep.subr.bf16.mxu1 %v6758_v27 }
 0x21c   :  { %4843 = vmatpush1.bf16.msra.mxu0 %v6516_v49  ;;  %v811_v49 = vrot.slane %v795_v21, %v8004_v34 }
 0x21d   :  { %4845 = vmatprep.subr.bf16.mxu0 %v6519_v56  ;;  %v819_v56 = vrot.slane %v795_v21, %v6535_v16 }
 0x21e   :  { %4903 = vmatpush1.bf16.msra.mxu1 %v6762_v57 }
 0x21f   :  { %4905 = vmatprep.subr.bf16.mxu1 %v6765_v19 }
 0x220   :  { %4847 = vmatpush1.bf16.msra.mxu0 %v6522_v11 }
 0x221   :  { %4913 = vmatprep.subr.bf16.mxu0 %v6526_v52 }
 0x222   :  { %4907 = vmatpush1.bf16.msra.mxu1 %v6770_v9  ;;  %v602_v9 = vld [vmem:[%s601_s0] sm:$0x3f] }
 0x223   :  { %4909 = vmatprep.subr.bf16.mxu1 %v6773_v0 }
 0x226   :  { %4911 = vmatpush1.bf16.msra.mxu1 %v6778_v17 }
 0x227   :  { %4977 = vmatprep.subr.bf16.mxu1 %v6619_v44 }
 0x27c   :  { %v904_v15 = vpop.f32.mrb[2].mxu1  ;;  %v975_v11 = vpop.f32.mrb[4].mxu0 }
 0x27d   :  { %v905_v63 = vadd.f32 %v904_v15, %v811_v49  ;;  %v976_v52 = vadd.f32 %v975_v11, %v819_v56  ;;  %v906_v4 = vpop.f32.mrb[3].mxu1  ;;  %v977_v46 = vpop.f32.mrb[5].mxu0  ;;  %v1077_v49 = vrot.slane %v602_v9, 2 }
 0x27e   :  { %v907_v48 = vadd.f32 %v906_v4, %v815_v6  ;;  %v978_v44 = vadd.f32 %v977_v46, %v823_v41  ;;  %v8035_v4 = vld [vmem:[#allocation21_spill] sm:$0xff] }
 0x27f   :  { %v831_v46 = vrot.slane %v795_v21, %v8035_v4 }
 0x280   :  { %v1053_v45 = vcombine.low %v905_v63, %v907_v48  ;;  %v1081_v17 = vcombine.low %v976_v52, %v978_v44  ;;  %v8034_v63 = vld [vmem:[#allocation20_spill] sm:$0xff] }
 0x281   :  { %v827_v52 = vrot.slane %v795_v21, %v8034_v63 }
 0x282   :  { %v1060_v0 = vrot.slane %v1053_v45, %v6543_v33  ;;  %v1088_v28 = vrot.slane %v1081_v17, %v6543_v33 }
 0x284   :  { %v1067_v16 = vrot.slane %v1060_v0, %v6543_v33  ;;  %v1095_v56 = vrot.slane %v1088_v28, %v6543_v33 }
 0x286   :  { %v1069_v19 = vadd.f32 %v1067_v16, %v602_v9  ;;  %v1097_v6 = vadd.f32 %v1095_v56, %v1077_v49  ;;  %v1123_v49 = vrot.slane %v602_v9, 4  ;;  %v1197_v9 = vld [vmem:[#allocation7 + $0x1d8] sm:$0xff] }
 0x288   :  { %v4380_v57 = vmul.f32 -1.442695, %v1069_v19  ;;  %v4381_v41 = vmul.f32 -1.442695, %v1097_v6 }
 0x28a   :  { %5955 = vpow2.f32 %v4380_v57 }
 0x28b   :  { %5957 = vpow2.f32 %v4381_v41 }
 0x294   :  { %v5956_v15 = vpop.eup %5955 }
 0x295   :  { %v1073_v11 = vadd.f32 1.0, %v5956_v15  ;;  %v5958_v17 = vpop.eup %5957 }
 0x296   :  { %v1101_v45 = vadd.f32 1.0, %v5958_v17  ;;  %v1233_v17 = vld [vmem:[#allocation7 + $0x2f8] sm:$0xff] }
 0x297   :  { %5959 = vrcp.f32 %v1073_v11 }
 0x298   :  { %5961 = vrcp.f32 %v1101_v45  ;;  %v1232_v45 = vld [vmem:[#allocation7 + $0x2f0] sm:$0xff] }
 0x2a1   :  { %v5960_v56 = vpop.eup %5959 }
 0x2a2   :  { %v5962_v15 = vpop.eup %5961 }
 0x2a3   :  { %v1127_v21 = vsub.f32 1.0, %v5962_v15 }
 0x2bc   :  { %v1046_v0 = vpop.f32.mrb[4].mxu1 }
 0x2bd   :  { %v1047_v48 = vadd.f32 %v1046_v0, %v827_v52  ;;  %v1048_v16 = vpop.f32.mrb[5].mxu1  ;;  %v1129_v52 = vmul.f32 %v5962_v15, %v6565_v37  ;;  %v1191_v37 = vld [vmem:[#allocation7 + $0x1a8] sm:$0xff]  ;;  %v1250_v15 = vld [vmem:[#allocation7 + $0x380] sm:$0xff] }
 0x2be   :  { %v1049_v44 = vadd.f32 %v1048_v16, %v831_v46  ;;  %v1220_v16 = vld [vmem:[#allocation7 + $0x290] sm:$0xff] }
 0x2c0   :  { %v1106_v19 = vcombine.low %v1047_v48, %v1049_v44  ;;  %v1227_v44 = vld [vmem:[#allocation7 + $0x2c8] sm:$0xff] }
 0x2c2   :  { %v1113_v28 = vrot.slane %v1106_v19, %v6543_v33  ;;  %v1226_v19 = vld [vmem:[#allocation7 + $0x2c0] sm:$0xff] }
 0x2c4   :  { %v1120_v57 = vrot.slane %v1113_v28, %v6543_v33  ;;  %v1239_v28 = vld [vmem:[#allocation7 + $0x328] sm:$0xff] }
 0x2c6   :  { %v1122_v6 = vmul.f32 %v5960_v56, %v1120_v57  ;;  %v1245_v57 = vld [vmem:[#allocation7 + $0x358] sm:$0xff]  ;;  %v1244_v56 = vld [vmem:[#allocation7 + $0x350] sm:$0xff] }
 0x2c8   :  { %v1125_v41 = vadd.f32 %v1123_v49, %v1122_v6  ;;  %v1238_v49 = vld [vmem:[#allocation7 + $0x320] sm:$0xff]  ;;  %v1251_v6 = vld [vmem:[#allocation7 + $0x388] sm:$0xff] }
 0x2ca   :  { %5963 = vtanh.f32 %v1125_v41  ;;  %v1257_v41 = vld [vmem:[#allocation7 + $0x3b8] sm:$0xff] }
 0x2d4   :  { %v5964_v11 = vpop.eup %5963 }
 0x2d5   :  { %v1128_v4 = vmul.f32 %v5964_v11, %v1127_v21  ;;  %v1256_v21 = vld [vmem:[#allocation7 + $0x3b0] sm:$0xff]  ;;  %v1263_v11 = vld [vmem:[#allocation7 + $0x3e8] sm:$0xff] }
 0x2d7   :  { %v6801_v46 = vadd.f32 %v1129_v52, %v1128_v4  ;;  %v1221_v4 = vld [vmem:[#allocation7 + $0x298] sm:$0xff] }
 0x2d8   :  { %v1269_v52 = vld [vmem:[#allocation7 + $0x418] sm:$0xff] }
 0x2d9   :  { %v1339_v0 = vrot.slane %v6801_v46, %v8005_v60  ;;  %v6807_v48 = vrot.slane %v6801_v46, %v8004_v34  ;;  %1132 = vst.msk [vmem:[#allocation9 + $0x1] ss:$8 sm:$0x3] %vm6561_vm0, %v6801_v46 }
 0x2db   :  { %1437 = vmatprep.mubr.f32.mxu0 %v1339_v0  ;;  %1508 = vmatprep.mubr.f32.mxu1 %v1339_v0 }
 0x2dc   :  { %1438 = vmatmul.mubr.f32.vlgmr.msra.gmra.mrb[6].mxu0 %v6807_v48  ;;  %1509 = vmatmul.mubr.f32.vlgmr.msra.gmra.mrb[6].mxu1 %v6807_v48 }
 0x2dd   :  { %4915 = vmatpush1.bf16.msra.mxu0 %v6571_v1  ;;  %1579 = vmatprep.mubr.f32.mxu0 %v1339_v0  ;;  %v6824_v1 = vpack.c.bf16 %v1197_v9, %v1191_v37  ;;  %v1262_v0 = vld [vmem:[#allocation7 + $0x3e0] sm:$0xff]  ;;  %v1268_v37 = vld [vmem:[#allocation7 + $0x410] sm:$0xff]  ;;  %v1275_v9 = vld [vmem:[#allocation7 + $0x448] sm:$0xff] }
 0x2de   :  { %4917 = vmatprep.subr.bf16.mxu0 %v6576_v55  ;;  %4979 = vmatpush1.bf16.msra.mxu1 %v6621_v7  ;;  %v1190_v55 = vld [vmem:[#allocation7 + $0x1a0] sm:$0xff]  ;;  %v1196_v7 = vld [vmem:[#allocation7 + $0x1d0] sm:$0xff] }
 0x2df   :  { %4981 = vmatprep.subr.bf16.mxu1 %v6630_v35  ;;  %v1203_v35 = vld [vmem:[#allocation7 + $0x208] sm:$0xff] }
 0x2e1   :  { %4919 = vmatpush1.bf16.msra.mxu0 %v6579_v5  ;;  %v1209_v5 = vld [vmem:[#allocation7 + $0x238] sm:$0xff] }
 0x2e2   :  { %4921 = vmatprep.subr.bf16.mxu0 %v6582_v18  ;;  %4983 = vmatpush1.bf16.msra.mxu1 %v6632_v47  ;;  %v6829_v18 = vpack.c.bf16 %v1196_v7, %v1190_v55  ;;  %v6832_v47 = vpack.c.bf16 %v1209_v5, %v1203_v35  ;;  %v1281_v55 = vld [vmem:[#allocation7 + $0x478] sm:$0xff]  ;;  %v1274_v7 = vld [vmem:[#allocation7 + $0x440] sm:$0xff]  ;;  %v1280_v35 = vld [vmem:[#allocation7 + $0x470] sm:$0xff] }
 0x2e3   :  { %4985 = vmatprep.subr.bf16.mxu1 %v6640_v38  ;;  %v1215_v38 = vld [vmem:[#allocation7 + $0x268] sm:$0xff] }
 0x2e4   :  { %v1287_v5 = vld [vmem:[#allocation7 + $0x4a8] sm:$0xff] }
 0x2e5   :  { %4923 = vmatpush1.bf16.msra.mxu0 %v6585_v59  ;;  %v1202_v59 = vld [vmem:[#allocation7 + $0x200] sm:$0xff] }
 0x2e6   :  { %4925 = vmatprep.subr.bf16.mxu0 %v6588_v43  ;;  %4987 = vmatpush1.bf16.msra.mxu1 %v6644_v40  ;;  %v1208_v43 = vld [vmem:[#allocation7 + $0x230] sm:$0xff] }
 0x2e7   :  { %4989 = vmatprep.subr.bf16.mxu1 %v6652_v36  ;;  %v6837_v40 = vpack.c.bf16 %v1208_v43, %v1202_v59  ;;  %v1214_v36 = vld [vmem:[#allocation7 + $0x260] sm:$0xff]  ;;  %v1293_v59 = vld [vmem:[#allocation7 + $0x4d8] sm:$0xff]  ;;  %v6882_v43 = vpack.c.bf16 %v1280_v35, %v1274_v7  ;;  %v8037_v7 = vld [vmem:[#allocation18_spill] sm:$0xff] }
 0x2e8   :  { %v8038_v35 = vld [vmem:[#allocation15_spill] sm:$0xff] }
 0x2e9   :  { %4927 = vmatpush1.bf16.msra.mxu0 %v6591_v54  ;;  %v6840_v54 = vpack.c.bf16 %v1221_v4, %v1215_v38  ;;  %v1286_v38 = vld [vmem:[#allocation7 + $0x4a0] sm:$0xff]  ;;  %v1292_v4 = vld [vmem:[#allocation7 + $0x4d0] sm:$0xff] }
 0x2ea   :  { %4929 = vmatprep.subr.bf16.mxu0 %v6824_v1  ;;  %4991 = vmatpush1.bf16.msra.mxu1 %v6658_v51  ;;  %v6845_v51 = vpack.c.bf16 %v1220_v16, %v1214_v36  ;;  %v1299_v36 = vld [vmem:[#allocation7 + $0x508] sm:$0xff]  ;;  %v1305_v16 = vld [vmem:[#allocation7 + $0x538] sm:$0xff] }
 0x2eb   :  { %4993 = vmatprep.subr.bf16.mxu1 %v6664_v42  ;;  %v6848_v42 = vpack.c.bf16 %v1233_v17, %v1227_v44  ;;  %v6888_v44 = vpack.c.bf16 %v1292_v4, %v1286_v38  ;;  %v6891_v17 = vpack.c.bf16 %v1305_v16, %v1299_v36  ;;  %v8041_v38 = vld [vmem:[#allocation23_spill] sm:$0xff]  ;;  %v8042_v4 = vld [vmem:[#allocation24_spill] sm:$0xff] }
 0x2ec   :  { %v1788_v36 = vld [vmem:[#allocation7 + $0x398] sm:$0xff] }
 0x2ed   :  { %4931 = vmatpush1.bf16.msra.mxu0 %v6829_v18 }
 0x2ee   :  { %4933 = vmatprep.subr.bf16.mxu0 %v6832_v47  ;;  %4995 = vmatpush1.bf16.msra.mxu1 %v6670_v62  ;;  %v6853_v62 = vpack.c.bf16 %v1232_v45, %v1226_v19  ;;  %v1298_v19 = vld [vmem:[#allocation7 + $0x500] sm:$0xff]  ;;  %v1304_v45 = vld [vmem:[#allocation7 + $0x530] sm:$0xff] }
 0x2ef   :  { %4997 = vmatprep.subr.bf16.mxu1 %v6676_v53  ;;  %v6856_v53 = vpack.c.bf16 %v1245_v57, %v1239_v28  ;;  %v1311_v28 = vld [vmem:[#allocation7 + $0x568] sm:$0xff]  ;;  %v1317_v57 = vld [vmem:[#allocation7 + $0x598] sm:$0xff] }
 0x2f1   :  { %4935 = vmatpush1.bf16.msra.mxu0 %v6837_v40 }
 0x2f2   :  { %4937 = vmatprep.subr.bf16.mxu0 %v6840_v54  ;;  %4999 = vmatpush1.bf16.msra.mxu1 %v6682_v23  ;;  %v6861_v23 = vpack.c.bf16 %v1244_v56, %v1238_v49  ;;  %v6894_v49 = vpack.c.bf16 %v1304_v45, %v1298_v19  ;;  %v6897_v56 = vpack.c.bf16 %v1317_v57, %v1311_v28  ;;  %v1787_v19 = vld [vmem:[#allocation7 + $0x390] sm:$0xff]  ;;  %v1793_v57 = vld [vmem:[#allocation7 + $0x3c0] sm:$0xff] }
 0x2f3   :  { %5001 = vmatprep.subr.bf16.mxu1 %v6688_v30  ;;  %v6864_v30 = vpack.c.bf16 %v1257_v41, %v1251_v6  ;;  %v1310_v6 = vld [vmem:[#allocation7 + $0x560] sm:$0xff]  ;;  %v1316_v41 = vld [vmem:[#allocation7 + $0x590] sm:$0xff] }
 0x2f5   :  { %4939 = vmatpush1.bf16.msra.mxu0 %v6845_v51 }
 0x2f6   :  { %4941 = vmatprep.subr.bf16.mxu0 %v6848_v42  ;;  %5003 = vmatpush1.bf16.msra.mxu1 %v6694_v3  ;;  %v6869_v3 = vpack.c.bf16 %v1256_v21, %v1250_v15  ;;  %v1323_v15 = vld [vmem:[#allocation7 + $0x5c8] sm:$0xff]  ;;  %v1329_v21 = vld [vmem:[#allocation7 + $0x5f8] sm:$0xff] }
 0x2f7   :  { %5005 = vmatprep.subr.bf16.mxu1 %v6700_v32  ;;  %v6872_v32 = vpack.c.bf16 %v1269_v52, %v1263_v11  ;;  %v6900_v11 = vpack.c.bf16 %v1316_v41, %v1310_v6  ;;  %v6903_v52 = vpack.c.bf16 %v1329_v21, %v1323_v15  ;;  %v1799_v6 = vld [vmem:[#allocation7 + $0x3f0] sm:$0xff]  ;;  %v1806_v15 = vld [vmem:[#allocation7 + $0x428] sm:$0xff]  ;;  %v1812_v21 = vld [vmem:[#allocation7 + $0x458] sm:$0xff] }
 0x2f8   :  { %v6951_v41 = vpack.c.bf16 %v1799_v6, %v1793_v57  ;;  %v1859_v57 = vld [vmem:[#allocation7 + $0x5d0] sm:$0xff] }
 0x2f9   :  { %4943 = vmatpush1.bf16.msra.mxu0 %v6853_v62 }
 0x2fa   :  { %4945 = vmatprep.subr.bf16.mxu0 %v6856_v53  ;;  %5007 = vmatpush1.bf16.msra.mxu1 %v6706_v2  ;;  %v6876_v2 = vpack.c.bf16 %v1268_v37, %v1262_v0  ;;  %v1322_v0 = vld [vmem:[#allocation7 + $0x5c0] sm:$0xff]  ;;  %v1328_v37 = vld [vmem:[#allocation7 + $0x5f0] sm:$0xff] }
 0x2fb   :  { %5009 = vmatprep.subr.bf16.mxu1 %v6712_v14  ;;  %v6879_v14 = vpack.c.bf16 %v1281_v55, %v1275_v9  ;;  %v6906_v9 = vpack.c.bf16 %v1328_v37, %v1322_v0  ;;  %v8036_v55 = vld [vmem:[#allocation22_spill] sm:$0xff]  ;;  %v6955_v0 = vpack.c.bf16 %v1812_v21, %v1806_v15  ;;  %v1805_v37 = vld [vmem:[#allocation7 + $0x420] sm:$0xff]  ;;  %v1678_v15 = vld [vmem:[#allocation7 + $0x28] sm:$0xff] }
 0x2fc   :  { %v1684_v21 = vld [vmem:[#allocation7 + $0x58] sm:$0xff] }
 0x2fd   :  { %4947 = vmatpush1.bf16.msra.mxu0 %v6861_v23 }
 0x2fe   :  { %4949 = vmatprep.subr.bf16.mxu0 %v6864_v30  ;;  %5011 = vmatpush1.bf16.msra.mxu1 %v6718_v13  ;;  %v6885_v13 = vpack.c.bf16 %v1293_v59, %v1287_v5  ;;  %v8039_v5 = vld [vmem:[#allocation14_spill] sm:$0xff]  ;;  %v8040_v59 = vld [vmem:[#allocation16_spill] sm:$0xff] }
 0x301   :  { %4951 = vmatpush1.bf16.msra.mxu0 %v6869_v3 }
 0x302   :  { %4953 = vmatprep.subr.bf16.mxu0 %v6872_v32 }
 0x305   :  { %4955 = vmatpush1.bf16.msra.mxu0 %v6876_v2 }
 0x306   :  { %4957 = vmatprep.subr.bf16.mxu0 %v6879_v14 }
 0x309   :  { %4959 = vmatpush1.bf16.msra.mxu0 %v6882_v43 }
 0x30a   :  { %4961 = vmatprep.subr.bf16.mxu0 %v6885_v13 }
 0x30d   :  { %4963 = vmatpush1.bf16.msra.mxu0 %v6888_v44 }
 0x30e   :  { %4965 = vmatprep.subr.bf16.mxu0 %v6891_v17 }
 0x311   :  { %4967 = vmatpush1.bf16.msra.mxu0 %v6894_v49 }
 0x312   :  { %4969 = vmatprep.subr.bf16.mxu0 %v6897_v56 }
 0x315   :  { %4971 = vmatpush1.bf16.msra.mxu0 %v6900_v11 }
 0x316   :  { %4973 = vmatprep.subr.bf16.mxu0 %v6903_v52 }
 0x319   :  { %4975 = vmatpush1.bf16.msra.mxu0 %v6906_v9 }
 0x31a   :  { %5041 = vmatprep.subr.bf16.mxu0 %v6623_v8  ;;  %v8043_v8 = vld [vmem:[#allocation25_spill] sm:$0xff] }
 0x31c   :  { %1580 = vmatmul.mubr.f32.vlgmr.msra.gmra.mrb[8].mxu0 %v6807_v48  ;;  %v8046_v48 = vld [vmem:[#allocation28_spill] sm:$0xff] }
 0x31d   :  { %5043 = vmatpush1.bf16.msra.mxu0 %v6626_v20  ;;  %v8044_v20 = vld [vmem:[#allocation26_spill] sm:$0xff] }
 0x31e   :  { %5045 = vmatprep.subr.bf16.mxu0 %v6635_v22  ;;  %v8045_v22 = vld [vmem:[#allocation27_spill] sm:$0xff] }
 0x321   :  { %5047 = vmatpush1.bf16.msra.mxu0 %v8036_v55  ;;  %v1811_v55 = vld [vmem:[#allocation7 + $0x450] sm:$0xff] }
 0x322   :  { %5049 = vmatprep.subr.bf16.mxu0 %v8037_v7  ;;  %v6957_v7 = vpack.c.bf16 %v1811_v55, %v1805_v37  ;;  %v6985_v37 = vpack.c.bf16 %v1684_v21, %v1678_v15  ;;  %v1330_v55 = vld [vmem:[%s7904_s4] sm:$0x3f] }
 0x324   :  { %8055 = vst [vmem:[#allocation22_spill] sm:$0xff] %v6985_v37 }
 0x325   :  { %5051 = vmatpush1.bf16.msra.mxu0 %v8038_v35  ;;  %v1818_v35 = vld [vmem:[#allocation7 + $0x488] sm:$0xff] }
 0x326   :  { %5053 = vmatprep.subr.bf16.mxu0 %v8039_v5  ;;  %v1824_v5 = vld [vmem:[#allocation7 + $0x4b8] sm:$0xff] }
 0x329   :  { %5055 = vmatpush1.bf16.msra.mxu0 %v8040_v59  ;;  %v6961_v59 = vpack.c.bf16 %v1824_v5, %v1818_v35  ;;  %v1346_v35 = vrot.slane %v1330_v55, %v8004_v34  ;;  %v8056_v5 = vld [vmem:[#allocation17_spill] sm:$0xff] }
 0x32a   :  { %5057 = vmatprep.subr.bf16.mxu0 %v8041_v38  ;;  %v1817_v38 = vld [vmem:[#allocation7 + $0x480] sm:$0xff] }
 0x32d   :  { %5059 = vmatpush1.bf16.msra.mxu0 %v8042_v4  ;;  %v1823_v4 = vld [vmem:[#allocation7 + $0x4b0] sm:$0xff] }
 0x32e   :  { %5061 = vmatprep.subr.bf16.mxu0 %v8043_v8  ;;  %v6963_v8 = vpack.c.bf16 %v1823_v4, %v1817_v38  ;;  %v1354_v38 = vrot.slane %v1330_v55, %v8056_v5  ;;  %v1350_v4 = vrot.slane %v1330_v55, %v8005_v60  ;;  %v1137_v5 = vld [vmem:[%s1136_s17] sm:$0x3f] }
 0x331   :  { %5063 = vmatpush1.bf16.msra.mxu0 %v6686_v31  ;;  %v8047_v31 = vld [vmem:[#allocation29_spill] sm:$0xff] }
 0x332   :  { %5065 = vmatprep.subr.bf16.mxu0 %v6691_v50  ;;  %v8048_v50 = vld [vmem:[#allocation30_spill] sm:$0xff] }
 0x335   :  { %5067 = vmatpush1.bf16.msra.mxu0 %v6698_v25  ;;  %v8049_v25 = vld [vmem:[#allocation31_spill] sm:$0xff] }
 0x336   :  { %5069 = vmatprep.subr.bf16.mxu0 %v8044_v20  ;;  %v1830_v20 = vld [vmem:[#allocation7 + $0x4e8] sm:$0xff] }
 0x339   :  { %5071 = vmatpush1.bf16.msra.mxu0 %v8045_v22  ;;  %v1836_v22 = vld [vmem:[#allocation7 + $0x518] sm:$0xff] }
 0x33a   :  { %5073 = vmatprep.subr.bf16.mxu0 %v6720_v26  ;;  %v8050_v26 = vld [vmem:[#allocation32_spill] sm:$0xff] }
 0x33d   :  { %5075 = vmatpush1.bf16.msra.mxu0 %v6722_v10  ;;  %v8053_v10 = vld [vmem:[#allocation35_spill] sm:$0xff] }
 0x33e   :  { %5077 = vmatprep.subr.bf16.mxu0 %v6728_v12  ;;  %v8051_v12 = vld [vmem:[#allocation33_spill] sm:$0xff] }
 0x341   :  { %5079 = vmatpush1.bf16.msra.mxu0 %v6730_v61  ;;  %v8052_v61 = vld [vmem:[#allocation34_spill] sm:$0xff] }
 0x342   :  { %5081 = vmatprep.subr.bf16.mxu0 %v6736_v29  ;;  %v1782_v29 = vld [vmem:[#allocation7 + $0x368] sm:$0xff] }
 0x343   :  { %v6943_v16 = vpack.c.bf16 %v1788_v36, %v1782_v29  ;;  %v1847_v29 = vld [vmem:[#allocation7 + $0x570] sm:$0xff]  ;;  %v1854_v36 = vld [vmem:[#allocation7 + $0x5a8] sm:$0xff] }
 0x345   :  { %5083 = vmatpush1.bf16.msra.mxu0 %v8046_v48  ;;  %5013 = vmatprep.subr.bf16.mxu1 %v6943_v16  ;;  %v1829_v48 = vld [vmem:[#allocation7 + $0x4e0] sm:$0xff] }
 0x346   :  { %5085 = vmatprep.subr.bf16.mxu0 %v8047_v31  ;;  %v6966_v31 = vpack.c.bf16 %v1836_v22, %v1830_v20  ;;  %v8057_v20 = vld [vmem:[#allocation19_spill] sm:$0xff] }
 0x347   :  { %v1358_v22 = vrot.slane %v1330_v55, %v8057_v20 }
 0x349   :  { %5087 = vmatpush1.bf16.msra.mxu0 %v6746_v24  ;;  %v1781_v24 = vld [vmem:[#allocation7 + $0x360] sm:$0xff] }
 0x34a   :  { %5089 = vmatprep.subr.bf16.mxu0 %v8048_v50  ;;  %v6945_v45 = vpack.c.bf16 %v1787_v19, %v1781_v24  ;;  %v1835_v50 = vld [vmem:[#allocation7 + $0x510] sm:$0xff]  ;;  %v1860_v24 = vld [vmem:[#allocation7 + $0x5d8] sm:$0xff] }
 0x34c   :  { %5015 = vmatpush1.bf16.msra.mxu1 %v6945_v45 }
 0x34d   :  { %5091 = vmatpush1.bf16.msra.mxu0 %v6754_v58  ;;  %v1794_v58 = vld [vmem:[#allocation7 + $0x3c8] sm:$0xff] }
 0x34e   :  { %5093 = vmatprep.subr.bf16.mxu0 %v6758_v27  ;;  %v1800_v27 = vld [vmem:[#allocation7 + $0x3f8] sm:$0xff] }
 0x34f   :  { %v6949_v28 = vpack.c.bf16 %v1800_v27, %v1794_v58  ;;  %v6978_v58 = vpack.c.bf16 %v1860_v24, %v1854_v36  ;;  %v1853_v27 = vld [vmem:[#allocation7 + $0x5a0] sm:$0xff] }
 0x350   :  { %v6981_v6 = vpack.c.bf16 %v1859_v57, %v1853_v27 }
 0x351   :  { %5095 = vmatpush1.bf16.msra.mxu0 %v8049_v25  ;;  %5017 = vmatprep.subr.bf16.mxu1 %v6949_v28  ;;  %v1842_v25 = vld [vmem:[#allocation7 + $0x548] sm:$0xff] }
 0x352   :  { %5097 = vmatprep.subr.bf16.mxu0 %v8050_v26  ;;  %5019 = vmatpush1.bf16.msra.mxu1 %v6951_v41  ;;  %v1848_v26 = vld [vmem:[#allocation7 + $0x578] sm:$0xff]  ;;  %8054 = vst [vmem:[#allocation20_spill] sm:$0xff] %v6981_v6 }
 0x353   :  { %5021 = vmatprep.subr.bf16.mxu1 %v6955_v0 }
 0x355   :  { %5099 = vmatpush1.bf16.msra.mxu0 %v8051_v12  ;;  %v6969_v12 = vpack.c.bf16 %v1835_v50, %v1829_v48 }
 0x356   :  { %5101 = vmatprep.subr.bf16.mxu0 %v8052_v61  ;;  %5023 = vmatpush1.bf16.msra.mxu1 %v6957_v7  ;;  %v6972_v61 = vpack.c.bf16 %v1848_v26, %v1842_v25 }
 0x357   :  { %5025 = vmatprep.subr.bf16.mxu1 %v6961_v59 }
 0x359   :  { %5103 = vmatpush1.bf16.msra.mxu0 %v8053_v10  ;;  %v1841_v10 = vld [vmem:[#allocation7 + $0x540] sm:$0xff] }
 0x35a   :  { %5027 = vmatpush1.bf16.msra.mxu1 %v6963_v8  ;;  %v6975_v19 = vpack.c.bf16 %v1847_v29, %v1841_v10 }
 0x35b   :  { %5029 = vmatprep.subr.bf16.mxu1 %v6966_v31 }
 0x35e   :  { %5031 = vmatpush1.bf16.msra.mxu1 %v6969_v12 }
 0x35f   :  { %5033 = vmatprep.subr.bf16.mxu1 %v6972_v61 }
 0x362   :  { %5035 = vmatpush1.bf16.msra.mxu1 %v6975_v19 }
 0x363   :  { %5037 = vmatprep.subr.bf16.mxu1 %v6978_v58 }
 0x366   :  { %5039 = vmatpush1.bf16.msra.mxu1 %v6981_v6 }
 0x367   :  { %5105 = vmatprep.subr.bf16.mxu1 %v6985_v37 }
 0x3af   :  { %v1439_v48 = vpop.f32.mrb[6].mxu0  ;;  %v1510_v50 = vpop.f32.mrb[6].mxu1 }
 0x3b0   :  { %v1440_v25 = vadd.f32 %v1439_v48, %v1346_v35  ;;  %v1511_v26 = vadd.f32 %v1510_v50, %v1354_v38  ;;  %v1441_v10 = vpop.f32.mrb[7].mxu0  ;;  %v1512_v29 = vpop.f32.mrb[7].mxu1  ;;  %v1612_v35 = vrot.slane %v1137_v5, 2 }
 0x3b1   :  { %v1442_v36 = vadd.f32 %v1441_v10, %v1350_v4  ;;  %v1513_v24 = vadd.f32 %v1512_v29, %v1358_v22 }
 0x3b3   :  { %v1588_v27 = vcombine.low %v1440_v25, %v1442_v36  ;;  %v1616_v57 = vcombine.low %v1511_v26, %v1513_v24  ;;  %v1362_v25 = vrot.slane %v1330_v55, %v8034_v63  ;;  %v8058_v26 = vld [vmem:[#allocation21_spill] sm:$0xff] }
 0x3b4   :  { %v1366_v10 = vrot.slane %v1330_v55, %v8058_v26 }
 0x3b5   :  { %v1595_v15 = vrot.slane %v1588_v27, %v6543_v33  ;;  %v1623_v20 = vrot.slane %v1616_v57, %v6543_v33 }
 0x3b7   :  { %v1602_v21 = vrot.slane %v1595_v15, %v6543_v33  ;;  %v1630_v38 = vrot.slane %v1623_v20, %v6543_v33 }
 0x3b9   :  { %v1604_v37 = vadd.f32 %v1602_v21, %v1137_v5  ;;  %v1632_v4 = vadd.f32 %v1630_v38, %v1612_v35  ;;  %v1658_v21 = vrot.slane %v1137_v5, 4 }
 0x3bb   :  { %v4383_v6 = vmul.f32 -1.442695, %v1604_v37  ;;  %v4384_v22 = vmul.f32 -1.442695, %v1632_v4 }
 0x3bd   :  { %5965 = vpow2.f32 %v4383_v6 }
 0x3be   :  { %5967 = vpow2.f32 %v4384_v22 }
 0x3c7   :  { %v5966_v48 = vpop.eup %5965 }
 0x3c8   :  { %v1608_v50 = vadd.f32 1.0, %v5966_v48  ;;  %v5968_v57 = vpop.eup %5967 }
 0x3c9   :  { %v1636_v15 = vadd.f32 1.0, %v5968_v57 }
 0x3ca   :  { %5969 = vrcp.f32 %v1608_v50 }
 0x3cb   :  { %5971 = vrcp.f32 %v1636_v15 }
 0x3d4   :  { %v5970_v35 = vpop.eup %5969 }
 0x3d5   :  { %v5972_v22 = vpop.eup %5971 }
 0x3d6   :  { %v1662_v55 = vsub.f32 1.0, %v5972_v22 }
 0x3ef   :  { %v1581_v29 = vpop.f32.mrb[8].mxu0 }
 0x3f0   :  { %v1582_v36 = vadd.f32 %v1581_v29, %v1362_v25  ;;  %v1583_v24 = vpop.f32.mrb[9].mxu0  ;;  %v1664_v25 = vmul.f32 %v5972_v22, %v6801_v46  ;;  %v1683_v29 = vld [vmem:[#allocation7 + $0x50] sm:$0xff]  ;;  %v1689_v46 = vld [vmem:[#allocation7 + $0x80] sm:$0xff] }
 0x3f1   :  { %v1584_v27 = vadd.f32 %v1583_v24, %v1366_v10  ;;  %v1677_v10 = vld [vmem:[#allocation7 + $0x20] sm:$0xff]  ;;  %v1690_v24 = vld [vmem:[#allocation7 + $0x88] sm:$0xff]  ;;  %v1707_v22 = vld [vmem:[#allocation7 + $0x110] sm:$0xff] }
 0x3f3   :  { %v1641_v37 = vcombine.low %v1582_v36, %v1584_v27  ;;  %v1696_v27 = vld [vmem:[#allocation7 + $0xb8] sm:$0xff] }
 0x3f4   :  { %v7015_v15 = vpack.c.bf16 %v1696_v27, %v1690_v24  ;;  %v2239_v27 = vld [vmem:[#allocation7 + $0xf8] sm:$0xff] }
 0x3f5   :  { %v1648_v20 = vrot.slane %v1641_v37, %v6543_v33  ;;  %v7010_v37 = vpack.c.bf16 %v1683_v29, %v1677_v10  ;;  %v1713_v10 = vld [vmem:[#allocation7 + $0x140] sm:$0xff]  ;;  %v1719_v29 = vld [vmem:[#allocation7 + $0x170] sm:$0xff] }
 0x3f6   :  { %v7030_v24 = vpack.c.bf16 %v1719_v29, %v1713_v10  ;;  %v2245_v10 = vld [vmem:[#allocation7 + $0x128] sm:$0xff]  ;;  %v2251_v29 = vld [vmem:[#allocation7 + $0x158] sm:$0xff] }
 0x3f7   :  { %v1655_v6 = vrot.slane %v1648_v20, %v6543_v33  ;;  %v1695_v20 = vld [vmem:[#allocation7 + $0xb0] sm:$0xff] }
 0x3f9   :  { %v1657_v38 = vmul.f32 %v5970_v35, %v1655_v6  ;;  %v1702_v6 = vld [vmem:[#allocation7 + $0xe8] sm:$0xff]  ;;  %v7018_v35 = vpack.c.bf16 %v1695_v20, %v1689_v46  ;;  %v2232_v46 = vld [vmem:[#allocation7 + $0xc0] sm:$0xff]  ;;  %v2238_v20 = vld [vmem:[#allocation7 + $0xf0] sm:$0xff] }
 0x3fb   :  { %v1660_v4 = vadd.f32 %v1658_v21, %v1657_v38  ;;  %v1708_v21 = vld [vmem:[#allocation7 + $0x118] sm:$0xff] }
 0x3fc   :  { %v7021_v38 = vpack.c.bf16 %v1708_v21, %v1702_v6  ;;  %v2235_v6 = vld [vmem:[#allocation7 + $0xd8] sm:$0xff]  ;;  %v2241_v21 = vld [vmem:[#allocation7 + $0x108] sm:$0xff] }
 0x3fd   :  { %5973 = vtanh.f32 %v1660_v4  ;;  %v1701_v4 = vld [vmem:[#allocation7 + $0xe0] sm:$0xff] }
 0x407   :  { %v5974_v48 = vpop.eup %5973 }
 0x408   :  { %v1663_v50 = vmul.f32 %v5974_v48, %v1662_v55  ;;  %v1714_v55 = vld [vmem:[#allocation7 + $0x148] sm:$0xff]  ;;  %v1720_v48 = vld [vmem:[#allocation7 + $0x178] sm:$0xff] }
 0x40a   :  { %v7004_v36 = vadd.f32 %v1664_v25, %v1663_v50  ;;  %v7024_v50 = vpack.c.bf16 %v1707_v22, %v1701_v4  ;;  %v7027_v25 = vpack.c.bf16 %v1720_v48, %v1714_v55  ;;  %v2234_v4 = vld [vmem:[#allocation7 + $0xd0] sm:$0xff]  ;;  %v2240_v22 = vld [vmem:[#allocation7 + $0x100] sm:$0xff]  ;;  %v7083_v55 = vpack.c.bf16 %v2238_v20, %v2232_v46 }
 0x40b   :  { %v7085_v48 = vpack.c.bf16 %v2241_v21, %v2235_v6  ;;  %v2258_v46 = vld [vmem:[#allocation7 + $0x190] sm:$0xff]  ;;  %v2264_v6 = vld [vmem:[#allocation7 + $0x1c0] sm:$0xff]  ;;  %v2269_v21 = vld [vmem:[#allocation7 + $0x1e8] sm:$0xff] }
 0x40c   :  { %v1874_v5 = vrot.slane %v7004_v36, %v8005_v60  ;;  %v1870_v57 = vrot.slane %v7004_v36, %v8004_v34  ;;  %1667 = vst.msk [vmem:[#allocation9 + $0x2] ss:$8 sm:$0x3] %vm6561_vm0, %v7004_v36 }
 0x40d   :  { %8059 = vst [vmem:[#allocation18_spill] sm:$0xff] %v7085_v48 }
 0x40e   :  { %1972 = vmatprep.mubr.f32.mxu1 %v1874_v5  ;;  %2043 = vmatprep.mubr.f32.mxu0 %v1874_v5 }
 0x40f   :  { %1973 = vmatmul.mubr.f32.vlgmr.msra.gmra.mrb[8].mxu1 %v1870_v57  ;;  %2044 = vmatmul.mubr.f32.vlgmr.msra.gmra.mrb[10].mxu0 %v1870_v57 }
 0x410   :  { %5107 = vmatpush1.bf16.msra.mxu1 %v7010_v37  ;;  %2114 = vmatprep.mubr.f32.mxu1 %v1874_v5 }
 0x411   :  { %5109 = vmatprep.subr.bf16.mxu1 %v7015_v15 }
 0x414   :  { %5111 = vmatpush1.bf16.msra.mxu1 %v7018_v35 }
 0x415   :  { %5113 = vmatprep.subr.bf16.mxu1 %v7021_v38 }
 0x418   :  { %5115 = vmatpush1.bf16.msra.mxu1 %v7024_v50 }
 0x419   :  { %5117 = vmatprep.subr.bf16.mxu1 %v7027_v25 }
 0x41c   :  { %5119 = vmatpush1.bf16.msra.mxu1 %v7030_v24 }
 0x41d   :  { %5121 = vmatprep.subr.bf16.mxu1 %v6824_v1  ;;  %v2209_v1 = vld [vmem:[#allocation7 + $0x8] sm:$0xff] }
 0x420   :  { %5123 = vmatpush1.bf16.msra.mxu1 %v6829_v18  ;;  %v2215_v18 = vld [vmem:[#allocation7 + $0x38] sm:$0xff] }
 0x421   :  { %5125 = vmatprep.subr.bf16.mxu1 %v6832_v47  ;;  %v2208_v47 = vld [vmem:[#allocation7] sm:$0xff] }
 0x424   :  { %5127 = vmatpush1.bf16.msra.mxu1 %v6837_v40  ;;  %v7058_v40 = vpack.c.bf16 %v2215_v18, %v2209_v1  ;;  %v2244_v1 = vld [vmem:[#allocation7 + $0x120] sm:$0xff]  ;;  %v7089_v18 = vpack.c.bf16 %v2240_v22, %v2234_v4  ;;  %v2275_v4 = vld [vmem:[#allocation7 + $0x218] sm:$0xff] }
 0x425   :  { %5129 = vmatprep.subr.bf16.mxu1 %v6840_v54  ;;  %v2214_v54 = vld [vmem:[#allocation7 + $0x30] sm:$0xff]  ;;  %v2271_v22 = vld [vmem:[#allocation7 + $0x1f8] sm:$0xff] }
 0x426   :  { %5169 = vmatprep.subr.bf16.mxu0 %v7058_v40  ;;  %8060 = vst [vmem:[#allocation15_spill] sm:$0xff] %v7089_v18 }
 0x428   :  { %5131 = vmatpush1.bf16.msra.mxu1 %v6845_v51  ;;  %v2211_v51 = vld [vmem:[#allocation7 + $0x18] sm:$0xff] }
 0x429   :  { %5133 = vmatprep.subr.bf16.mxu1 %v6848_v42  ;;  %v2217_v42 = vld [vmem:[#allocation7 + $0x48] sm:$0xff] }
 0x42c   :  { %5135 = vmatpush1.bf16.msra.mxu1 %v6853_v62  ;;  %v7060_v62 = vpack.c.bf16 %v2214_v54, %v2208_v47  ;;  %v7091_v47 = vpack.c.bf16 %v2251_v29, %v2245_v10  ;;  %v2250_v54 = vld [vmem:[#allocation7 + $0x150] sm:$0xff]  ;;  %v2277_v10 = vld [vmem:[#allocation7 + $0x228] sm:$0xff] }
 0x42d   :  { %5137 = vmatprep.subr.bf16.mxu1 %v6856_v53  ;;  %v7062_v53 = vpack.c.bf16 %v2217_v42, %v2211_v51  ;;  %v2247_v51 = vld [vmem:[#allocation7 + $0x138] sm:$0xff]  ;;  %v2253_v42 = vld [vmem:[#allocation7 + $0x168] sm:$0xff] }
 0x42e   :  { %5171 = vmatpush1.bf16.msra.mxu0 %v7060_v62 }
 0x430   :  { %5139 = vmatpush1.bf16.msra.mxu1 %v6861_v23  ;;  %v2210_v23 = vld [vmem:[#allocation7 + $0x10] sm:$0xff] }
 0x431   :  { %5141 = vmatprep.subr.bf16.mxu1 %v6864_v30  ;;  %v2216_v30 = vld [vmem:[#allocation7 + $0x40] sm:$0xff] }
 0x434   :  { %5143 = vmatpush1.bf16.msra.mxu1 %v6869_v3  ;;  %v2221_v3 = vld [vmem:[#allocation7 + $0x68] sm:$0xff] }
 0x435   :  { %5145 = vmatprep.subr.bf16.mxu1 %v6872_v32  ;;  %v7065_v32 = vpack.c.bf16 %v2216_v30, %v2210_v23  ;;  %v7094_v23 = vpack.c.bf16 %v2253_v42, %v2247_v51  ;;  %v2246_v30 = vld [vmem:[#allocation7 + $0x130] sm:$0xff]  ;;  %v2268_v51 = vld [vmem:[#allocation7 + $0x1e0] sm:$0xff] }
 0x436   :  { %v2274_v42 = vld [vmem:[#allocation7 + $0x210] sm:$0xff] }
 0x437   :  { %8061 = vst [vmem:[#allocation14_spill] sm:$0xff] %v7094_v23 }
 0x438   :  { %5147 = vmatpush1.bf16.msra.mxu1 %v6876_v2  ;;  %v2227_v2 = vld [vmem:[#allocation7 + $0x98] sm:$0xff] }
 0x439   :  { %5149 = vmatprep.subr.bf16.mxu1 %v6879_v14  ;;  %v2220_v14 = vld [vmem:[#allocation7 + $0x60] sm:$0xff] }
 0x43c   :  { %5151 = vmatpush1.bf16.msra.mxu1 %v6882_v43  ;;  %v2226_v43 = vld [vmem:[#allocation7 + $0x90] sm:$0xff] }
 0x43d   :  { %5153 = vmatprep.subr.bf16.mxu1 %v6885_v13  ;;  %v7069_v13 = vpack.c.bf16 %v2227_v2, %v2221_v3  ;;  %v2252_v3 = vld [vmem:[#allocation7 + $0x160] sm:$0xff]  ;;  %v2257_v2 = vld [vmem:[#allocation7 + $0x188] sm:$0xff] }
 0x43f   :  { %5173 = vmatprep.subr.bf16.mxu0 %v7069_v13 }
 0x440   :  { %5155 = vmatpush1.bf16.msra.mxu1 %v6888_v44  ;;  %v7071_v44 = vpack.c.bf16 %v2226_v43, %v2220_v14  ;;  %v2263_v14 = vld [vmem:[#allocation7 + $0x1b8] sm:$0xff]  ;;  %v7097_v43 = vpack.c.bf16 %v2250_v54, %v2244_v1  ;;  %v7113_v1 = vpack.c.bf16 %v2264_v6, %v2258_v46  ;;  %v7115_v54 = vpack.c.bf16 %v2275_v4, %v2269_v21  ;;  %v2280_v21 = vld [vmem:[#allocation7 + $0x240] sm:$0xff]  ;;  %v2286_v4 = vld [vmem:[#allocation7 + $0x270] sm:$0xff] }
 0x441   :  { %5157 = vmatprep.subr.bf16.mxu1 %v6891_v17  ;;  %v2223_v17 = vld [vmem:[#allocation7 + $0x78] sm:$0xff] }
 0x442   :  { %5175 = vmatpush1.bf16.msra.mxu0 %v7071_v44  ;;  %8064 = vst [vmem:[#allocation24_spill] sm:$0xff] %v7113_v1 }
 0x444   :  { %5159 = vmatpush1.bf16.msra.mxu1 %v6894_v49  ;;  %v2229_v49 = vld [vmem:[#allocation7 + $0xa8] sm:$0xff] }
 0x445   :  { %5161 = vmatprep.subr.bf16.mxu1 %v6897_v56  ;;  %v2222_v56 = vld [vmem:[#allocation7 + $0x70] sm:$0xff] }
 0x448   :  { %5163 = vmatpush1.bf16.msra.mxu1 %v6900_v11  ;;  %v7074_v11 = vpack.c.bf16 %v2229_v49, %v2223_v17  ;;  %v2259_v17 = vld [vmem:[#allocation7 + $0x198] sm:$0xff]  ;;  %v2265_v49 = vld [vmem:[#allocation7 + $0x1c8] sm:$0xff] }
 0x449   :  { %5165 = vmatprep.subr.bf16.mxu1 %v6903_v52  ;;  %v2228_v52 = vld [vmem:[#allocation7 + $0xa0] sm:$0xff]  ;;  %v7106_v20 = vpack.c.bf16 %v2265_v49, %v2259_v17  ;;  %v2287_v17 = vld [vmem:[#allocation7 + $0x278] sm:$0xff] }
 0x44a   :  { %v7077_v5 = vpack.c.bf16 %v2228_v52, %v2222_v56  ;;  %v7101_v56 = vpack.c.bf16 %v2252_v3, %v2246_v30  ;;  %v7103_v52 = vpack.c.bf16 %v2263_v14, %v2257_v2  ;;  %v2270_v30 = vld [vmem:[#allocation7 + $0x1f0] sm:$0xff]  ;;  %v7118_v3 = vpack.c.bf16 %v2277_v10, %v2271_v22  ;;  %v2276_v2 = vld [vmem:[#allocation7 + $0x220] sm:$0xff]  ;;  %v2281_v14 = vld [vmem:[#allocation7 + $0x248] sm:$0xff] }
 0x44b   :  { %8063 = vst [vmem:[#allocation23_spill] sm:$0xff] %v7106_v20  ;;  %v2283_v49 = vld [vmem:[#allocation7 + $0x258] sm:$0xff]  ;;  %v7125_v46 = vpack.c.bf16 %v2276_v2, %v2270_v30  ;;  %v7127_v6 = vpack.c.bf16 %v2287_v17, %v2281_v14  ;;  %v2282_v22 = vld [vmem:[#allocation7 + $0x250] sm:$0xff]  ;;  %v2292_v14 = vld [vmem:[#allocation7 + $0x2a0] sm:$0xff] }
 0x44c   :  { %5167 = vmatpush1.bf16.msra.mxu1 %v6906_v9  ;;  %v2233_v9 = vld [vmem:[#allocation7 + $0xc8] sm:$0xff]  ;;  %8062 = vst [vmem:[#allocation16_spill] sm:$0xff] %v7101_v56  ;;  %8065 = vst [vmem:[#allocation25_spill] sm:$0xff] %v7118_v3  ;;  %v2298_v17 = vld [vmem:[#allocation7 + $0x2d0] sm:$0xff] }
 0x44d   :  { %5233 = vmatprep.subr.bf16.mxu1 %v7062_v53 }
 0x44f   :  { %2115 = vmatmul.mubr.f32.vlgmr.msra.gmra.mrb[10].mxu1 %v1870_v57  ;;  %v7079_v57 = vpack.c.bf16 %v2239_v27, %v2233_v9  ;;  %v2256_v9 = vld [vmem:[#allocation7 + $0x180] sm:$0xff]  ;;  %v2262_v27 = vld [vmem:[#allocation7 + $0x1b0] sm:$0xff] }
 0x450   :  { %5235 = vmatpush1.bf16.msra.mxu1 %v7065_v32  ;;  %v7109_v29 = vpack.c.bf16 %v2262_v27, %v2256_v9  ;;  %v2289_v9 = vld [vmem:[#allocation7 + $0x288] sm:$0xff]  ;;  %v7121_v27 = vpack.c.bf16 %v2274_v42, %v2268_v51  ;;  %v2295_v51 = vld [vmem:[#allocation7 + $0x2b8] sm:$0xff] }
 0x451   :  { %5237 = vmatprep.subr.bf16.mxu1 %v7074_v11  ;;  %5177 = vmatprep.subr.bf16.mxu0 %v7079_v57  ;;  %v7130_v10 = vpack.c.bf16 %v2289_v9, %v2283_v49  ;;  %v2301_v42 = vld [vmem:[#allocation7 + $0x2e8] sm:$0xff]  ;;  %v2294_v49 = vld [vmem:[#allocation7 + $0x2b0] sm:$0xff] }
 0x452   :  { %5179 = vmatpush1.bf16.msra.mxu0 %v7083_v55  ;;  %v7142_v9 = vpack.c.bf16 %v2301_v42, %v2295_v51  ;;  %v2313_v42 = vld [vmem:[#allocation7 + $0x348] sm:$0xff] }
 0x453   :  { %5181 = vmatprep.subr.bf16.mxu0 %v7091_v47 }
 0x454   :  { %5239 = vmatpush1.bf16.msra.mxu1 %v7077_v5  ;;  %8066 = vst [vmem:[#allocation26_spill] sm:$0xff] %v7142_v9 }
 0x455   :  { %5241 = vmatprep.subr.bf16.mxu1 %v7085_v48  ;;  %v2311_v48 = vld [vmem:[#allocation7 + $0x338] sm:$0xff] }
 0x456   :  { %5183 = vmatpush1.bf16.msra.mxu0 %v7097_v43 }
 0x457   :  { %5185 = vmatprep.subr.bf16.mxu0 %v7103_v52 }
 0x458   :  { %5243 = vmatpush1.bf16.msra.mxu1 %v7089_v18  ;;  %v2305_v18 = vld [vmem:[#allocation7 + $0x308] sm:$0xff] }
 0x459   :  { %5245 = vmatprep.subr.bf16.mxu1 %v7094_v23  ;;  %v2299_v23 = vld [vmem:[#allocation7 + $0x2d8] sm:$0xff] }
 0x45a   :  { %5187 = vmatpush1.bf16.msra.mxu0 %v7109_v29 }
 0x45b   :  { %5189 = vmatprep.subr.bf16.mxu0 %v7115_v54 }
 0x45c   :  { %5247 = vmatpush1.bf16.msra.mxu1 %v7101_v56  ;;  %v2293_v56 = vld [vmem:[#allocation7 + $0x2a8] sm:$0xff] }
 0x45d   :  { %5249 = vmatprep.subr.bf16.mxu1 %v7106_v20  ;;  %v2288_v20 = vld [vmem:[#allocation7 + $0x280] sm:$0xff]  ;;  %v7139_v2 = vpack.c.bf16 %v2299_v23, %v2293_v56  ;;  %v7151_v56 = vpack.c.bf16 %v2311_v48, %v2305_v18  ;;  %v2319_v18 = vld [vmem:[#allocation7 + $0x378] sm:$0xff] }
 0x45e   :  { %5191 = vmatpush1.bf16.msra.mxu0 %v7121_v27  ;;  %v7137_v30 = vpack.c.bf16 %v2288_v20, %v2282_v22  ;;  %v2304_v20 = vld [vmem:[#allocation7 + $0x300] sm:$0xff]  ;;  %v2307_v22 = vld [vmem:[#allocation7 + $0x318] sm:$0xff] }
 0x45f   :  { %5193 = vmatprep.subr.bf16.mxu0 %v7127_v6 }
 0x460   :  { %5251 = vmatpush1.bf16.msra.mxu1 %v7113_v1  ;;  %v7133_v1 = vpack.c.bf16 %v2286_v4, %v2280_v21  ;;  %v7145_v21 = vpack.c.bf16 %v2298_v17, %v2292_v14  ;;  %v2310_v4 = vld [vmem:[#allocation7 + $0x330] sm:$0xff]  ;;  %v2312_v17 = vld [vmem:[#allocation7 + $0x340] sm:$0xff] }
 0x461   :  { %5253 = vmatprep.subr.bf16.mxu1 %v7118_v3  ;;  %v2300_v3 = vld [vmem:[#allocation7 + $0x2e0] sm:$0xff]  ;;  %v7157_v51 = vpack.c.bf16 %v2310_v4, %v2304_v20  ;;  %v2306_v14 = vld [vmem:[#allocation7 + $0x310] sm:$0xff] }
 0x462   :  { %5195 = vmatpush1.bf16.msra.mxu0 %v7133_v1  ;;  %v7149_v23 = vpack.c.bf16 %v2300_v3, %v2294_v49  ;;  %v7159_v3 = vpack.c.bf16 %v2313_v42, %v2307_v22  ;;  %v7161_v48 = vpack.c.bf16 %v2312_v17, %v2306_v14  ;;  %v2325_v49 = vld [vmem:[#allocation7 + $0x3a8] sm:$0xff]  ;;  %v2318_v20 = vld [vmem:[#allocation7 + $0x370] sm:$0xff]  ;;  %v2324_v4 = vld [vmem:[#allocation7 + $0x3a0] sm:$0xff] }
 0x463   :  { %5197 = vmatprep.subr.bf16.mxu0 %v7139_v2  ;;  %v2331_v22 = vld [vmem:[#allocation7 + $0x3d8] sm:$0xff]  ;;  %v2337_v42 = vld [vmem:[#allocation7 + $0x408] sm:$0xff]  ;;  %v2330_v14 = vld [vmem:[#allocation7 + $0x3d0] sm:$0xff] }
 0x464   :  { %5255 = vmatpush1.bf16.msra.mxu1 %v7125_v46  ;;  %8067 = vst [vmem:[#allocation27_spill] sm:$0xff] %v7149_v23  ;;  %v2336_v17 = vld [vmem:[#allocation7 + $0x400] sm:$0xff] }
 0x465   :  { %5257 = vmatprep.subr.bf16.mxu1 %v7130_v10 }
 0x466   :  { %5199 = vmatpush1.bf16.msra.mxu0 %v7145_v21 }
 0x467   :  { %5201 = vmatprep.subr.bf16.mxu0 %v7151_v56 }
 0x468   :  { %5259 = vmatpush1.bf16.msra.mxu1 %v7137_v30 }
 0x469   :  { %5261 = vmatprep.subr.bf16.mxu1 %v7142_v9  ;;  %v7169_v9 = vpack.c.bf16 %v2324_v4, %v2318_v20  ;;  %v2342_v20 = vld [vmem:[#allocation7 + $0x430] sm:$0xff]  ;;  %v2348_v4 = vld [vmem:[#allocation7 + $0x460] sm:$0xff] }
 0x46a   :  { %5203 = vmatpush1.bf16.msra.mxu0 %v7157_v51 }
 0x46b   :  { %5205 = vmatprep.subr.bf16.mxu0 %v6943_v16  ;;  %v7175_v16 = vpack.c.bf16 %v2337_v42, %v2331_v22  ;;  %v7185_v22 = vpack.c.bf16 %v2348_v4, %v2342_v20  ;;  %v2361_v42 = vld [vmem:[#allocation7 + $0x4c8] sm:$0xff]  ;;  %v2366_v20 = vld [vmem:[#allocation7 + $0x4f0] sm:$0xff]  ;;  %v2372_v4 = vld [vmem:[#allocation7 + $0x520] sm:$0xff] }
 0x46c   :  { %5263 = vmatpush1.bf16.msra.mxu1 %v7149_v23  ;;  %v7167_v23 = vpack.c.bf16 %v2325_v49, %v2319_v18  ;;  %v7177_v18 = vpack.c.bf16 %v2336_v17, %v2330_v14  ;;  %v2349_v49 = vld [vmem:[#allocation7 + $0x468] sm:$0xff]  ;;  %v2354_v14 = vld [vmem:[#allocation7 + $0x490] sm:$0xff]  ;;  %v2360_v17 = vld [vmem:[#allocation7 + $0x4c0] sm:$0xff] }
 0x46d   :  { %5265 = vmatprep.subr.bf16.mxu1 %v7159_v3  ;;  %8070 = vst [vmem:[#allocation30_spill] sm:$0xff] %v7185_v22 }
 0x46e   :  { %5207 = vmatpush1.bf16.msra.mxu0 %v6945_v45  ;;  %8068 = vst [vmem:[#allocation28_spill] sm:$0xff] %v7177_v18  ;;  %v2343_v45 = vld [vmem:[#allocation7 + $0x438] sm:$0xff] }
 0x46f   :  { %5209 = vmatprep.subr.bf16.mxu0 %v6949_v28  ;;  %v7183_v28 = vpack.c.bf16 %v2349_v49, %v2343_v45  ;;  %v2367_v45 = vld [vmem:[#allocation7 + $0x4f8] sm:$0xff]  ;;  %v7193_v49 = vpack.c.bf16 %v2360_v17, %v2354_v14  ;;  %v2378_v14 = vld [vmem:[#allocation7 + $0x550] sm:$0xff]  ;;  %v2384_v17 = vld [vmem:[#allocation7 + $0x580] sm:$0xff] }
 0x470   :  { %5267 = vmatpush1.bf16.msra.mxu1 %v7161_v48 }
 0x471   :  { %5269 = vmatprep.subr.bf16.mxu1 %v7167_v23  ;;  %8069 = vst [vmem:[#allocation29_spill] sm:$0xff] %v7183_v28  ;;  %8072 = vst [vmem:[#allocation32_spill] sm:$0xff] %v7193_v49 }
 0x472   :  { %5211 = vmatpush1.bf16.msra.mxu0 %v6951_v41  ;;  %v2355_v41 = vld [vmem:[#allocation7 + $0x498] sm:$0xff] }
 0x473   :  { %5213 = vmatprep.subr.bf16.mxu0 %v6955_v0  ;;  %v7191_v0 = vpack.c.bf16 %v2361_v42, %v2355_v41  ;;  %v7201_v41 = vpack.c.bf16 %v2372_v4, %v2366_v20  ;;  %v2396_v20 = vld [vmem:[#allocation7 + $0x5e0] sm:$0xff] }
 0x474   :  { %5271 = vmatpush1.bf16.msra.mxu1 %v7169_v9 }
 0x475   :  { %5273 = vmatprep.subr.bf16.mxu1 %v7175_v16  ;;  %8071 = vst [vmem:[#allocation31_spill] sm:$0xff] %v7191_v0  ;;  %8074 = vst [vmem:[#allocation34_spill] sm:$0xff] %v7201_v41 }
 0x476   :  { %5215 = vmatpush1.bf16.msra.mxu0 %v6957_v7 }
 0x477   :  { %5217 = vmatprep.subr.bf16.mxu0 %v6961_v59  ;;  %v2379_v59 = vld [vmem:[#allocation7 + $0x558] sm:$0xff] }
 0x478   :  { %5275 = vmatpush1.bf16.msra.mxu1 %v7177_v18  ;;  %v2373_v18 = vld [vmem:[#allocation7 + $0x528] sm:$0xff] }
 0x479   :  { %5277 = vmatprep.subr.bf16.mxu1 %v7183_v28  ;;  %v7197_v7 = vpack.c.bf16 %v2373_v18, %v2367_v45  ;;  %v2385_v28 = vld [vmem:[#allocation7 + $0x588] sm:$0xff]  ;;  %v7209_v18 = vpack.c.bf16 %v2384_v17, %v2378_v14  ;;  %v2390_v45 = vld [vmem:[#allocation7 + $0x5b0] sm:$0xff]  ;;  %v8082_v14 = vld [vmem:[#allocation19_spill] sm:$0xff] }
 0x47a   :  { %5219 = vmatpush1.bf16.msra.mxu0 %v6963_v8  ;;  %v7204_v42 = vpack.c.bf16 %v2385_v28, %v2379_v59  ;;  %v2391_v8 = vld [vmem:[#allocation7 + $0x5b8] sm:$0xff]  ;;  %v8080_v28 = vld [vmem:[#allocation22_spill] sm:$0xff] }
 0x47b   :  { %8073 = vst [vmem:[#allocation33_spill] sm:$0xff] %v7197_v7  ;;  %5221 = vmatprep.subr.bf16.mxu0 %v6966_v31  ;;  %8076 = vst [vmem:[#allocation21_spill] sm:$0xff] %v7209_v18 }
 0x47c   :  { %5279 = vmatpush1.bf16.msra.mxu1 %v7185_v22  ;;  %8075 = vst [vmem:[#allocation35_spill] sm:$0xff] %v7204_v42 }
 0x47d   :  { %5281 = vmatprep.subr.bf16.mxu1 %v7191_v0  ;;  %v2397_v0 = vld [vmem:[#allocation7 + $0x5e8] sm:$0xff] }
 0x47e   :  { %5223 = vmatpush1.bf16.msra.mxu0 %v6969_v12  ;;  %v7212_v31 = vpack.c.bf16 %v2397_v0, %v2391_v8  ;;  %v7217_v12 = vpack.c.bf16 %v2396_v20, %v2390_v45  ;;  %v8081_v0 = vld [vmem:[#allocation17_spill] sm:$0xff] }
 0x47f   :  { %5225 = vmatprep.subr.bf16.mxu0 %v6972_v61  ;;  %v8079_v61 = vld [vmem:[#allocation20_spill] sm:$0xff] }
 0x480   :  { %5283 = vmatpush1.bf16.msra.mxu1 %v7193_v49  ;;  %8077 = vst [vmem:[#allocation36_spill] sm:$0xff] %v7212_v31  ;;  %8078 = vst [vmem:[#allocation37_spill] sm:$0xff] %v7217_v12 }
 0x481   :  { %5285 = vmatprep.subr.bf16.mxu1 %v7197_v7  ;;  %v1672_v7 = vld [vmem:[%s1671_s22] sm:$0x3f] }
 0x482   :  { %5227 = vmatpush1.bf16.msra.mxu0 %v6975_v19  ;;  %v1865_v19 = vld [vmem:[%s7904_s4] sm:$0x3f] }
 0x483   :  { %5229 = vmatprep.subr.bf16.mxu0 %v6978_v58  ;;  %v1881_v58 = vrot.slane %v1865_v19, %v8004_v34  ;;  %v1889_v4 = vrot.slane %v1865_v19, %v8081_v0  ;;  %v1885_v59 = vrot.slane %v1865_v19, %v8005_v60  ;;  %v1893_v17 = vrot.slane %v1865_v19, %v8082_v14 }
 0x484   :  { %5287 = vmatpush1.bf16.msra.mxu1 %v7201_v41 }
 0x485   :  { %5289 = vmatprep.subr.bf16.mxu1 %v7204_v42 }
 0x486   :  { %5231 = vmatpush1.bf16.msra.mxu0 %v8079_v61 }
 0x487   :  { %5297 = vmatprep.subr.bf16.mxu0 %v8080_v28 }
 0x488   :  { %5291 = vmatpush1.bf16.msra.mxu1 %v7209_v18 }
 0x489   :  { %5293 = vmatprep.subr.bf16.mxu1 %v7212_v31 }
 0x48c   :  { %5295 = vmatpush1.bf16.msra.mxu1 %v7217_v12 }
 0x48d   :  { %5361 = vmatprep.subr.bf16.mxu1 %v7058_v40 }
 0x4e2   :  { %v1974_v8 = vpop.f32.mrb[8].mxu1  ;;  %v2045_v45 = vpop.f32.mrb[10].mxu0 }
 0x4e3   :  { %v1975_v20 = vadd.f32 %v1974_v8, %v1881_v58  ;;  %v2046_v61 = vadd.f32 %v2045_v45, %v1889_v4  ;;  %v1976_v28 = vpop.f32.mrb[9].mxu1  ;;  %v2047_v12 = vpop.f32.mrb[11].mxu0  ;;  %v2147_v58 = vrot.slane %v1672_v7, 2  ;;  %v1897_v8 = vrot.slane %v1865_v19, %v8034_v63 }
 0x4e4   :  { %v1977_v31 = vadd.f32 %v1976_v28, %v1885_v59  ;;  %v2048_v40 = vadd.f32 %v2047_v12, %v1893_v17  ;;  %v2193_v28 = vrot.slane %v1672_v7, 4 }
 0x4e6   :  { %v2123_v18 = vcombine.low %v1975_v20, %v1977_v31  ;;  %v2151_v42 = vcombine.low %v2046_v61, %v2048_v40 }
 0x4e8   :  { %v2130_v41 = vrot.slane %v2123_v18, %v6543_v33  ;;  %v2158_v14 = vrot.slane %v2151_v42, %v6543_v33  ;;  %v1901_v18 = vrot.slane %v1865_v19, %v8058_v26 }
 0x4ea   :  { %v2137_v0 = vrot.slane %v2130_v41, %v6543_v33  ;;  %v2165_v4 = vrot.slane %v2158_v14, %v6543_v33 }
 0x4ec   :  { %v2139_v49 = vadd.f32 %v2137_v0, %v1672_v7  ;;  %v2167_v59 = vadd.f32 %v2165_v4, %v2147_v58  ;;  %v2267_v7 = vld [vmem:[#allocation7 + $0x1d8] sm:$0xff] }
 0x4ee   :  { %v4386_v22 = vmul.f32 -1.442695, %v2139_v49  ;;  %v4387_v12 = vmul.f32 -1.442695, %v2167_v59 }
 0x4f0   :  { %5975 = vpow2.f32 %v4386_v22 }
 0x4f1   :  { %5977 = vpow2.f32 %v4387_v12 }
 0x4fa   :  { %v5976_v31 = vpop.eup %5975 }
 0x4fb   :  { %v2143_v17 = vadd.f32 1.0, %v5976_v31  ;;  %v5978_v42 = vpop.eup %5977 }
 0x4fc   :  { %v2171_v61 = vadd.f32 1.0, %v5978_v42  ;;  %v2303_v42 = vld [vmem:[#allocation7 + $0x2f8] sm:$0xff] }
 0x4fd   :  { %5979 = vrcp.f32 %v2143_v17 }
 0x4fe   :  { %5981 = vrcp.f32 %v2171_v61  ;;  %v2302_v61 = vld [vmem:[#allocation7 + $0x2f0] sm:$0xff] }
 0x507   :  { %v5980_v40 = vpop.eup %5979 }
 0x508   :  { %v5982_v59 = vpop.eup %5981 }
 0x509   :  { %v2197_v19 = vsub.f32 1.0, %v5982_v59  ;;  %v2199_v17 = vmul.f32 %v5982_v59, %v7004_v36  ;;  %v2261_v36 = vld [vmem:[#allocation7 + $0x1a8] sm:$0xff]  ;;  %v2320_v59 = vld [vmem:[#allocation7 + $0x380] sm:$0xff] }
 0x522   :  { %v2116_v41 = vpop.f32.mrb[10].mxu1 }
 0x523   :  { %v2117_v45 = vadd.f32 %v2116_v41, %v1897_v8  ;;  %v2118_v0 = vpop.f32.mrb[11].mxu1 }
 0x524   :  { %v2119_v20 = vadd.f32 %v2118_v0, %v1901_v18  ;;  %v2290_v0 = vld [vmem:[#allocation7 + $0x290] sm:$0xff] }
 0x526   :  { %v2176_v49 = vcombine.low %v2117_v45, %v2119_v20  ;;  %v2291_v45 = vld [vmem:[#allocation7 + $0x298] sm:$0xff]  ;;  %v2297_v20 = vld [vmem:[#allocation7 + $0x2c8] sm:$0xff] }
 0x528   :  { %v2183_v14 = vrot.slane %v2176_v49, %v6543_v33  ;;  %v2296_v49 = vld [vmem:[#allocation7 + $0x2c0] sm:$0xff] }
 0x52a   :  { %v2190_v22 = vrot.slane %v2183_v14, %v6543_v33  ;;  %v2309_v14 = vld [vmem:[#allocation7 + $0x328] sm:$0xff] }
 0x52c   :  { %v2192_v58 = vmul.f32 %v5980_v40, %v2190_v22  ;;  %v2315_v22 = vld [vmem:[#allocation7 + $0x358] sm:$0xff]  ;;  %v2314_v40 = vld [vmem:[#allocation7 + $0x350] sm:$0xff] }
 0x52e   :  { %v2195_v4 = vadd.f32 %v2193_v28, %v2192_v58  ;;  %v2308_v28 = vld [vmem:[#allocation7 + $0x320] sm:$0xff]  ;;  %v2321_v58 = vld [vmem:[#allocation7 + $0x388] sm:$0xff] }
 0x530   :  { %5983 = vtanh.f32 %v2195_v4  ;;  %v2327_v4 = vld [vmem:[#allocation7 + $0x3b8] sm:$0xff] }
 0x53a   :  { %v5984_v12 = vpop.eup %5983 }
 0x53b   :  { %v2198_v31 = vmul.f32 %v5984_v12, %v2197_v19  ;;  %v2326_v19 = vld [vmem:[#allocation7 + $0x3b0] sm:$0xff]  ;;  %v2333_v12 = vld [vmem:[#allocation7 + $0x3e8] sm:$0xff] }
 0x53d   :  { %v7240_v8 = vadd.f32 %v2199_v17, %v2198_v31  ;;  %v2339_v31 = vld [vmem:[#allocation7 + $0x418] sm:$0xff]  ;;  %v2332_v17 = vld [vmem:[#allocation7 + $0x3e0] sm:$0xff] }
 0x53f   :  { %v2409_v18 = vrot.slane %v7240_v8, %v8005_v60  ;;  %v7246_v41 = vrot.slane %v7240_v8, %v8004_v34  ;;  %2202 = vst.msk [vmem:[#allocation9 + $0x3] ss:$8 sm:$0x3] %vm6561_vm0, %v7240_v8 }
 0x541   :  { %2507 = vmatprep.mubr.f32.mxu0 %v2409_v18  ;;  %2578 = vmatprep.mubr.f32.mxu1 %v2409_v18 }
 0x542   :  { %2508 = vmatmul.mubr.f32.vlgmr.msra.gmra.mrb[12].mxu0 %v7246_v41  ;;  %2579 = vmatmul.mubr.f32.vlgmr.msra.gmra.mrb[12].mxu1 %v7246_v41 }
 0x543   :  { %5299 = vmatpush1.bf16.msra.mxu0 %v7010_v37  ;;  %2649 = vmatprep.mubr.f32.mxu0 %v2409_v18  ;;  %v7263_v37 = vpack.c.bf16 %v2267_v7, %v2261_v36  ;;  %v2338_v18 = vld [vmem:[#allocation7 + $0x410] sm:$0xff]  ;;  %v2345_v36 = vld [vmem:[#allocation7 + $0x448] sm:$0xff]  ;;  %v2351_v7 = vld [vmem:[#allocation7 + $0x478] sm:$0xff] }
 0x544   :  { %5301 = vmatprep.subr.bf16.mxu0 %v7015_v15  ;;  %5363 = vmatpush1.bf16.msra.mxu1 %v7060_v62  ;;  %v2260_v15 = vld [vmem:[#allocation7 + $0x1a0] sm:$0xff]  ;;  %v2266_v62 = vld [vmem:[#allocation7 + $0x1d0] sm:$0xff] }
 0x545   :  { %5365 = vmatprep.subr.bf16.mxu1 %v7069_v13  ;;  %v2273_v13 = vld [vmem:[#allocation7 + $0x208] sm:$0xff] }
 0x547   :  { %5303 = vmatpush1.bf16.msra.mxu0 %v7018_v35  ;;  %v2279_v35 = vld [vmem:[#allocation7 + $0x238] sm:$0xff] }
 0x548   :  { %5305 = vmatprep.subr.bf16.mxu0 %v7021_v38  ;;  %5367 = vmatpush1.bf16.msra.mxu1 %v7071_v44  ;;  %v7268_v38 = vpack.c.bf16 %v2266_v62, %v2260_v15  ;;  %v7271_v44 = vpack.c.bf16 %v2279_v35, %v2273_v13  ;;  %v2344_v15 = vld [vmem:[#allocation7 + $0x440] sm:$0xff]  ;;  %v2350_v62 = vld [vmem:[#allocation7 + $0x470] sm:$0xff]  ;;  %v2357_v13 = vld [vmem:[#allocation7 + $0x4a8] sm:$0xff] }
 0x549   :  { %5369 = vmatprep.subr.bf16.mxu1 %v7079_v57  ;;  %v2285_v57 = vld [vmem:[#allocation7 + $0x268] sm:$0xff]  ;;  %v2363_v35 = vld [vmem:[#allocation7 + $0x4d8] sm:$0xff] }
 0x54b   :  { %5307 = vmatpush1.bf16.msra.mxu0 %v7024_v50  ;;  %v2272_v50 = vld [vmem:[#allocation7 + $0x200] sm:$0xff] }
 0x54c   :  { %5309 = vmatprep.subr.bf16.mxu0 %v7027_v25  ;;  %5371 = vmatpush1.bf16.msra.mxu1 %v7083_v55  ;;  %v2278_v25 = vld [vmem:[#allocation7 + $0x230] sm:$0xff] }
 0x54d   :  { %5373 = vmatprep.subr.bf16.mxu1 %v7091_v47  ;;  %v7276_v55 = vpack.c.bf16 %v2278_v25, %v2272_v50  ;;  %v2284_v47 = vld [vmem:[#allocation7 + $0x260] sm:$0xff]  ;;  %v7321_v50 = vpack.c.bf16 %v2350_v62, %v2344_v15  ;;  %v8085_v15 = vld [vmem:[#allocation14_spill] sm:$0xff] }
 0x54e   :  { %v2356_v25 = vld [vmem:[#allocation7 + $0x4a0] sm:$0xff] }
 0x54f   :  { %5311 = vmatpush1.bf16.msra.mxu0 %v7030_v24  ;;  %v7279_v24 = vpack.c.bf16 %v2291_v45, %v2285_v57  ;;  %v2362_v57 = vld [vmem:[#allocation7 + $0x4d0] sm:$0xff]  ;;  %v2369_v45 = vld [vmem:[#allocation7 + $0x508] sm:$0xff]  ;;  %v8086_v62 = vld [vmem:[#allocation16_spill] sm:$0xff] }
 0x550   :  { %5313 = vmatprep.subr.bf16.mxu0 %v7263_v37  ;;  %5375 = vmatpush1.bf16.msra.mxu1 %v7097_v43  ;;  %v7284_v43 = vpack.c.bf16 %v2290_v0, %v2284_v47  ;;  %v2375_v47 = vld [vmem:[#allocation7 + $0x538] sm:$0xff]  ;;  %v7327_v0 = vpack.c.bf16 %v2362_v57, %v2356_v25  ;;  %v8097_v25 = vld [vmem:[#allocation33_spill] sm:$0xff] }
 0x551   :  { %5377 = vmatprep.subr.bf16.mxu1 %v7103_v52  ;;  %v7287_v52 = vpack.c.bf16 %v2303_v42, %v2297_v20  ;;  %v7330_v20 = vpack.c.bf16 %v2375_v47, %v2369_v45  ;;  %v2368_v42 = vld [vmem:[#allocation7 + $0x500] sm:$0xff]  ;;  %v2852_v57 = vld [vmem:[#allocation7 + $0x368] sm:$0xff]  ;;  %v2858_v45 = vld [vmem:[#allocation7 + $0x398] sm:$0xff] }
 0x552   :  { %v7382_v47 = vpack.c.bf16 %v2858_v45, %v2852_v57  ;;  %v2911_v57 = vld [vmem:[#allocation7 + $0x540] sm:$0xff]  ;;  %v2917_v45 = vld [vmem:[#allocation7 + $0x570] sm:$0xff] }
 0x553   :  { %5315 = vmatpush1.bf16.msra.mxu0 %v7268_v38 }
 0x554   :  { %5317 = vmatprep.subr.bf16.mxu0 %v7271_v44  ;;  %5379 = vmatpush1.bf16.msra.mxu1 %v7109_v29  ;;  %v7292_v29 = vpack.c.bf16 %v2302_v61, %v2296_v49  ;;  %v2374_v49 = vld [vmem:[#allocation7 + $0x530] sm:$0xff]  ;;  %v2381_v61 = vld [vmem:[#allocation7 + $0x568] sm:$0xff] }
 0x555   :  { %5381 = vmatprep.subr.bf16.mxu1 %v7115_v54  ;;  %v7295_v54 = vpack.c.bf16 %v2315_v22, %v2309_v14  ;;  %v2387_v14 = vld [vmem:[#allocation7 + $0x598] sm:$0xff]  ;;  %v7333_v22 = vpack.c.bf16 %v2374_v49, %v2368_v42  ;;  %v2851_v42 = vld [vmem:[#allocation7 + $0x360] sm:$0xff]  ;;  %v2857_v49 = vld [vmem:[#allocation7 + $0x390] sm:$0xff] }
 0x557   :  { %5319 = vmatpush1.bf16.msra.mxu0 %v7276_v55 }
 0x558   :  { %5321 = vmatprep.subr.bf16.mxu0 %v7279_v24  ;;  %5383 = vmatpush1.bf16.msra.mxu1 %v7121_v27  ;;  %v7300_v27 = vpack.c.bf16 %v2314_v40, %v2308_v28  ;;  %v7336_v28 = vpack.c.bf16 %v2387_v14, %v2381_v61  ;;  %v2380_v40 = vld [vmem:[#allocation7 + $0x560] sm:$0xff]  ;;  %v7384_v61 = vpack.c.bf16 %v2857_v49, %v2851_v42  ;;  %v2864_v14 = vld [vmem:[#allocation7 + $0x3c8] sm:$0xff]  ;;  %v2930_v49 = vld [vmem:[#allocation7 + $0x5d8] sm:$0xff] }
 0x559   :  { %5385 = vmatprep.subr.bf16.mxu1 %v7127_v6  ;;  %v7303_v6 = vpack.c.bf16 %v2327_v4, %v2321_v58  ;;  %v2386_v58 = vld [vmem:[#allocation7 + $0x590] sm:$0xff]  ;;  %v2393_v4 = vld [vmem:[#allocation7 + $0x5c8] sm:$0xff] }
 0x55a   :  { %v2924_v42 = vld [vmem:[#allocation7 + $0x5a8] sm:$0xff] }
 0x55b   :  { %5323 = vmatpush1.bf16.msra.mxu0 %v7284_v43 }
 0x55c   :  { %5325 = vmatprep.subr.bf16.mxu0 %v7287_v52  ;;  %5387 = vmatpush1.bf16.msra.mxu1 %v7133_v1  ;;  %v7308_v1 = vpack.c.bf16 %v2326_v19, %v2320_v59  ;;  %v2399_v59 = vld [vmem:[#allocation7 + $0x5f8] sm:$0xff]  ;;  %v7339_v19 = vpack.c.bf16 %v2386_v58, %v2380_v40 }
 0x55d   :  { %5389 = vmatprep.subr.bf16.mxu1 %v7139_v2  ;;  %v7311_v2 = vpack.c.bf16 %v2339_v31, %v2333_v12  ;;  %v7342_v12 = vpack.c.bf16 %v2399_v59, %v2393_v4  ;;  %v2392_v31 = vld [vmem:[#allocation7 + $0x5c0] sm:$0xff]  ;;  %v2870_v40 = vld [vmem:[#allocation7 + $0x3f8] sm:$0xff]  ;;  %v2869_v59 = vld [vmem:[#allocation7 + $0x3f0] sm:$0xff] }
 0x55e   :  { %v7388_v58 = vpack.c.bf16 %v2870_v40, %v2864_v14  ;;  %v2863_v4 = vld [vmem:[#allocation7 + $0x3c0] sm:$0xff]  ;;  %v7414_v14 = vpack.c.bf16 %v2917_v45, %v2911_v57  ;;  %v7417_v40 = vpack.c.bf16 %v2930_v49, %v2924_v42 }
 0x55f   :  { %5327 = vmatpush1.bf16.msra.mxu0 %v7292_v29 }
 0x560   :  { %5329 = vmatprep.subr.bf16.mxu0 %v7295_v54  ;;  %5391 = vmatpush1.bf16.msra.mxu1 %v7145_v21  ;;  %v7315_v21 = vpack.c.bf16 %v2338_v18, %v2332_v17  ;;  %v2398_v17 = vld [vmem:[#allocation7 + $0x5f0] sm:$0xff]  ;;  %8103 = vst [vmem:[#allocation20_spill] sm:$0xff] %v7417_v40 }
 0x561   :  { %5393 = vmatprep.subr.bf16.mxu1 %v7151_v56  ;;  %v7318_v56 = vpack.c.bf16 %v2351_v7, %v2345_v36  ;;  %v7345_v18 = vpack.c.bf16 %v2398_v17, %v2392_v31  ;;  %v8083_v36 = vld [vmem:[#allocation18_spill] sm:$0xff]  ;;  %v8084_v7 = vld [vmem:[#allocation15_spill] sm:$0xff]  ;;  %v7390_v31 = vpack.c.bf16 %v2869_v59, %v2863_v4  ;;  %v2876_v17 = vld [vmem:[#allocation7 + $0x428] sm:$0xff] }
 0x562   :  { %v2923_v4 = vld [vmem:[#allocation7 + $0x5a0] sm:$0xff]  ;;  %v2929_v59 = vld [vmem:[#allocation7 + $0x5d0] sm:$0xff] }
 0x563   :  { %5331 = vmatpush1.bf16.msra.mxu0 %v7300_v27 }
 0x564   :  { %5333 = vmatprep.subr.bf16.mxu0 %v7303_v6  ;;  %5395 = vmatpush1.bf16.msra.mxu1 %v7157_v51  ;;  %v7324_v51 = vpack.c.bf16 %v2363_v35, %v2357_v13  ;;  %v8087_v13 = vld [vmem:[#allocation23_spill] sm:$0xff]  ;;  %v8088_v35 = vld [vmem:[#allocation24_spill] sm:$0xff] }
 0x565   :  { %5397 = vmatprep.subr.bf16.mxu1 %v7382_v47 }
 0x567   :  { %5335 = vmatpush1.bf16.msra.mxu0 %v7308_v1 }
 0x568   :  { %5337 = vmatprep.subr.bf16.mxu0 %v7311_v2  ;;  %5399 = vmatpush1.bf16.msra.mxu1 %v7384_v61 }
 0x569   :  { %5401 = vmatprep.subr.bf16.mxu1 %v7388_v58 }
 0x56b   :  { %5339 = vmatpush1.bf16.msra.mxu0 %v7315_v21 }
 0x56c   :  { %5341 = vmatprep.subr.bf16.mxu0 %v7318_v56  ;;  %5403 = vmatpush1.bf16.msra.mxu1 %v7390_v31 }
 0x56f   :  { %5343 = vmatpush1.bf16.msra.mxu0 %v7321_v50 }
 0x570   :  { %5345 = vmatprep.subr.bf16.mxu0 %v7324_v51 }
 0x573   :  { %5347 = vmatpush1.bf16.msra.mxu0 %v7327_v0 }
 0x574   :  { %5349 = vmatprep.subr.bf16.mxu0 %v7330_v20 }
 0x577   :  { %5351 = vmatpush1.bf16.msra.mxu0 %v7333_v22 }
 0x578   :  { %5353 = vmatprep.subr.bf16.mxu0 %v7336_v28 }
 0x57b   :  { %5355 = vmatpush1.bf16.msra.mxu0 %v7339_v19 }
 0x57c   :  { %5357 = vmatprep.subr.bf16.mxu0 %v7342_v12 }
 0x57f   :  { %5359 = vmatpush1.bf16.msra.mxu0 %v7345_v18 }
 0x580   :  { %5425 = vmatprep.subr.bf16.mxu0 %v7062_v53  ;;  %v8089_v53 = vld [vmem:[#allocation25_spill] sm:$0xff] }
 0x582   :  { %2650 = vmatmul.mubr.f32.vlgmr.msra.gmra.mrb[14].mxu0 %v7246_v41  ;;  %v8096_v41 = vld [vmem:[#allocation32_spill] sm:$0xff] }
 0x583   :  { %5427 = vmatpush1.bf16.msra.mxu0 %v7065_v32  ;;  %v8090_v32 = vld [vmem:[#allocation26_spill] sm:$0xff] }
 0x584   :  { %5429 = vmatprep.subr.bf16.mxu0 %v7074_v11  ;;  %v8091_v11 = vld [vmem:[#allocation27_spill] sm:$0xff] }
 0x587   :  { %5431 = vmatpush1.bf16.msra.mxu0 %v7077_v5  ;;  %v8092_v5 = vld [vmem:[#allocation28_spill] sm:$0xff] }
 0x588   :  { %5433 = vmatprep.subr.bf16.mxu0 %v8083_v36  ;;  %v2882_v36 = vld [vmem:[#allocation7 + $0x458] sm:$0xff] }
 0x58b   :  { %5435 = vmatpush1.bf16.msra.mxu0 %v8084_v7  ;;  %v7394_v7 = vpack.c.bf16 %v2882_v36, %v2876_v17  ;;  %v7420_v17 = vpack.c.bf16 %v2929_v59, %v2923_v4  ;;  %v2748_v36 = vld [vmem:[#allocation7 + $0x28] sm:$0xff] }
 0x58c   :  { %5437 = vmatprep.subr.bf16.mxu0 %v8085_v15  ;;  %v2875_v15 = vld [vmem:[#allocation7 + $0x420] sm:$0xff] }
 0x58d   :  { %5405 = vmatprep.subr.bf16.mxu1 %v7394_v7  ;;  %8104 = vst [vmem:[#allocation22_spill] sm:$0xff] %v7420_v17 }
 0x58f   :  { %5439 = vmatpush1.bf16.msra.mxu0 %v8086_v62  ;;  %v2881_v62 = vld [vmem:[#allocation7 + $0x450] sm:$0xff] }
 0x590   :  { %5441 = vmatprep.subr.bf16.mxu0 %v8087_v13  ;;  %v7396_v13 = vpack.c.bf16 %v2881_v62, %v2875_v15  ;;  %v2754_v15 = vld [vmem:[#allocation7 + $0x58] sm:$0xff] }
 0x591   :  { %v7424_v62 = vpack.c.bf16 %v2754_v15, %v2748_v36 }
 0x592   :  { %5407 = vmatpush1.bf16.msra.mxu1 %v7396_v13 }
 0x593   :  { %5443 = vmatpush1.bf16.msra.mxu0 %v8088_v35  ;;  %v2888_v35 = vld [vmem:[#allocation7 + $0x488] sm:$0xff]  ;;  %8105 = vst [vmem:[#allocation18_spill] sm:$0xff] %v7424_v62 }
 0x594   :  { %5445 = vmatprep.subr.bf16.mxu0 %v8089_v53  ;;  %v2894_v53 = vld [vmem:[#allocation7 + $0x4b8] sm:$0xff] }
 0x597   :  { %5447 = vmatpush1.bf16.msra.mxu0 %v7125_v46  ;;  %v8093_v46 = vld [vmem:[#allocation29_spill] sm:$0xff] }
 0x598   :  { %5449 = vmatprep.subr.bf16.mxu0 %v7130_v10  ;;  %v8094_v10 = vld [vmem:[#allocation30_spill] sm:$0xff] }
 0x59b   :  { %5451 = vmatpush1.bf16.msra.mxu0 %v7137_v30  ;;  %v8095_v30 = vld [vmem:[#allocation31_spill] sm:$0xff] }
 0x59c   :  { %5453 = vmatprep.subr.bf16.mxu0 %v8090_v32  ;;  %v7400_v32 = vpack.c.bf16 %v2894_v53, %v2888_v35  ;;  %v2400_v35 = vld [vmem:[%s7904_s4] sm:$0x3f] }
 0x59d   :  { %v2416_v53 = vrot.slane %v2400_v35, %v8004_v34 }
 0x59e   :  { %5409 = vmatprep.subr.bf16.mxu1 %v7400_v32 }
 0x59f   :  { %5455 = vmatpush1.bf16.msra.mxu0 %v8091_v11  ;;  %v2887_v11 = vld [vmem:[#allocation7 + $0x480] sm:$0xff] }
 0x5a0   :  { %5457 = vmatprep.subr.bf16.mxu0 %v7159_v3  ;;  %v8098_v3 = vld [vmem:[#allocation34_spill] sm:$0xff] }
 0x5a3   :  { %5459 = vmatpush1.bf16.msra.mxu0 %v7161_v48  ;;  %v8099_v48 = vld [vmem:[#allocation35_spill] sm:$0xff] }
 0x5a4   :  { %5461 = vmatprep.subr.bf16.mxu0 %v7167_v23  ;;  %v8100_v23 = vld [vmem:[#allocation21_spill] sm:$0xff] }
 0x5a7   :  { %5463 = vmatpush1.bf16.msra.mxu0 %v7169_v9  ;;  %v8101_v9 = vld [vmem:[#allocation36_spill] sm:$0xff] }
 0x5a8   :  { %5465 = vmatprep.subr.bf16.mxu0 %v7175_v16  ;;  %v8102_v16 = vld [vmem:[#allocation37_spill] sm:$0xff] }
 0x5ab   :  { %5467 = vmatpush1.bf16.msra.mxu0 %v8092_v5  ;;  %v2893_v5 = vld [vmem:[#allocation7 + $0x4b0] sm:$0xff] }
 0x5ac   :  { %5469 = vmatprep.subr.bf16.mxu0 %v8093_v46  ;;  %v7402_v46 = vpack.c.bf16 %v2893_v5, %v2887_v11  ;;  %v8106_v11 = vld [vmem:[#allocation17_spill] sm:$0xff] }
 0x5ad   :  { %v2424_v5 = vrot.slane %v2400_v35, %v8106_v11 }
 0x5ae   :  { %5411 = vmatpush1.bf16.msra.mxu1 %v7402_v46 }
 0x5af   :  { %5471 = vmatpush1.bf16.msra.mxu0 %v8094_v10  ;;  %v2900_v10 = vld [vmem:[#allocation7 + $0x4e8] sm:$0xff] }
 0x5b0   :  { %5473 = vmatprep.subr.bf16.mxu0 %v8095_v30  ;;  %v2906_v30 = vld [vmem:[#allocation7 + $0x518] sm:$0xff] }
 0x5b3   :  { %5475 = vmatpush1.bf16.msra.mxu0 %v8096_v41  ;;  %v2899_v41 = vld [vmem:[#allocation7 + $0x4e0] sm:$0xff] }
 0x5b4   :  { %5477 = vmatprep.subr.bf16.mxu0 %v8097_v25  ;;  %v7405_v25 = vpack.c.bf16 %v2906_v30, %v2900_v10  ;;  %v2420_v10 = vrot.slane %v2400_v35, %v8005_v60  ;;  %v8107_v30 = vld [vmem:[#allocation19_spill] sm:$0xff] }
 0x5b6   :  { %5413 = vmatprep.subr.bf16.mxu1 %v7405_v25 }
 0x5b7   :  { %5479 = vmatpush1.bf16.msra.mxu0 %v8098_v3  ;;  %v2905_v3 = vld [vmem:[#allocation7 + $0x510] sm:$0xff] }
 0x5b8   :  { %5481 = vmatprep.subr.bf16.mxu0 %v8099_v48  ;;  %v2912_v48 = vld [vmem:[#allocation7 + $0x548] sm:$0xff] }
 0x5bb   :  { %5483 = vmatpush1.bf16.msra.mxu0 %v8100_v23  ;;  %v2918_v23 = vld [vmem:[#allocation7 + $0x578] sm:$0xff] }
 0x5bc   :  { %5485 = vmatprep.subr.bf16.mxu0 %v8101_v9  ;;  %v7408_v9 = vpack.c.bf16 %v2905_v3, %v2899_v41  ;;  %v2428_v41 = vrot.slane %v2400_v35, %v8107_v30 }
 0x5be   :  { %5415 = vmatpush1.bf16.msra.mxu1 %v7408_v9 }
 0x5bf   :  { %5487 = vmatpush1.bf16.msra.mxu0 %v8102_v16  ;;  %v7411_v16 = vpack.c.bf16 %v2918_v23, %v2912_v48 }
 0x5c1   :  { %5417 = vmatprep.subr.bf16.mxu1 %v7411_v16 }
 0x5c2   :  { %5419 = vmatpush1.bf16.msra.mxu1 %v7414_v14 }
 0x5c3   :  { %5421 = vmatprep.subr.bf16.mxu1 %v7417_v40 }
 0x5c6   :  { %5423 = vmatpush1.bf16.msra.mxu1 %v7420_v17 }
 0x5c7   :  { %5489 = vmatprep.subr.bf16.mxu1 %v7424_v62  ;;  %v2207_v62 = vld [vmem:[%s2206_s26] sm:$0x3f] }
 0x615   :  { %v2509_v3 = vpop.f32.mrb[12].mxu0  ;;  %v2580_v48 = vpop.f32.mrb[12].mxu1 }
 0x616   :  { %v2510_v23 = vadd.f32 %v2509_v3, %v2416_v53  ;;  %v2581_v57 = vadd.f32 %v2580_v48, %v2424_v5  ;;  %v2511_v45 = vpop.f32.mrb[13].mxu0  ;;  %v2582_v42 = vpop.f32.mrb[13].mxu1  ;;  %v2682_v53 = vrot.slane %v2207_v62, 2 }
 0x617   :  { %v2512_v49 = vadd.f32 %v2511_v45, %v2420_v10  ;;  %v2583_v4 = vadd.f32 %v2582_v42, %v2428_v41 }
 0x619   :  { %v2658_v59 = vcombine.low %v2510_v23, %v2512_v49  ;;  %v2686_v36 = vcombine.low %v2581_v57, %v2583_v4  ;;  %v2432_v23 = vrot.slane %v2400_v35, %v8034_v63  ;;  %v2436_v57 = vrot.slane %v2400_v35, %v8058_v26 }
 0x61b   :  { %v2665_v15 = vrot.slane %v2658_v59, %v6543_v33  ;;  %v2693_v30 = vrot.slane %v2686_v36, %v6543_v33  ;;  %v2728_v36 = vrot.slane %v2207_v62, 4 }
 0x61d   :  { %v2672_v11 = vrot.slane %v2665_v15, %v6543_v33  ;;  %v2700_v5 = vrot.slane %v2693_v30, %v6543_v33 }
 0x61f   :  { %v2674_v17 = vadd.f32 %v2672_v11, %v2207_v62  ;;  %v2702_v10 = vadd.f32 %v2700_v5, %v2682_v53 }
 0x621   :  { %v4389_v40 = vmul.f32 -1.442695, %v2674_v17  ;;  %v4390_v41 = vmul.f32 -1.442695, %v2702_v10 }
 0x623   :  { %5985 = vpow2.f32 %v4389_v40 }
 0x624   :  { %5987 = vpow2.f32 %v4390_v41 }
 0x62d   :  { %v5986_v3 = vpop.eup %5985 }
 0x62e   :  { %v2678_v48 = vadd.f32 1.0, %v5986_v3  ;;  %v5988_v4 = vpop.eup %5987 }
 0x62f   :  { %v2706_v59 = vadd.f32 1.0, %v5988_v4 }
 0x630   :  { %5989 = vrcp.f32 %v2678_v48 }
 0x631   :  { %5991 = vrcp.f32 %v2706_v59  ;;  %v2765_v59 = vld [vmem:[#allocation7 + $0xb0] sm:$0xff] }
 0x63a   :  { %v5990_v15 = vpop.eup %5989 }
 0x63b   :  { %v5992_v10 = vpop.eup %5991 }
 0x63c   :  { %v2732_v35 = vsub.f32 1.0, %v5992_v10  ;;  %v2734_v48 = vmul.f32 %v5992_v10, %v7240_v8  ;;  %v2759_v8 = vld [vmem:[#allocation7 + $0x80] sm:$0xff]  ;;  %v2784_v10 = vld [vmem:[#allocation7 + $0x148] sm:$0xff] }
 0x655   :  { %v2651_v45 = vpop.f32.mrb[14].mxu0 }
 0x656   :  { %v2652_v42 = vadd.f32 %v2651_v45, %v2432_v23  ;;  %v2653_v11 = vpop.f32.mrb[15].mxu0  ;;  %v2747_v23 = vld [vmem:[#allocation7 + $0x20] sm:$0xff] }
 0x657   :  { %v2654_v49 = vadd.f32 %v2653_v11, %v2436_v57  ;;  %v2753_v57 = vld [vmem:[#allocation7 + $0x50] sm:$0xff]  ;;  %v2766_v11 = vld [vmem:[#allocation7 + $0xb8] sm:$0xff] }
 0x658   :  { %v7449_v4 = vpack.c.bf16 %v2753_v57, %v2747_v23  ;;  %v2789_v23 = vld [vmem:[#allocation7 + $0x170] sm:$0xff] }
 0x659   :  { %v2711_v17 = vcombine.low %v2652_v42, %v2654_v49  ;;  %v2760_v42 = vld [vmem:[#allocation7 + $0x88] sm:$0xff] }
 0x65b   :  { %v2718_v30 = vrot.slane %v2711_v17, %v6543_v33  ;;  %v7454_v17 = vpack.c.bf16 %v2766_v11, %v2760_v42  ;;  %v3309_v42 = vld [vmem:[#allocation7 + $0xf8] sm:$0xff] }
 0x65d   :  { %v2725_v40 = vrot.slane %v2718_v30, %v6543_v33  ;;  %v2772_v30 = vld [vmem:[#allocation7 + $0xe8] sm:$0xff] }
 0x65f   :  { %v2727_v53 = vmul.f32 %v5990_v15, %v2725_v40  ;;  %v2778_v40 = vld [vmem:[#allocation7 + $0x118] sm:$0xff] }
 0x660   :  { %v7460_v15 = vpack.c.bf16 %v2778_v40, %v2772_v30  ;;  %v3311_v30 = vld [vmem:[#allocation7 + $0x108] sm:$0xff]  ;;  %v3304_v40 = vld [vmem:[#allocation7 + $0xd0] sm:$0xff] }
 0x661   :  { %v2730_v5 = vadd.f32 %v2728_v36, %v2727_v53  ;;  %v7457_v36 = vpack.c.bf16 %v2765_v59, %v2759_v8  ;;  %v2771_v53 = vld [vmem:[#allocation7 + $0xe0] sm:$0xff]  ;;  %v3308_v8 = vld [vmem:[#allocation7 + $0xf0] sm:$0xff]  ;;  %v3305_v59 = vld [vmem:[#allocation7 + $0xd8] sm:$0xff] }
 0x663   :  { %5993 = vtanh.f32 %v2730_v5  ;;  %v2777_v5 = vld [vmem:[#allocation7 + $0x110] sm:$0xff] }
 0x66d   :  { %v5994_v41 = vpop.eup %5993 }
 0x66e   :  { %v2733_v3 = vmul.f32 %v5994_v41, %v2732_v35  ;;  %v2790_v35 = vld [vmem:[#allocation7 + $0x178] sm:$0xff]  ;;  %v7463_v41 = vpack.c.bf16 %v2777_v5, %v2771_v53  ;;  %v3310_v53 = vld [vmem:[#allocation7 + $0x100] sm:$0xff] }
 0x670   :  { %v7443_v45 = vadd.f32 %v2734_v48, %v2733_v3  ;;  %v7466_v3 = vpack.c.bf16 %v2790_v35, %v2784_v10  ;;  %v2783_v48 = vld [vmem:[#allocation7 + $0x140] sm:$0xff]  ;;  %v7524_v10 = vpack.c.bf16 %v3311_v30, %v3305_v59  ;;  %v3315_v35 = vld [vmem:[#allocation7 + $0x128] sm:$0xff]  ;;  %v3345_v30 = vld [vmem:[#allocation7 + $0x218] sm:$0xff] }
 0x671   :  { %v7469_v57 = vpack.c.bf16 %v2789_v23, %v2783_v48  ;;  %v3321_v48 = vld [vmem:[#allocation7 + $0x158] sm:$0xff]  ;;  %v3314_v23 = vld [vmem:[#allocation7 + $0x120] sm:$0xff]  ;;  %v3339_v59 = vld [vmem:[#allocation7 + $0x1e8] sm:$0xff] }
 0x672   :  { %v2944_v62 = vrot.slane %v7443_v45, %v8005_v60  ;;  %v2940_v49 = vrot.slane %v7443_v45, %v8004_v34  ;;  %2737 = vst.msk [vmem:[#allocation9 + $0x4] ss:$8 sm:$0x3] %vm6561_vm0, %v7443_v45 }
 0x674   :  { %3042 = vmatprep.mubr.f32.mxu1 %v2944_v62  ;;  %3113 = vmatprep.mubr.f32.mxu0 %v2944_v62 }
 0x675   :  { %3043 = vmatmul.mubr.f32.vlgmr.msra.gmra.mrb[14].mxu1 %v2940_v49  ;;  %3114 = vmatmul.mubr.f32.vlgmr.msra.gmra.mrb[16].mxu0 %v2940_v49 }
 0x676   :  { %5491 = vmatpush1.bf16.msra.mxu1 %v7449_v4  ;;  %3184 = vmatprep.mubr.f32.mxu1 %v2944_v62 }
 0x677   :  { %5493 = vmatprep.subr.bf16.mxu1 %v7454_v17 }
 0x67a   :  { %5495 = vmatpush1.bf16.msra.mxu1 %v7457_v36 }
 0x67b   :  { %5497 = vmatprep.subr.bf16.mxu1 %v7460_v15 }
 0x67e   :  { %5499 = vmatpush1.bf16.msra.mxu1 %v7463_v41 }
 0x67f   :  { %5501 = vmatprep.subr.bf16.mxu1 %v7466_v3 }
 0x682   :  { %5503 = vmatpush1.bf16.msra.mxu1 %v7469_v57 }
 0x683   :  { %5505 = vmatprep.subr.bf16.mxu1 %v7263_v37  ;;  %v3279_v37 = vld [vmem:[#allocation7 + $0x8] sm:$0xff] }
 0x686   :  { %5507 = vmatpush1.bf16.msra.mxu1 %v7268_v38  ;;  %v3285_v38 = vld [vmem:[#allocation7 + $0x38] sm:$0xff] }
 0x687   :  { %5509 = vmatprep.subr.bf16.mxu1 %v7271_v44  ;;  %v3278_v44 = vld [vmem:[#allocation7] sm:$0xff] }
 0x68a   :  { %5511 = vmatpush1.bf16.msra.mxu1 %v7276_v55  ;;  %v7497_v55 = vpack.c.bf16 %v3285_v38, %v3279_v37  ;;  %v7528_v37 = vpack.c.bf16 %v3310_v53, %v3304_v40  ;;  %v7530_v38 = vpack.c.bf16 %v3321_v48, %v3315_v35  ;;  %v3341_v40 = vld [vmem:[#allocation7 + $0x1f8] sm:$0xff]  ;;  %v3347_v53 = vld [vmem:[#allocation7 + $0x228] sm:$0xff] }
 0x68b   :  { %5513 = vmatprep.subr.bf16.mxu1 %v7279_v24  ;;  %v3284_v24 = vld [vmem:[#allocation7 + $0x30] sm:$0xff] }
 0x68c   :  { %5553 = vmatprep.subr.bf16.mxu0 %v7497_v55  ;;  %8108 = vst [vmem:[#allocation15_spill] sm:$0xff] %v7528_v37 }
 0x68e   :  { %5515 = vmatpush1.bf16.msra.mxu1 %v7284_v43  ;;  %v3281_v43 = vld [vmem:[#allocation7 + $0x18] sm:$0xff] }
 0x68f   :  { %5517 = vmatprep.subr.bf16.mxu1 %v7287_v52  ;;  %v3287_v52 = vld [vmem:[#allocation7 + $0x48] sm:$0xff] }
 0x692   :  { %5519 = vmatpush1.bf16.msra.mxu1 %v7292_v29  ;;  %v7499_v29 = vpack.c.bf16 %v3284_v24, %v3278_v44  ;;  %v3320_v44 = vld [vmem:[#allocation7 + $0x150] sm:$0xff]  ;;  %v3317_v24 = vld [vmem:[#allocation7 + $0x138] sm:$0xff] }
 0x693   :  { %5521 = vmatprep.subr.bf16.mxu1 %v7295_v54  ;;  %v7501_v54 = vpack.c.bf16 %v3287_v52, %v3281_v43  ;;  %v3323_v43 = vld [vmem:[#allocation7 + $0x168] sm:$0xff] }
 0x694   :  { %5555 = vmatpush1.bf16.msra.mxu0 %v7499_v29  ;;  %v7533_v52 = vpack.c.bf16 %v3323_v43, %v3317_v24  ;;  %v3344_v24 = vld [vmem:[#allocation7 + $0x210] sm:$0xff] }
 0x695   :  { %v3340_v43 = vld [vmem:[#allocation7 + $0x1f0] sm:$0xff] }
 0x696   :  { %5523 = vmatpush1.bf16.msra.mxu1 %v7300_v27  ;;  %v3280_v27 = vld [vmem:[#allocation7 + $0x10] sm:$0xff]  ;;  %8109 = vst [vmem:[#allocation14_spill] sm:$0xff] %v7533_v52 }
 0x697   :  { %5525 = vmatprep.subr.bf16.mxu1 %v7303_v6  ;;  %v3286_v6 = vld [vmem:[#allocation7 + $0x40] sm:$0xff] }
 0x69a   :  { %5527 = vmatpush1.bf16.msra.mxu1 %v7308_v1  ;;  %v3291_v1 = vld [vmem:[#allocation7 + $0x68] sm:$0xff] }
 0x69b   :  { %5529 = vmatprep.subr.bf16.mxu1 %v7311_v2  ;;  %v7504_v2 = vpack.c.bf16 %v3286_v6, %v3280_v27  ;;  %v3316_v27 = vld [vmem:[#allocation7 + $0x130] sm:$0xff]  ;;  %v3322_v6 = vld [vmem:[#allocation7 + $0x160] sm:$0xff] }
 0x69e   :  { %5531 = vmatpush1.bf16.msra.mxu1 %v7315_v21  ;;  %v3297_v21 = vld [vmem:[#allocation7 + $0x98] sm:$0xff] }
 0x69f   :  { %5533 = vmatprep.subr.bf16.mxu1 %v7318_v56  ;;  %v3290_v56 = vld [vmem:[#allocation7 + $0x60] sm:$0xff] }
 0x6a2   :  { %5535 = vmatpush1.bf16.msra.mxu1 %v7321_v50  ;;  %v3296_v50 = vld [vmem:[#allocation7 + $0x90] sm:$0xff] }
 0x6a3   :  { %5537 = vmatprep.subr.bf16.mxu1 %v7324_v51  ;;  %v7508_v51 = vpack.c.bf16 %v3297_v21, %v3291_v1  ;;  %v3327_v1 = vld [vmem:[#allocation7 + $0x188] sm:$0xff]  ;;  %v3333_v21 = vld [vmem:[#allocation7 + $0x1b8] sm:$0xff] }
 0x6a5   :  { %5557 = vmatprep.subr.bf16.mxu0 %v7508_v51 }
 0x6a6   :  { %5539 = vmatpush1.bf16.msra.mxu1 %v7327_v0  ;;  %v7510_v0 = vpack.c.bf16 %v3296_v50, %v3290_v56  ;;  %v7536_v56 = vpack.c.bf16 %v3320_v44, %v3314_v23  ;;  %v3329_v50 = vld [vmem:[#allocation7 + $0x198] sm:$0xff]  ;;  %v7554_v23 = vpack.c.bf16 %v3345_v30, %v3339_v59  ;;  %v3338_v44 = vld [vmem:[#allocation7 + $0x1e0] sm:$0xff]  ;;  %v3356_v59 = vld [vmem:[#allocation7 + $0x270] sm:$0xff] }
 0x6a7   :  { %5541 = vmatprep.subr.bf16.mxu1 %v7330_v20  ;;  %v3293_v20 = vld [vmem:[#allocation7 + $0x78] sm:$0xff]  ;;  %v3352_v30 = vld [vmem:[#allocation7 + $0x250] sm:$0xff] }
 0x6a8   :  { %5559 = vmatpush1.bf16.msra.mxu0 %v7510_v0 }
 0x6aa   :  { %5543 = vmatpush1.bf16.msra.mxu1 %v7333_v22  ;;  %v3299_v22 = vld [vmem:[#allocation7 + $0xa8] sm:$0xff] }
 0x6ab   :  { %5545 = vmatprep.subr.bf16.mxu1 %v7336_v28  ;;  %v3292_v28 = vld [vmem:[#allocation7 + $0x70] sm:$0xff] }
 0x6ae   :  { %5547 = vmatpush1.bf16.msra.mxu1 %v7339_v19  ;;  %v7513_v19 = vpack.c.bf16 %v3299_v22, %v3293_v20  ;;  %v3335_v20 = vld [vmem:[#allocation7 + $0x1c8] sm:$0xff]  ;;  %v7540_v22 = vpack.c.bf16 %v3322_v6, %v3316_v27  ;;  %v7557_v27 = vpack.c.bf16 %v3347_v53, %v3341_v40  ;;  %v3346_v6 = vld [vmem:[#allocation7 + $0x220] sm:$0xff] }
 0x6af   :  { %5549 = vmatprep.subr.bf16.mxu1 %v7342_v12  ;;  %v3298_v12 = vld [vmem:[#allocation7 + $0xa0] sm:$0xff] }
 0x6b0   :  { %v7516_v11 = vpack.c.bf16 %v3298_v12, %v3292_v28  ;;  %8110 = vst [vmem:[#allocation16_spill] sm:$0xff] %v7540_v22  ;;  %v7542_v28 = vpack.c.bf16 %v3333_v21, %v3327_v1  ;;  %v3326_v12 = vld [vmem:[#allocation7 + $0x180] sm:$0xff]  ;;  %8113 = vst [vmem:[#allocation25_spill] sm:$0xff] %v7557_v27  ;;  %v3351_v1 = vld [vmem:[#allocation7 + $0x248] sm:$0xff] }
 0x6b1   :  { %v3357_v21 = vld [vmem:[#allocation7 + $0x278] sm:$0xff]  ;;  %v3358_v53 = vld [vmem:[#allocation7 + $0x280] sm:$0xff] }
 0x6b2   :  { %5551 = vmatpush1.bf16.msra.mxu1 %v7345_v18  ;;  %v3303_v18 = vld [vmem:[#allocation7 + $0xc8] sm:$0xff] }
 0x6b3   :  { %5617 = vmatprep.subr.bf16.mxu1 %v7501_v54  ;;  %v7518_v62 = vpack.c.bf16 %v3309_v42, %v3303_v18  ;;  %v3332_v18 = vld [vmem:[#allocation7 + $0x1b0] sm:$0xff] }
 0x6b4   :  { %v3328_v42 = vld [vmem:[#allocation7 + $0x190] sm:$0xff]  ;;  %v7548_v35 = vpack.c.bf16 %v3332_v18, %v3326_v12  ;;  %v7560_v12 = vpack.c.bf16 %v3344_v24, %v3338_v44  ;;  %v7564_v18 = vpack.c.bf16 %v3346_v6, %v3340_v43  ;;  %v3365_v44 = vld [vmem:[#allocation7 + $0x2b8] sm:$0xff]  ;;  %v3371_v24 = vld [vmem:[#allocation7 + $0x2e8] sm:$0xff]  ;;  %v7576_v43 = vpack.c.bf16 %v3358_v53, %v3352_v30 }
 0x6b5   :  { %3185 = vmatmul.mubr.f32.vlgmr.msra.gmra.mrb[16].mxu1 %v2940_v49  ;;  %v3302_v49 = vld [vmem:[#allocation7 + $0xc0] sm:$0xff]  ;;  %5561 = vmatprep.subr.bf16.mxu0 %v7518_v62  ;;  %v3380_v30 = vld [vmem:[#allocation7 + $0x330] sm:$0xff]  ;;  %v3377_v53 = vld [vmem:[#allocation7 + $0x318] sm:$0xff] }
 0x6b6   :  { %5619 = vmatpush1.bf16.msra.mxu1 %v7504_v2  ;;  %v7522_v5 = vpack.c.bf16 %v3308_v8, %v3302_v49  ;;  %v7545_v49 = vpack.c.bf16 %v3335_v20, %v3329_v50  ;;  %v3334_v8 = vld [vmem:[#allocation7 + $0x1c0] sm:$0xff]  ;;  %v3353_v50 = vld [vmem:[#allocation7 + $0x258] sm:$0xff]  ;;  %v3359_v20 = vld [vmem:[#allocation7 + $0x288] sm:$0xff] }
 0x6b7   :  { %5621 = vmatprep.subr.bf16.mxu1 %v7513_v19  ;;  %v7552_v48 = vpack.c.bf16 %v3334_v8, %v3328_v42  ;;  %v7566_v42 = vpack.c.bf16 %v3357_v21, %v3351_v1  ;;  %v3350_v8 = vld [vmem:[#allocation7 + $0x240] sm:$0xff]  ;;  %v7569_v40 = vpack.c.bf16 %v3359_v20, %v3353_v50  ;;  %v3368_v21 = vld [vmem:[#allocation7 + $0x2d0] sm:$0xff]  ;;  %v7581_v20 = vpack.c.bf16 %v3371_v24, %v3365_v44  ;;  %v3383_v24 = vld [vmem:[#allocation7 + $0x348] sm:$0xff] }
 0x6b8   :  { %5563 = vmatpush1.bf16.msra.mxu0 %v7522_v5  ;;  %8111 = vst [vmem:[#allocation23_spill] sm:$0xff] %v7545_v49  ;;  %v3362_v1 = vld [vmem:[#allocation7 + $0x2a0] sm:$0xff]  ;;  %v3364_v50 = vld [vmem:[#allocation7 + $0x2b0] sm:$0xff] }
 0x6b9   :  { %5565 = vmatprep.subr.bf16.mxu0 %v7530_v38  ;;  %8112 = vst [vmem:[#allocation24_spill] sm:$0xff] %v7552_v48  ;;  %8114 = vst [vmem:[#allocation26_spill] sm:$0xff] %v7581_v20 }
 0x6ba   :  { %5623 = vmatpush1.bf16.msra.mxu1 %v7516_v11 }
 0x6bb   :  { %5625 = vmatprep.subr.bf16.mxu1 %v7524_v10 }
 0x6bc   :  { %5567 = vmatpush1.bf16.msra.mxu0 %v7536_v56 }
 0x6bd   :  { %5569 = vmatprep.subr.bf16.mxu0 %v7542_v28 }
 0x6be   :  { %5627 = vmatpush1.bf16.msra.mxu1 %v7528_v37  ;;  %v3381_v37 = vld [vmem:[#allocation7 + $0x338] sm:$0xff] }
 0x6bf   :  { %5629 = vmatprep.subr.bf16.mxu1 %v7533_v52  ;;  %v3375_v52 = vld [vmem:[#allocation7 + $0x308] sm:$0xff] }
 0x6c0   :  { %5571 = vmatpush1.bf16.msra.mxu0 %v7548_v35 }
 0x6c1   :  { %5573 = vmatprep.subr.bf16.mxu0 %v7554_v23 }
 0x6c2   :  { %5631 = vmatpush1.bf16.msra.mxu1 %v7540_v22  ;;  %v3369_v22 = vld [vmem:[#allocation7 + $0x2d8] sm:$0xff] }
 0x6c3   :  { %5633 = vmatprep.subr.bf16.mxu1 %v7545_v49  ;;  %v3363_v49 = vld [vmem:[#allocation7 + $0x2a8] sm:$0xff] }
 0x6c4   :  { %5575 = vmatpush1.bf16.msra.mxu0 %v7560_v12  ;;  %v7578_v6 = vpack.c.bf16 %v3369_v22, %v3363_v49  ;;  %v7590_v49 = vpack.c.bf16 %v3381_v37, %v3375_v52  ;;  %v3389_v52 = vld [vmem:[#allocation7 + $0x378] sm:$0xff] }
 0x6c5   :  { %5577 = vmatprep.subr.bf16.mxu0 %v7566_v42 }
 0x6c6   :  { %5635 = vmatpush1.bf16.msra.mxu1 %v7552_v48  ;;  %v7572_v48 = vpack.c.bf16 %v3356_v59, %v3350_v8  ;;  %v7584_v8 = vpack.c.bf16 %v3368_v21, %v3362_v1  ;;  %v3374_v59 = vld [vmem:[#allocation7 + $0x300] sm:$0xff]  ;;  %v3376_v1 = vld [vmem:[#allocation7 + $0x310] sm:$0xff] }
 0x6c7   :  { %5637 = vmatprep.subr.bf16.mxu1 %v7557_v27  ;;  %v3370_v27 = vld [vmem:[#allocation7 + $0x2e0] sm:$0xff]  ;;  %v7596_v44 = vpack.c.bf16 %v3380_v30, %v3374_v59  ;;  %v3388_v59 = vld [vmem:[#allocation7 + $0x370] sm:$0xff] }
 0x6c8   :  { %5579 = vmatpush1.bf16.msra.mxu0 %v7572_v48  ;;  %v7588_v22 = vpack.c.bf16 %v3370_v27, %v3364_v50  ;;  %v3382_v21 = vld [vmem:[#allocation7 + $0x340] sm:$0xff]  ;;  %v7598_v27 = vpack.c.bf16 %v3383_v24, %v3377_v53  ;;  %v3395_v50 = vld [vmem:[#allocation7 + $0x3a8] sm:$0xff]  ;;  %v3401_v53 = vld [vmem:[#allocation7 + $0x3d8] sm:$0xff] }
 0x6c9   :  { %5581 = vmatprep.subr.bf16.mxu0 %v7578_v6  ;;  %v7600_v37 = vpack.c.bf16 %v3382_v21, %v3376_v1  ;;  %v3394_v30 = vld [vmem:[#allocation7 + $0x3a0] sm:$0xff]  ;;  %v3407_v24 = vld [vmem:[#allocation7 + $0x408] sm:$0xff]  ;;  %v3400_v1 = vld [vmem:[#allocation7 + $0x3d0] sm:$0xff] }
 0x6ca   :  { %5639 = vmatpush1.bf16.msra.mxu1 %v7564_v18  ;;  %8115 = vst [vmem:[#allocation27_spill] sm:$0xff] %v7588_v22  ;;  %v3406_v21 = vld [vmem:[#allocation7 + $0x400] sm:$0xff] }
 0x6cb   :  { %5641 = vmatprep.subr.bf16.mxu1 %v7569_v40 }
 0x6cc   :  { %5583 = vmatpush1.bf16.msra.mxu0 %v7584_v8 }
 0x6cd   :  { %5585 = vmatprep.subr.bf16.mxu0 %v7590_v49 }
 0x6ce   :  { %5643 = vmatpush1.bf16.msra.mxu1 %v7576_v43 }
 0x6cf   :  { %5645 = vmatprep.subr.bf16.mxu1 %v7581_v20  ;;  %v7608_v20 = vpack.c.bf16 %v3394_v30, %v3388_v59  ;;  %v3412_v59 = vld [vmem:[#allocation7 + $0x430] sm:$0xff]  ;;  %v3418_v30 = vld [vmem:[#allocation7 + $0x460] sm:$0xff] }
 0x6d0   :  { %5587 = vmatpush1.bf16.msra.mxu0 %v7596_v44 }
 0x6d1   :  { %5589 = vmatprep.subr.bf16.mxu0 %v7382_v47  ;;  %v7614_v47 = vpack.c.bf16 %v3407_v24, %v3401_v53  ;;  %v7624_v53 = vpack.c.bf16 %v3418_v30, %v3412_v59  ;;  %v3431_v24 = vld [vmem:[#allocation7 + $0x4c8] sm:$0xff]  ;;  %v3436_v59 = vld [vmem:[#allocation7 + $0x4f0] sm:$0xff]  ;;  %v3442_v30 = vld [vmem:[#allocation7 + $0x520] sm:$0xff] }
 0x6d2   :  { %5647 = vmatpush1.bf16.msra.mxu1 %v7588_v22  ;;  %v7606_v22 = vpack.c.bf16 %v3395_v50, %v3389_v52  ;;  %v7616_v52 = vpack.c.bf16 %v3406_v21, %v3400_v1  ;;  %v3419_v50 = vld [vmem:[#allocation7 + $0x468] sm:$0xff]  ;;  %v3424_v1 = vld [vmem:[#allocation7 + $0x490] sm:$0xff]  ;;  %v3430_v21 = vld [vmem:[#allocation7 + $0x4c0] sm:$0xff] }
 0x6d3   :  { %5649 = vmatprep.subr.bf16.mxu1 %v7598_v27  ;;  %8116 = vst [vmem:[#allocation28_spill] sm:$0xff] %v7614_v47  ;;  %8119 = vst [vmem:[#allocation31_spill] sm:$0xff] %v7624_v53 }
 0x6d4   :  { %5591 = vmatpush1.bf16.msra.mxu0 %v7384_v61  ;;  %8117 = vst [vmem:[#allocation29_spill] sm:$0xff] %v7616_v52  ;;  %v3413_v61 = vld [vmem:[#allocation7 + $0x438] sm:$0xff] }
 0x6d5   :  { %5593 = vmatprep.subr.bf16.mxu0 %v7388_v58  ;;  %v7622_v58 = vpack.c.bf16 %v3419_v50, %v3413_v61  ;;  %v3437_v61 = vld [vmem:[#allocation7 + $0x4f8] sm:$0xff]  ;;  %v7632_v50 = vpack.c.bf16 %v3430_v21, %v3424_v1  ;;  %v3448_v1 = vld [vmem:[#allocation7 + $0x550] sm:$0xff]  ;;  %v3454_v21 = vld [vmem:[#allocation7 + $0x580] sm:$0xff] }
 0x6d6   :  { %5651 = vmatpush1.bf16.msra.mxu1 %v7600_v37 }
 0x6d7   :  { %5653 = vmatprep.subr.bf16.mxu1 %v7606_v22  ;;  %8118 = vst [vmem:[#allocation30_spill] sm:$0xff] %v7622_v58  ;;  %8121 = vst [vmem:[#allocation33_spill] sm:$0xff] %v7632_v50 }
 0x6d8   :  { %5595 = vmatpush1.bf16.msra.mxu0 %v7390_v31  ;;  %v3425_v31 = vld [vmem:[#allocation7 + $0x498] sm:$0xff] }
 0x6d9   :  { %5597 = vmatprep.subr.bf16.mxu0 %v7394_v7  ;;  %v7630_v7 = vpack.c.bf16 %v3431_v24, %v3425_v31  ;;  %v7640_v31 = vpack.c.bf16 %v3442_v30, %v3436_v59  ;;  %v3466_v59 = vld [vmem:[#allocation7 + $0x5e0] sm:$0xff]  ;;  %v8130_v30 = vld [vmem:[#allocation18_spill] sm:$0xff] }
 0x6da   :  { %5655 = vmatpush1.bf16.msra.mxu1 %v7608_v20 }
 0x6db   :  { %5657 = vmatprep.subr.bf16.mxu1 %v7614_v47  ;;  %8120 = vst [vmem:[#allocation32_spill] sm:$0xff] %v7630_v7  ;;  %8123 = vst [vmem:[#allocation35_spill] sm:$0xff] %v7640_v31 }
 0x6dc   :  { %5599 = vmatpush1.bf16.msra.mxu0 %v7396_v13 }
 0x6dd   :  { %5601 = vmatprep.subr.bf16.mxu0 %v7400_v32  ;;  %v3449_v32 = vld [vmem:[#allocation7 + $0x558] sm:$0xff] }
 0x6de   :  { %5659 = vmatpush1.bf16.msra.mxu1 %v7616_v52  ;;  %v3443_v52 = vld [vmem:[#allocation7 + $0x528] sm:$0xff] }
 0x6df   :  { %5661 = vmatprep.subr.bf16.mxu1 %v7622_v58  ;;  %v7636_v13 = vpack.c.bf16 %v3443_v52, %v3437_v61  ;;  %v3455_v58 = vld [vmem:[#allocation7 + $0x588] sm:$0xff]  ;;  %v7648_v52 = vpack.c.bf16 %v3454_v21, %v3448_v1  ;;  %v3460_v61 = vld [vmem:[#allocation7 + $0x5b0] sm:$0xff] }
 0x6e0   :  { %5603 = vmatpush1.bf16.msra.mxu0 %v7402_v46  ;;  %v7643_v24 = vpack.c.bf16 %v3455_v58, %v3449_v32  ;;  %v3461_v46 = vld [vmem:[#allocation7 + $0x5b8] sm:$0xff]  ;;  %v8127_v58 = vld [vmem:[#allocation20_spill] sm:$0xff]  ;;  %v8131_v32 = vld [vmem:[#allocation17_spill] sm:$0xff] }
 0x6e1   :  { %8122 = vst [vmem:[#allocation34_spill] sm:$0xff] %v7636_v13  ;;  %5605 = vmatprep.subr.bf16.mxu0 %v7405_v25  ;;  %8125 = vst [vmem:[#allocation36_spill] sm:$0xff] %v7648_v52 }
 0x6e2   :  { %5663 = vmatpush1.bf16.msra.mxu1 %v7624_v53  ;;  %8124 = vst [vmem:[#allocation21_spill] sm:$0xff] %v7643_v24 }
 0x6e3   :  { %5665 = vmatprep.subr.bf16.mxu1 %v7630_v7  ;;  %v3467_v7 = vld [vmem:[#allocation7 + $0x5e8] sm:$0xff] }
 0x6e4   :  { %5607 = vmatpush1.bf16.msra.mxu0 %v7408_v9  ;;  %v7651_v25 = vpack.c.bf16 %v3467_v7, %v3461_v46  ;;  %v7656_v9 = vpack.c.bf16 %v3466_v59, %v3460_v61  ;;  %v8132_v46 = vld [vmem:[#allocation19_spill] sm:$0xff] }
 0x6e5   :  { %5609 = vmatprep.subr.bf16.mxu0 %v7411_v16  ;;  %v8129_v16 = vld [vmem:[#allocation22_spill] sm:$0xff] }
 0x6e6   :  { %5667 = vmatpush1.bf16.msra.mxu1 %v7632_v50  ;;  %8126 = vst [vmem:[#allocation37_spill] sm:$0xff] %v7651_v25  ;;  %8128 = vst [vmem:[#allocation20_spill] sm:$0xff] %v7656_v9  ;;  %v2742_v50 = vld [vmem:[%s2741_s2] sm:$0x3f] }
 0x6e7   :  { %5669 = vmatprep.subr.bf16.mxu1 %v7636_v13 }
 0x6e8   :  { %5611 = vmatpush1.bf16.msra.mxu0 %v7414_v14  ;;  %v2935_v14 = vld [vmem:[%s7904_s4] sm:$0x3f] }
 0x6e9   :  { %5613 = vmatprep.subr.bf16.mxu0 %v8127_v58  ;;  %v2951_v7 = vrot.slane %v2935_v14, %v8004_v34  ;;  %v2959_v1 = vrot.slane %v2935_v14, %v8131_v32  ;;  %v2955_v21 = vrot.slane %v2935_v14, %v8005_v60  ;;  %v2963_v61 = vrot.slane %v2935_v14, %v8132_v46 }
 0x6ea   :  { %5671 = vmatpush1.bf16.msra.mxu1 %v7640_v31 }
 0x6eb   :  { %5673 = vmatprep.subr.bf16.mxu1 %v7643_v24 }
 0x6ec   :  { %5615 = vmatpush1.bf16.msra.mxu0 %v8129_v16 }
 0x6ed   :  { %5681 = vmatprep.subr.bf16.mxu0 %v8130_v30 }
 0x6ee   :  { %5675 = vmatpush1.bf16.msra.mxu1 %v7648_v52 }
 0x6ef   :  { %5677 = vmatprep.subr.bf16.mxu1 %v7651_v25 }
 0x6f2   :  { %5679 = vmatpush1.bf16.msra.mxu1 %v7656_v9 }
 0x6f3   :  { %5745 = vmatprep.subr.bf16.mxu1 %v7497_v55 }
 0x748   :  { %v3044_v59 = vpop.f32.mrb[14].mxu1  ;;  %v3115_v58 = vpop.f32.mrb[16].mxu0 }
 0x749   :  { %v3045_v16 = vadd.f32 %v3044_v59, %v2951_v7  ;;  %v3116_v30 = vadd.f32 %v3115_v58, %v2959_v1  ;;  %v3046_v25 = vpop.f32.mrb[15].mxu1  ;;  %v3117_v9 = vpop.f32.mrb[17].mxu0  ;;  %v3217_v7 = vrot.slane %v2742_v50, 2 }
 0x74a   :  { %v3047_v52 = vadd.f32 %v3046_v25, %v2955_v21  ;;  %v3118_v55 = vadd.f32 %v3117_v9, %v2963_v61  ;;  %v2967_v61 = vrot.slane %v2935_v14, %v8034_v63 }
 0x74c   :  { %v3193_v24 = vcombine.low %v3045_v16, %v3047_v52  ;;  %v3221_v31 = vcombine.low %v3116_v30, %v3118_v55  ;;  %v3263_v30 = vrot.slane %v2742_v50, 4 }
 0x74e   :  { %v3200_v13 = vrot.slane %v3193_v24, %v6543_v33  ;;  %v3228_v46 = vrot.slane %v3221_v31, %v6543_v33  ;;  %v2971_v24 = vrot.slane %v2935_v14, %v8058_v26 }
 0x750   :  { %v3207_v32 = vrot.slane %v3200_v13, %v6543_v33  ;;  %v3235_v1 = vrot.slane %v3228_v46, %v6543_v33 }
 0x752   :  { %v3209_v53 = vadd.f32 %v3207_v32, %v2742_v50  ;;  %v3237_v25 = vadd.f32 %v3235_v1, %v3217_v7  ;;  %v3337_v50 = vld [vmem:[#allocation7 + $0x1d8] sm:$0xff] }
 0x754   :  { %v4392_v47 = vmul.f32 -1.442695, %v3209_v53  ;;  %v4393_v9 = vmul.f32 -1.442695, %v3237_v25 }
 0x756   :  { %5995 = vpow2.f32 %v4392_v47 }
 0x757   :  { %5997 = vpow2.f32 %v4393_v9 }
 0x760   :  { %v5996_v52 = vpop.eup %5995 }
 0x761   :  { %v3213_v21 = vadd.f32 1.0, %v5996_v52  ;;  %v5998_v31 = vpop.eup %5997 }
 0x762   :  { %v3241_v16 = vadd.f32 1.0, %v5998_v31  ;;  %v3373_v31 = vld [vmem:[#allocation7 + $0x2f8] sm:$0xff] }
 0x763   :  { %5999 = vrcp.f32 %v3213_v21 }
 0x764   :  { %6001 = vrcp.f32 %v3241_v16  ;;  %v3372_v16 = vld [vmem:[#allocation7 + $0x2f0] sm:$0xff] }
 0x76d   :  { %v6000_v55 = vpop.eup %5999 }
 0x76e   :  { %v6002_v25 = vpop.eup %6001 }
 0x76f   :  { %v3267_v14 = vsub.f32 1.0, %v6002_v25  ;;  %v3269_v21 = vmul.f32 %v6002_v25, %v7443_v45  ;;  %v3331_v45 = vld [vmem:[#allocation7 + $0x1a8] sm:$0xff]  ;;  %v3390_v25 = vld [vmem:[#allocation7 + $0x380] sm:$0xff] }
 0x788   :  { %v3186_v13 = vpop.f32.mrb[16].mxu1 }
 0x789   :  { %v3187_v59 = vadd.f32 %v3186_v13, %v2967_v61  ;;  %v3188_v32 = vpop.f32.mrb[17].mxu1 }
 0x78a   :  { %v3189_v58 = vadd.f32 %v3188_v32, %v2971_v24  ;;  %v3360_v32 = vld [vmem:[#allocation7 + $0x290] sm:$0xff] }
 0x78c   :  { %v3246_v53 = vcombine.low %v3187_v59, %v3189_v58  ;;  %v3361_v59 = vld [vmem:[#allocation7 + $0x298] sm:$0xff]  ;;  %v3367_v58 = vld [vmem:[#allocation7 + $0x2c8] sm:$0xff] }
 0x78e   :  { %v3253_v46 = vrot.slane %v3246_v53, %v6543_v33  ;;  %v3366_v53 = vld [vmem:[#allocation7 + $0x2c0] sm:$0xff] }
 0x790   :  { %v3260_v47 = vrot.slane %v3253_v46, %v6543_v33  ;;  %v3379_v46 = vld [vmem:[#allocation7 + $0x328] sm:$0xff] }
 0x792   :  { %v3262_v7 = vmul.f32 %v6000_v55, %v3260_v47  ;;  %v3385_v47 = vld [vmem:[#allocation7 + $0x358] sm:$0xff]  ;;  %v3384_v55 = vld [vmem:[#allocation7 + $0x350] sm:$0xff] }
 0x794   :  { %v3265_v1 = vadd.f32 %v3263_v30, %v3262_v7  ;;  %v3378_v30 = vld [vmem:[#allocation7 + $0x320] sm:$0xff]  ;;  %v3391_v7 = vld [vmem:[#allocation7 + $0x388] sm:$0xff] }
 0x796   :  { %6003 = vtanh.f32 %v3265_v1  ;;  %v3397_v1 = vld [vmem:[#allocation7 + $0x3b8] sm:$0xff] }
 0x7a0   :  { %v6004_v9 = vpop.eup %6003 }
 0x7a1   :  { %v3268_v52 = vmul.f32 %v6004_v9, %v3267_v14  ;;  %v3396_v14 = vld [vmem:[#allocation7 + $0x3b0] sm:$0xff]  ;;  %v3403_v9 = vld [vmem:[#allocation7 + $0x3e8] sm:$0xff] }
 0x7a3   :  { %v7679_v61 = vadd.f32 %v3269_v21, %v3268_v52  ;;  %v3409_v52 = vld [vmem:[#allocation7 + $0x418] sm:$0xff]  ;;  %v3402_v21 = vld [vmem:[#allocation7 + $0x3e0] sm:$0xff] }
 0x7a5   :  { %v3479_v24 = vrot.slane %v7679_v61, %v8005_v60  ;;  %v7685_v13 = vrot.slane %v7679_v61, %v8004_v34  ;;  %3272 = vst.msk [vmem:[#allocation9 + $0x5] ss:$8 sm:$0x3] %vm6561_vm0, %v7679_v61 }
 0x7a7   :  { %3577 = vmatprep.mubr.f32.mxu0 %v3479_v24  ;;  %3648 = vmatprep.mubr.f32.mxu1 %v3479_v24 }
 0x7a8   :  { %3578 = vmatmul.mubr.f32.vlgmr.msra.gmra.mrb[18].mxu0 %v7685_v13  ;;  %3649 = vmatmul.mubr.f32.vlgmr.msra.gmra.mrb[18].mxu1 %v7685_v13 }
 0x7a9   :  { %5683 = vmatpush1.bf16.msra.mxu0 %v7449_v4  ;;  %3719 = vmatprep.mubr.f32.mxu0 %v3479_v24  ;;  %v7702_v4 = vpack.c.bf16 %v3337_v50, %v3331_v45  ;;  %v3408_v24 = vld [vmem:[#allocation7 + $0x410] sm:$0xff]  ;;  %v3415_v45 = vld [vmem:[#allocation7 + $0x448] sm:$0xff]  ;;  %v3421_v50 = vld [vmem:[#allocation7 + $0x478] sm:$0xff] }
 0x7aa   :  { %5685 = vmatprep.subr.bf16.mxu0 %v7454_v17  ;;  %5747 = vmatpush1.bf16.msra.mxu1 %v7499_v29  ;;  %v3330_v17 = vld [vmem:[#allocation7 + $0x1a0] sm:$0xff]  ;;  %v3336_v29 = vld [vmem:[#allocation7 + $0x1d0] sm:$0xff] }
 0x7ab   :  { %5749 = vmatprep.subr.bf16.mxu1 %v7508_v51  ;;  %v3343_v51 = vld [vmem:[#allocation7 + $0x208] sm:$0xff] }
 0x7ad   :  { %5687 = vmatpush1.bf16.msra.mxu0 %v7457_v36  ;;  %v3349_v36 = vld [vmem:[#allocation7 + $0x238] sm:$0xff] }
 0x7ae   :  { %5689 = vmatprep.subr.bf16.mxu0 %v7460_v15  ;;  %5751 = vmatpush1.bf16.msra.mxu1 %v7510_v0  ;;  %v7707_v15 = vpack.c.bf16 %v3336_v29, %v3330_v17  ;;  %v7710_v0 = vpack.c.bf16 %v3349_v36, %v3343_v51  ;;  %v3414_v17 = vld [vmem:[#allocation7 + $0x440] sm:$0xff]  ;;  %v3420_v29 = vld [vmem:[#allocation7 + $0x470] sm:$0xff]  ;;  %v3427_v51 = vld [vmem:[#allocation7 + $0x4a8] sm:$0xff] }
 0x7af   :  { %5753 = vmatprep.subr.bf16.mxu1 %v7518_v62  ;;  %v3355_v62 = vld [vmem:[#allocation7 + $0x268] sm:$0xff]  ;;  %v3433_v36 = vld [vmem:[#allocation7 + $0x4d8] sm:$0xff] }
 0x7b1   :  { %5691 = vmatpush1.bf16.msra.mxu0 %v7463_v41  ;;  %v3342_v41 = vld [vmem:[#allocation7 + $0x200] sm:$0xff] }
 0x7b2   :  { %5693 = vmatprep.subr.bf16.mxu0 %v7466_v3  ;;  %5755 = vmatpush1.bf16.msra.mxu1 %v7522_v5  ;;  %v3348_v3 = vld [vmem:[#allocation7 + $0x230] sm:$0xff] }
 0x7b3   :  { %5757 = vmatprep.subr.bf16.mxu1 %v7530_v38  ;;  %v7715_v5 = vpack.c.bf16 %v3348_v3, %v3342_v41  ;;  %v3354_v38 = vld [vmem:[#allocation7 + $0x260] sm:$0xff]  ;;  %v7760_v41 = vpack.c.bf16 %v3420_v29, %v3414_v17  ;;  %v8136_v29 = vld [vmem:[#allocation23_spill] sm:$0xff] }
 0x7b4   :  { %v3426_v3 = vld [vmem:[#allocation7 + $0x4a0] sm:$0xff] }
 0x7b5   :  { %5695 = vmatpush1.bf16.msra.mxu0 %v7469_v57  ;;  %v7718_v57 = vpack.c.bf16 %v3361_v59, %v3355_v62  ;;  %v3432_v62 = vld [vmem:[#allocation7 + $0x4d0] sm:$0xff]  ;;  %v3439_v59 = vld [vmem:[#allocation7 + $0x508] sm:$0xff]  ;;  %v8135_v17 = vld [vmem:[#allocation16_spill] sm:$0xff] }
 0x7b6   :  { %5697 = vmatprep.subr.bf16.mxu0 %v7702_v4  ;;  %5759 = vmatpush1.bf16.msra.mxu1 %v7536_v56  ;;  %v7723_v56 = vpack.c.bf16 %v3360_v32, %v3354_v38  ;;  %v3445_v38 = vld [vmem:[#allocation7 + $0x538] sm:$0xff]  ;;  %v7766_v32 = vpack.c.bf16 %v3432_v62, %v3426_v3  ;;  %v8152_v3 = vld [vmem:[#allocation20_spill] sm:$0xff]  ;;  %v3922_v62 = vld [vmem:[#allocation7 + $0x368] sm:$0xff] }
 0x7b7   :  { %5761 = vmatprep.subr.bf16.mxu1 %v7542_v28  ;;  %v7726_v28 = vpack.c.bf16 %v3373_v31, %v3367_v58  ;;  %v7769_v58 = vpack.c.bf16 %v3445_v38, %v3439_v59  ;;  %v3438_v31 = vld [vmem:[#allocation7 + $0x500] sm:$0xff]  ;;  %v3928_v59 = vld [vmem:[#allocation7 + $0x398] sm:$0xff] }
 0x7b8   :  { %v5780_v38 = vpack.c.bf16 %v3928_v59, %v3922_v62  ;;  %v3981_v62 = vld [vmem:[#allocation7 + $0x540] sm:$0xff]  ;;  %v3987_v59 = vld [vmem:[#allocation7 + $0x570] sm:$0xff] }
 0x7b9   :  { %5699 = vmatpush1.bf16.msra.mxu0 %v7707_v15 }
 0x7ba   :  { %5701 = vmatprep.subr.bf16.mxu0 %v7710_v0  ;;  %5763 = vmatpush1.bf16.msra.mxu1 %v7548_v35  ;;  %v7731_v35 = vpack.c.bf16 %v3372_v16, %v3366_v53  ;;  %v3444_v53 = vld [vmem:[#allocation7 + $0x530] sm:$0xff]  ;;  %v3451_v16 = vld [vmem:[#allocation7 + $0x568] sm:$0xff] }
 0x7bb   :  { %5765 = vmatprep.subr.bf16.mxu1 %v7554_v23  ;;  %v7734_v23 = vpack.c.bf16 %v3385_v47, %v3379_v46  ;;  %v3457_v46 = vld [vmem:[#allocation7 + $0x598] sm:$0xff]  ;;  %v7772_v47 = vpack.c.bf16 %v3444_v53, %v3438_v31  ;;  %v3921_v31 = vld [vmem:[#allocation7 + $0x360] sm:$0xff]  ;;  %v3927_v53 = vld [vmem:[#allocation7 + $0x390] sm:$0xff] }
 0x7bd   :  { %5703 = vmatpush1.bf16.msra.mxu0 %v7715_v5 }
 0x7be   :  { %5705 = vmatprep.subr.bf16.mxu0 %v7718_v57  ;;  %5767 = vmatpush1.bf16.msra.mxu1 %v7560_v12  ;;  %v7739_v12 = vpack.c.bf16 %v3384_v55, %v3378_v30  ;;  %v7775_v30 = vpack.c.bf16 %v3457_v46, %v3451_v16  ;;  %v3450_v55 = vld [vmem:[#allocation7 + $0x560] sm:$0xff]  ;;  %v5782_v16 = vpack.c.bf16 %v3927_v53, %v3921_v31  ;;  %v3934_v46 = vld [vmem:[#allocation7 + $0x3c8] sm:$0xff]  ;;  %v4000_v31 = vld [vmem:[#allocation7 + $0x5d8] sm:$0xff] }
 0x7bf   :  { %5769 = vmatprep.subr.bf16.mxu1 %v7566_v42  ;;  %v7742_v42 = vpack.c.bf16 %v3397_v1, %v3391_v7  ;;  %v3456_v7 = vld [vmem:[#allocation7 + $0x590] sm:$0xff]  ;;  %v3463_v1 = vld [vmem:[#allocation7 + $0x5c8] sm:$0xff]  ;;  %v5802_v53 = vpack.c.bf16 %v3987_v59, %v3981_v62 }
 0x7c1   :  { %5707 = vmatpush1.bf16.msra.mxu0 %v7723_v56 }
 0x7c2   :  { %5709 = vmatprep.subr.bf16.mxu0 %v7726_v28  ;;  %5771 = vmatpush1.bf16.msra.mxu1 %v7572_v48  ;;  %v7747_v48 = vpack.c.bf16 %v3396_v14, %v3390_v25  ;;  %v3469_v25 = vld [vmem:[#allocation7 + $0x5f8] sm:$0xff]  ;;  %v7778_v14 = vpack.c.bf16 %v3456_v7, %v3450_v55 }
 0x7c3   :  { %5773 = vmatprep.subr.bf16.mxu1 %v7578_v6  ;;  %v7750_v6 = vpack.c.bf16 %v3409_v52, %v3403_v9  ;;  %v7781_v9 = vpack.c.bf16 %v3469_v25, %v3463_v1  ;;  %v3462_v52 = vld [vmem:[#allocation7 + $0x5c0] sm:$0xff]  ;;  %v3940_v55 = vld [vmem:[#allocation7 + $0x3f8] sm:$0xff]  ;;  %v3939_v25 = vld [vmem:[#allocation7 + $0x3f0] sm:$0xff] }
 0x7c4   :  { %v5784_v7 = vpack.c.bf16 %v3940_v55, %v3934_v46  ;;  %v3933_v1 = vld [vmem:[#allocation7 + $0x3c0] sm:$0xff]  ;;  %v3999_v55 = vld [vmem:[#allocation7 + $0x5d0] sm:$0xff] }
 0x7c5   :  { %5711 = vmatpush1.bf16.msra.mxu0 %v7731_v35  ;;  %v3993_v46 = vld [vmem:[#allocation7 + $0x5a0] sm:$0xff] }
 0x7c6   :  { %5713 = vmatprep.subr.bf16.mxu0 %v7734_v23  ;;  %5775 = vmatpush1.bf16.msra.mxu1 %v7584_v8  ;;  %v7754_v8 = vpack.c.bf16 %v3408_v24, %v3402_v21  ;;  %v3468_v21 = vld [vmem:[#allocation7 + $0x5f0] sm:$0xff] }
 0x7c7   :  { %5777 = vmatprep.subr.bf16.mxu1 %v7590_v49  ;;  %v7757_v49 = vpack.c.bf16 %v3421_v50, %v3415_v45  ;;  %v7784_v24 = vpack.c.bf16 %v3468_v21, %v3462_v52  ;;  %v8133_v45 = vld [vmem:[#allocation15_spill] sm:$0xff]  ;;  %v8134_v50 = vld [vmem:[#allocation14_spill] sm:$0xff]  ;;  %v5786_v52 = vpack.c.bf16 %v3939_v25, %v3933_v1  ;;  %v3946_v21 = vld [vmem:[#allocation7 + $0x428] sm:$0xff] }
 0x7c8   :  { %v3818_v1 = vld [vmem:[#allocation7 + $0x28] sm:$0xff]  ;;  %v3824_v25 = vld [vmem:[#allocation7 + $0x58] sm:$0xff] }
 0x7c9   :  { %5715 = vmatpush1.bf16.msra.mxu0 %v7739_v12 }
 0x7ca   :  { %5717 = vmatprep.subr.bf16.mxu0 %v7742_v42  ;;  %5779 = vmatpush1.bf16.msra.mxu1 %v7596_v44  ;;  %v7763_v44 = vpack.c.bf16 %v3433_v36, %v3427_v51  ;;  %v8137_v51 = vld [vmem:[#allocation24_spill] sm:$0xff]  ;;  %v8147_v36 = vld [vmem:[#allocation34_spill] sm:$0xff] }
 0x7cb   :  { %5781 = vmatprep.subr.bf16.mxu1 %v5780_v38  ;;  %v3994_v38 = vld [vmem:[#allocation7 + $0x5a8] sm:$0xff] }
 0x7cd   :  { %5719 = vmatpush1.bf16.msra.mxu0 %v7747_v48 }
 0x7ce   :  { %5721 = vmatprep.subr.bf16.mxu0 %v7750_v6  ;;  %5783 = vmatpush1.bf16.msra.mxu1 %v5782_v16  ;;  %v5804_v16 = vpack.c.bf16 %v4000_v31, %v3994_v38 }
 0x7cf   :  { %5785 = vmatprep.subr.bf16.mxu1 %v5784_v7  ;;  %v5806_v7 = vpack.c.bf16 %v3999_v55, %v3993_v46 }
 0x7d1   :  { %5723 = vmatpush1.bf16.msra.mxu0 %v7754_v8 }
 0x7d2   :  { %5725 = vmatprep.subr.bf16.mxu0 %v7757_v49  ;;  %5787 = vmatpush1.bf16.msra.mxu1 %v5786_v52  ;;  %v5872_v52 = vpack.c.bf16 %v3824_v25, %v3818_v1 }
 0x7d5   :  { %5727 = vmatpush1.bf16.msra.mxu0 %v7760_v41 }
 0x7d6   :  { %5729 = vmatprep.subr.bf16.mxu0 %v7763_v44 }
 0x7d9   :  { %5731 = vmatpush1.bf16.msra.mxu0 %v7766_v32 }
 0x7da   :  { %5733 = vmatprep.subr.bf16.mxu0 %v7769_v58 }
 0x7dd   :  { %5735 = vmatpush1.bf16.msra.mxu0 %v7772_v47 }
 0x7de   :  { %5737 = vmatprep.subr.bf16.mxu0 %v7775_v30 }
 0x7e1   :  { %5739 = vmatpush1.bf16.msra.mxu0 %v7778_v14 }
 0x7e2   :  { %5741 = vmatprep.subr.bf16.mxu0 %v7781_v9 }
 0x7e5   :  { %5743 = vmatpush1.bf16.msra.mxu0 %v7784_v24 }
 0x7e6   :  { %5809 = vmatprep.subr.bf16.mxu0 %v7501_v54  ;;  %v8138_v54 = vld [vmem:[#allocation25_spill] sm:$0xff] }
 0x7e8   :  { %3720 = vmatmul.mubr.f32.vlgmr.msra.gmra.mrb[20].mxu0 %v7685_v13  ;;  %v8146_v13 = vld [vmem:[#allocation33_spill] sm:$0xff] }
 0x7e9   :  { %5811 = vmatpush1.bf16.msra.mxu0 %v7504_v2  ;;  %v8139_v2 = vld [vmem:[#allocation26_spill] sm:$0xff] }
 0x7ea   :  { %5813 = vmatprep.subr.bf16.mxu0 %v7513_v19  ;;  %v8140_v19 = vld [vmem:[#allocation27_spill] sm:$0xff] }
 0x7ed   :  { %5815 = vmatpush1.bf16.msra.mxu0 %v7516_v11  ;;  %v8141_v11 = vld [vmem:[#allocation28_spill] sm:$0xff] }
 0x7ee   :  { %5817 = vmatprep.subr.bf16.mxu0 %v7524_v10  ;;  %v8142_v10 = vld [vmem:[#allocation29_spill] sm:$0xff] }
 0x7f1   :  { %5819 = vmatpush1.bf16.msra.mxu0 %v8133_v45  ;;  %v3952_v45 = vld [vmem:[#allocation7 + $0x458] sm:$0xff] }
 0x7f2   :  { %5821 = vmatprep.subr.bf16.mxu0 %v8134_v50  ;;  %v5788_v50 = vpack.c.bf16 %v3952_v45, %v3946_v21  ;;  %v3470_v21 = vld [vmem:[%s7904_s4] sm:$0x3f] }
 0x7f3   :  { %v3486_v45 = vrot.slane %v3470_v21, %v8004_v34  ;;  %v3506_v1 = vrot.slane %v3470_v21, %v8058_v26 }
 0x7f4   :  { %5789 = vmatprep.subr.bf16.mxu1 %v5788_v50  ;;  %v8153_v50 = vld [vmem:[#allocation17_spill] sm:$0xff] }
 0x7f5   :  { %5823 = vmatpush1.bf16.msra.mxu0 %v8135_v17  ;;  %v3945_v17 = vld [vmem:[#allocation7 + $0x420] sm:$0xff] }
 0x7f6   :  { %5825 = vmatprep.subr.bf16.mxu0 %v8136_v29  ;;  %v3951_v29 = vld [vmem:[#allocation7 + $0x450] sm:$0xff] }
 0x7f9   :  { %5827 = vmatpush1.bf16.msra.mxu0 %v8137_v51  ;;  %v5790_v51 = vpack.c.bf16 %v3951_v29, %v3945_v17  ;;  %v3494_v17 = vrot.slane %v3470_v21, %v8153_v50  ;;  %v3490_v29 = vrot.slane %v3470_v21, %v8005_v60 }
 0x7fa   :  { %5829 = vmatprep.subr.bf16.mxu0 %v8138_v54  ;;  %v3958_v54 = vld [vmem:[#allocation7 + $0x488] sm:$0xff] }
 0x7fb   :  { %5791 = vmatpush1.bf16.msra.mxu1 %v5790_v51  ;;  %v8154_v51 = vld [vmem:[#allocation19_spill] sm:$0xff] }
 0x7fd   :  { %5831 = vmatpush1.bf16.msra.mxu0 %v7564_v18  ;;  %v8143_v18 = vld [vmem:[#allocation30_spill] sm:$0xff] }
 0x7fe   :  { %5833 = vmatprep.subr.bf16.mxu0 %v7569_v40  ;;  %v8144_v40 = vld [vmem:[#allocation31_spill] sm:$0xff] }
 0x801   :  { %5835 = vmatpush1.bf16.msra.mxu0 %v7576_v43  ;;  %v8145_v43 = vld [vmem:[#allocation32_spill] sm:$0xff] }
 0x802   :  { %5837 = vmatprep.subr.bf16.mxu0 %v8139_v2  ;;  %v3964_v2 = vld [vmem:[#allocation7 + $0x4b8] sm:$0xff] }
 0x805   :  { %5839 = vmatpush1.bf16.msra.mxu0 %v8140_v19  ;;  %v5792_v19 = vpack.c.bf16 %v3964_v2, %v3958_v54  ;;  %v3498_v54 = vrot.slane %v3470_v21, %v8154_v51 }
 0x806   :  { %5841 = vmatprep.subr.bf16.mxu0 %v7598_v27  ;;  %v8148_v27 = vld [vmem:[#allocation35_spill] sm:$0xff] }
 0x807   :  { %5793 = vmatprep.subr.bf16.mxu1 %v5792_v19 }
 0x809   :  { %5843 = vmatpush1.bf16.msra.mxu0 %v7600_v37  ;;  %v8149_v37 = vld [vmem:[#allocation21_spill] sm:$0xff] }
 0x80a   :  { %5845 = vmatprep.subr.bf16.mxu0 %v7606_v22  ;;  %v8150_v22 = vld [vmem:[#allocation36_spill] sm:$0xff] }
 0x80d   :  { %5847 = vmatpush1.bf16.msra.mxu0 %v7608_v20  ;;  %v8151_v20 = vld [vmem:[#allocation37_spill] sm:$0xff] }
 0x80e   :  { %5849 = vmatprep.subr.bf16.mxu0 %v8141_v11  ;;  %v3957_v11 = vld [vmem:[#allocation7 + $0x480] sm:$0xff] }
 0x811   :  { %5851 = vmatpush1.bf16.msra.mxu0 %v8142_v10  ;;  %v3963_v10 = vld [vmem:[#allocation7 + $0x4b0] sm:$0xff] }
 0x812   :  { %5853 = vmatprep.subr.bf16.mxu0 %v8143_v18  ;;  %v5794_v18 = vpack.c.bf16 %v3963_v10, %v3957_v11 }
 0x814   :  { %5795 = vmatpush1.bf16.msra.mxu1 %v5794_v18 }
 0x815   :  { %5855 = vmatpush1.bf16.msra.mxu0 %v8144_v40  ;;  %v3970_v40 = vld [vmem:[#allocation7 + $0x4e8] sm:$0xff] }
 0x816   :  { %5857 = vmatprep.subr.bf16.mxu0 %v8145_v43  ;;  %v3976_v43 = vld [vmem:[#allocation7 + $0x518] sm:$0xff] }
 0x819   :  { %5859 = vmatpush1.bf16.msra.mxu0 %v8146_v13  ;;  %v3969_v13 = vld [vmem:[#allocation7 + $0x4e0] sm:$0xff] }
 0x81a   :  { %5861 = vmatprep.subr.bf16.mxu0 %v8147_v36  ;;  %v5796_v36 = vpack.c.bf16 %v3976_v43, %v3970_v40 }
 0x81c   :  { %5797 = vmatprep.subr.bf16.mxu1 %v5796_v36 }
 0x81d   :  { %5863 = vmatpush1.bf16.msra.mxu0 %v8148_v27  ;;  %v3975_v27 = vld [vmem:[#allocation7 + $0x510] sm:$0xff] }
 0x81e   :  { %5865 = vmatprep.subr.bf16.mxu0 %v8149_v37  ;;  %v3982_v37 = vld [vmem:[#allocation7 + $0x548] sm:$0xff] }
 0x821   :  { %5867 = vmatpush1.bf16.msra.mxu0 %v8150_v22  ;;  %v3988_v22 = vld [vmem:[#allocation7 + $0x578] sm:$0xff] }
 0x822   :  { %5869 = vmatprep.subr.bf16.mxu0 %v8151_v20  ;;  %v5798_v20 = vpack.c.bf16 %v3975_v27, %v3969_v13 }
 0x824   :  { %5799 = vmatpush1.bf16.msra.mxu1 %v5798_v20  ;;  %v3277_v20 = vld [vmem:[%s3276_s9] sm:$0x3f] }
 0x825   :  { %5871 = vmatpush1.bf16.msra.mxu0 %v8152_v3  ;;  %v5800_v3 = vpack.c.bf16 %v3988_v22, %v3982_v37  ;;  %v3752_v38 = vrot.slane %v3277_v20, 2 }
 0x827   :  { %5801 = vmatprep.subr.bf16.mxu1 %v5800_v3 }
 0x828   :  { %5803 = vmatpush1.bf16.msra.mxu1 %v5802_v53 }
 0x829   :  { %5805 = vmatprep.subr.bf16.mxu1 %v5804_v16 }
 0x82c   :  { %5807 = vmatpush1.bf16.msra.mxu1 %v5806_v7  ;;  %v3502_v7 = vrot.slane %v3470_v21, %v8034_v63 }
 0x82d   :  { %5873 = vmatprep.subr.bf16.mxu1 %v5872_v52 }
 0x87b   :  { %v3579_v2 = vpop.f32.mrb[18].mxu0  ;;  %v3650_v19 = vpop.f32.mrb[18].mxu1 }
 0x87c   :  { %v3580_v11 = vadd.f32 %v3579_v2, %v3486_v45  ;;  %v3651_v10 = vadd.f32 %v3650_v19, %v3494_v17  ;;  %v3581_v18 = vpop.f32.mrb[19].mxu0  ;;  %v3652_v40 = vpop.f32.mrb[19].mxu1 }
 0x87d   :  { %v3582_v43 = vadd.f32 %v3581_v18, %v3490_v29  ;;  %v3653_v13 = vadd.f32 %v3652_v40, %v3498_v54 }
 0x87f   :  { %v3728_v36 = vcombine.low %v3580_v11, %v3582_v43  ;;  %v3756_v27 = vcombine.low %v3651_v10, %v3653_v13  ;;  %v3798_v10 = vrot.slane %v3277_v20, 4 }
 0x881   :  { %v3735_v37 = vrot.slane %v3728_v36, %v6543_v33  ;;  %v3763_v62 = vrot.slane %v3756_v27, %v6543_v33 }
 0x883   :  { %v3742_v22 = vrot.slane %v3735_v37, %v6543_v33  ;;  %v3770_v31 = vrot.slane %v3763_v62, %v6543_v33 }
 0x885   :  { %v3744_v3 = vadd.f32 %v3742_v22, %v3277_v20  ;;  %v3772_v53 = vadd.f32 %v3770_v31, %v3752_v38  ;;  %v3817_v22 = vld [vmem:[#allocation7 + $0x20] sm:$0xff]  ;;  %v3836_v38 = vld [vmem:[#allocation7 + $0xb8] sm:$0xff] }
 0x887   :  { %v4395_v59 = vmul.f32 -1.442695, %v3744_v3  ;;  %v4396_v16 = vmul.f32 -1.442695, %v3772_v53  ;;  %v3823_v3 = vld [vmem:[#allocation7 + $0x50] sm:$0xff] }
 0x888   :  { %v5874_v53 = vpack.c.bf16 %v3823_v3, %v3817_v22 }
 0x889   :  { %6005 = vpow2.f32 %v4395_v59  ;;  %v3830_v59 = vld [vmem:[#allocation7 + $0x88] sm:$0xff] }
 0x88a   :  { %6007 = vpow2.f32 %v4396_v16  ;;  %v5876_v16 = vpack.c.bf16 %v3836_v38, %v3830_v59 }
 0x893   :  { %v6006_v46 = vpop.eup %6005 }
 0x894   :  { %v3748_v55 = vadd.f32 1.0, %v6006_v46  ;;  %v6008_v29 = vpop.eup %6007  ;;  %v3829_v46 = vld [vmem:[#allocation7 + $0x80] sm:$0xff] }
 0x895   :  { %v3776_v2 = vadd.f32 1.0, %v6008_v29  ;;  %v3860_v29 = vld [vmem:[#allocation7 + $0x178] sm:$0xff] }
 0x896   :  { %6009 = vrcp.f32 %v3748_v55  ;;  %v3842_v55 = vld [vmem:[#allocation7 + $0xe8] sm:$0xff] }
 0x897   :  { %6011 = vrcp.f32 %v3776_v2 }
 0x8a0   :  { %v6010_v18 = vpop.eup %6009 }
 0x8a1   :  { %v6012_v13 = vpop.eup %6011 }
 0x8a2   :  { %v3802_v21 = vsub.f32 1.0, %v6012_v13  ;;  %v3804_v37 = vmul.f32 %v6012_v13, %v7679_v61  ;;  %v3835_v61 = vld [vmem:[#allocation7 + $0xb0] sm:$0xff] }
 0x8bb   :  { %v3721_v25 = vpop.f32.mrb[20].mxu0 }
 0x8bc   :  { %v3722_v52 = vadd.f32 %v3721_v25, %v3502_v7  ;;  %v3723_v45 = vpop.f32.mrb[21].mxu0  ;;  %v3848_v7 = vld [vmem:[#allocation7 + $0x118] sm:$0xff] }
 0x8bd   :  { %v3724_v17 = vadd.f32 %v3723_v45, %v3506_v1  ;;  %v5878_v1 = vpack.c.bf16 %v3835_v61, %v3829_v46  ;;  %v5880_v25 = vpack.c.bf16 %v3848_v7, %v3842_v55  ;;  %v3847_v45 = vld [vmem:[#allocation7 + $0x110] sm:$0xff] }
 0x8bf   :  { %v3781_v54 = vcombine.low %v3722_v52, %v3724_v17  ;;  %v3841_v52 = vld [vmem:[#allocation7 + $0xe0] sm:$0xff]  ;;  %v3854_v17 = vld [vmem:[#allocation7 + $0x148] sm:$0xff] }
 0x8c0   :  { %v5884_v2 = vpack.c.bf16 %v3860_v29, %v3854_v17 }
 0x8c1   :  { %v3788_v19 = vrot.slane %v3781_v54, %v6543_v33  ;;  %v5882_v54 = vpack.c.bf16 %v3847_v45, %v3841_v52 }
 0x8c3   :  { %v3795_v11 = vrot.slane %v3788_v19, %v6543_v33  ;;  %v3853_v19 = vld [vmem:[#allocation7 + $0x140] sm:$0xff] }
 0x8c5   :  { %v3797_v40 = vmul.f32 %v6010_v18, %v3795_v11  ;;  %v3859_v11 = vld [vmem:[#allocation7 + $0x170] sm:$0xff] }
 0x8c7   :  { %v3800_v43 = vadd.f32 %v3798_v10, %v3797_v40  ;;  %v5886_v10 = vpack.c.bf16 %v3859_v11, %v3853_v19 }
 0x8c9   :  { %6013 = vtanh.f32 %v3800_v43 }
 0x8d3   :  { %v6014_v36 = vpop.eup %6013 }
 0x8d4   :  { %v3803_v27 = vmul.f32 %v6014_v36, %v3802_v21 }
 0x8d6   :  { %v7837_v62 = vadd.f32 %v3804_v37, %v3803_v27 }
 0x8d8   :  { %v4014_v20 = vrot.slane %v7837_v62, %v8005_v60  ;;  %v4010_v31 = vrot.slane %v7837_v62, %v8004_v34  ;;  %3807 = vst.msk [vmem:[#allocation9 + $0x6] ss:$8 sm:$0x3] %vm6561_vm0, %v7837_v62 }
 0x8da   :  { %4112 = vmatprep.mubr.f32.mxu1 %v4014_v20  ;;  %4183 = vmatprep.mubr.f32.mxu0 %v4014_v20 }
 0x8db   :  { %4113 = vmatmul.mubr.f32.vlgmr.msra.gmra.mrb[20].mxu1 %v4010_v31  ;;  %4184 = vmatmul.mubr.f32.vlgmr.msra.gmra.mrb[22].mxu0 %v4010_v31 }
 0x8dc   :  { %5875 = vmatpush1.bf16.msra.mxu1 %v5874_v53  ;;  %4254 = vmatprep.mubr.f32.mxu1 %v4014_v20 }
 0x8dd   :  { %5877 = vmatprep.subr.bf16.mxu1 %v5876_v16 }
 0x8e0   :  { %5879 = vmatpush1.bf16.msra.mxu1 %v5878_v1 }
 0x8e1   :  { %5881 = vmatprep.subr.bf16.mxu1 %v5880_v25 }
 0x8e4   :  { %5883 = vmatpush1.bf16.msra.mxu1 %v5882_v54 }
 0x8e5   :  { %5885 = vmatprep.subr.bf16.mxu1 %v5884_v2 }
 0x8e8   :  { %5887 = vmatpush1.bf16.msra.mxu1 %v5886_v10 }
 0x8e9   :  { %5889 = vmatprep.subr.bf16.mxu1 %v7702_v4  ;;  %v4005_v4 = vld [vmem:[%s7904_s4] sm:$0x3f]  ;;  %s3810_s4 = smul.u32 6, %s4397_s12 }
 0x8ea   :  { %v4041_v18 = vrot.slane %v4005_v4, %v8058_v26 }
 0x8eb   :  { %s3811_s0 = scalar_lea.vmem [#allocation6], %s3810_s4 }
 0x8ec   :  { %5891 = vmatpush1.bf16.msra.mxu1 %v7707_v15  ;;  %v4021_v15 = vrot.slane %v4005_v4, %v8004_v34 }
 0x8ed   :  { %5893 = vmatprep.subr.bf16.mxu1 %v7710_v0  ;;  %v4029_v0 = vrot.slane %v4005_v4, %v8153_v50 }
 0x8f0   :  { %5895 = vmatpush1.bf16.msra.mxu1 %v7715_v5  ;;  %v4025_v5 = vrot.slane %v4005_v4, %v8005_v60  ;;  %v3812_v60 = vld [vmem:[%s3811_s0] sm:$0x3f] }
 0x8f1   :  { %5897 = vmatprep.subr.bf16.mxu1 %v7718_v57  ;;  %v4033_v57 = vrot.slane %v4005_v4, %v8154_v51  ;;  %v4037_v51 = vrot.slane %v4005_v4, %v8034_v63  ;;  %v4333_v59 = vrot.slane %v3812_v60, 4 }
 0x8f4   :  { %5899 = vmatpush1.bf16.msra.mxu1 %v7723_v56 }
 0x8f5   :  { %5901 = vmatprep.subr.bf16.mxu1 %v7726_v28 }
 0x8f8   :  { %5903 = vmatpush1.bf16.msra.mxu1 %v7731_v35 }
 0x8f9   :  { %5905 = vmatprep.subr.bf16.mxu1 %v7734_v23 }
 0x8fc   :  { %5907 = vmatpush1.bf16.msra.mxu1 %v7739_v12 }
 0x8fd   :  { %5909 = vmatprep.subr.bf16.mxu1 %v7742_v42 }
 0x900   :  { %5911 = vmatpush1.bf16.msra.mxu1 %v7747_v48 }
 0x901   :  { %5913 = vmatprep.subr.bf16.mxu1 %v7750_v6 }
 0x904   :  { %5915 = vmatpush1.bf16.msra.mxu1 %v7754_v8 }
 0x905   :  { %5917 = vmatprep.subr.bf16.mxu1 %v7757_v49 }
 0x908   :  { %5919 = vmatpush1.bf16.msra.mxu1 %v7760_v41 }
 0x909   :  { %5921 = vmatprep.subr.bf16.mxu1 %v7763_v44 }
 0x90c   :  { %5923 = vmatpush1.bf16.msra.mxu1 %v7766_v32 }
 0x90d   :  { %5925 = vmatprep.subr.bf16.mxu1 %v7769_v58 }
 0x910   :  { %5927 = vmatpush1.bf16.msra.mxu1 %v7772_v47  ;;  %v4287_v47 = vrot.slane %v3812_v60, 2 }
 0x911   :  { %5929 = vmatprep.subr.bf16.mxu1 %v7775_v30 }
 0x914   :  { %5931 = vmatpush1.bf16.msra.mxu1 %v7778_v14 }
 0x915   :  { %5933 = vmatprep.subr.bf16.mxu1 %v7781_v9 }
 0x918   :  { %5935 = vmatpush1.bf16.msra.mxu1 %v7784_v24 }
 0x91b   :  { %4255 = vmatmul.mubr.f32.vlgmr.msra.gmra.mrb[22].mxu1 %v4010_v31 }
 0x9ae   :  { %v4114_v56 = vpop.f32.mrb[20].mxu1  ;;  %v4185_v28 = vpop.f32.mrb[22].mxu0 }
 0x9af   :  { %v4115_v35 = vadd.f32 %v4114_v56, %v4021_v15  ;;  %v4186_v23 = vadd.f32 %v4185_v28, %v4029_v0  ;;  %v4116_v12 = vpop.f32.mrb[21].mxu1  ;;  %v4187_v42 = vpop.f32.mrb[23].mxu0 }
 0x9b0   :  { %v4117_v48 = vadd.f32 %v4116_v12, %v4025_v5  ;;  %v4188_v6 = vadd.f32 %v4187_v42, %v4033_v57 }
 0x9b2   :  { %v4263_v8 = vcombine.low %v4115_v35, %v4117_v48  ;;  %v4291_v49 = vcombine.low %v4186_v23, %v4188_v6 }
 0x9b4   :  { %v4270_v34 = vrot.slane %v4263_v8, %v6543_v33  ;;  %v4298_v32 = vrot.slane %v4291_v49, %v6543_v33 }
 0x9b6   :  { %v4277_v41 = vrot.slane %v4270_v34, %v6543_v33  ;;  %v4305_v30 = vrot.slane %v4298_v32, %v6543_v33 }
 0x9b8   :  { %v4279_v44 = vadd.f32 %v4277_v41, %v3812_v60  ;;  %v4307_v14 = vadd.f32 %v4305_v30, %v4287_v47 }
 0x9ba   :  { %v4398_v58 = vmul.f32 -1.442695, %v4279_v44  ;;  %v4399_v9 = vmul.f32 -1.442695, %v4307_v14 }
 0x9bc   :  { %6015 = vpow2.f32 %v4398_v58 }
 0x9bd   :  { %6017 = vpow2.f32 %v4399_v9 }
 0x9c6   :  { %v6016_v24 = vpop.eup %6015 }
 0x9c7   :  { %v4283_v50 = vadd.f32 1.0, %v6016_v24  ;;  %v6018_v36 = vpop.eup %6017 }
 0x9c8   :  { %v4311_v37 = vadd.f32 1.0, %v6018_v36 }
 0x9c9   :  { %6019 = vrcp.f32 %v4283_v50 }
 0x9ca   :  { %6021 = vrcp.f32 %v4311_v37 }
 0x9d3   :  { %v6020_v38 = vpop.eup %6019 }
 0x9d4   :  { %v6022_v63 = vpop.eup %6021 }
 0x9d5   :  { %v4337_v26 = vsub.f32 1.0, %v6022_v63  ;;  %v4339_v46 = vmul.f32 %v6022_v63, %v7837_v62 }
 0x9ee   :  { %v4256_v40 = vpop.f32.mrb[22].mxu1 }
 0x9ef   :  { %v4257_v43 = vadd.f32 %v4256_v40, %v4037_v51  ;;  %v4258_v13 = vpop.f32.mrb[23].mxu1 }
 0x9f0   :  { %v4259_v21 = vadd.f32 %v4258_v13, %v4041_v18 }
 0x9f2   :  { %v4316_v27 = vcombine.low %v4257_v43, %v4259_v21 }
 0x9f4   :  { %v4323_v22 = vrot.slane %v4316_v27, %v6543_v33 }
 0x9f6   :  { %v4330_v3 = vrot.slane %v4323_v22, %v6543_v33 }
 0x9f8   :  { %v4332_v20 = vmul.f32 %v6020_v38, %v4330_v3 }
 0x9fa   :  { %v4335_v31 = vadd.f32 %v4333_v59, %v4332_v20 }
 0x9fc   :  { %6023 = vtanh.f32 %v4335_v31 }
 0xa06   :  { %v6024_v53 = vpop.eup %6023 }
 0xa07   :  { %v4338_v16 = vmul.f32 %v6024_v53, %v4337_v26 }
 0xa09   :  { %v4340_v61 = vadd.f32 %v4339_v46, %v4338_v16 }
 0xa0b   :  { %4342 = vst.msk [vmem:[#allocation9 + $0x7] ss:$8 sm:$0x3] %vm6561_vm0, %v4340_v61 }
 0xa0c   :  { %6090 = shalt.err (!%p6087_p9)
}
 0xa0d   :  { %s6091_s18 = scalar_lea.hbm %s7905_s5, 256 }
 0xa0e   :  { %p6092_p10 = scmp.ne.s32.totalorder %s7905_s5, %s6091_s18  ;;  %p6095_p11 = scmp.lt.u32.totalorder %s6091_s18, %s7905_s5 }
 0xa10   :  { %p6097_p12 = pnand %p6095_p11, %p6092_p10 }
 0xa12   :  { %6100 = shalt.err (!%p6097_p12)
}
 0xa13   :  { %4353 = dma.vmem_to_hbm [thread:$0]  %s4351_s14, 256, %s7905_s5, [#allocation4]  }
 0xa14   :  { %6107 = dma.done.wait [#allocation4], 256  }
 0xa15   :  { %6108 = vsyncadd [#allocation4], 4294967040 }
 0xa16   :  { %4357 = vsyncpa [#allocation3], 1 }
 0xa17   :  { %4358 = vsyncpa [#allocation8], 1 }
 0xa18   :  { %4359 = vsyncpa [#allocation4], 1 }
 0xa19   :  { %4360 = vsyncpa [#allocation5], 1 }

</bundles_post_ra>
